<compile_context>
chip_gen: v5e
topology: v5e:2x2
jax: 0.10.0
libtpu: 0.0.40
codegen_flags: <defaults>
</compile_context>

<pallas_src>
import jax
import jax.numpy as jnp
from jax import lax
from jax.experimental import pallas as pl
from jax.experimental.pallas import tpu as pltpu

EPS = 1e-5   # nn.InstanceNorm3d default
KS = 3       # kernel size (3x3x3, stride 1, 'same')


def conv_block_3d(x_ncdhw, weight_oidhw, bias=None):
    """ConvBlock3D forward.

    x_ncdhw:      (N, Cin, D, H, W) float32
    weight_oidhw: (Cout, Cin, 3, 3, 3)  (PyTorch Conv3d layout)
    bias:         (Cout,) or None -- unused: a per-channel constant is cancelled
                  exactly by the affine-free InstanceNorm3d mean subtraction.
    returns:      (N, Cout, D, H, W) float32
    """
    del bias  # mathematically a no-op under InstanceNorm3d(affine=False)

    N, Cin, D, H, W = x_ncdhw.shape
    Cout = weight_oidhw.shape[0]
    Dp, Hp, Wp = D + 2, H + 2, W + 2
    P = Dp * Hp * Wp                  # padded spatial volume -> lane axis
    M = Hp * Wp + Wp + 1              # max |flat offset| of a 3x3x3 tap
    Pext = P + 2 * M                  # guard zeros: every tap slice is in-bounds
    K = KS * KS * KS * Cin            # contraction size of the single matmul
    inv_cnt = 1.0 / float(D * H * W)

    # Zero-pad spatial dims ('same' for k=3, s=1), flatten them (layout-preserving
    # reshape, stays NC(P)), and add M guard zeros on each side of the flat axis.
    xp = jnp.pad(x_ncdhw.astype(jnp.float32),
                 ((0, 0), (0, 0), (1, 1), (1, 1), (1, 1)))
    xf = jnp.pad(xp.reshape(N, Cin, P), ((0, 0), (0, 0), (M, M)))

    # Weight as one (Cout, 27*Cin) matrix, tap-major / channel-minor, matching the
    # im2col row order built in the kernel.
    w2 = jnp.transpose(weight_oidhw.astype(jnp.float32),
                       (0, 2, 3, 4, 1)).reshape(Cout, K)

    # 0/1 validity mask over the padded-flat spatial axis (1 at interior voxels).
    mask = jnp.zeros((Dp, Hp, Wp), jnp.float32)
    mask = mask.at[1:1 + D, 1:1 + H, 1:1 + W].set(1.0).reshape(1, P)

    def kernel(mask_ref, x_ref, w_ref, o_ref, patch_ref):
        # ---- im2col into a lane-dense VMEM scratch -----------------------------
        # Row block k = (kd, kh, kw) is the (Cin, P) activation slab shifted by that
        # tap's flat offset (a contiguous lane slice of the guarded flat input).
        for kd in range(KS):
            for kh in range(KS):
                for kw in range(KS):
                    k = (kd * KS + kh) * KS + kw
                    s = kd * (Hp * Wp) + kh * Wp + kw
                    patch_ref[k * Cin:(k + 1) * Cin, :] = x_ref[0, :, s:s + P]

        # ---- single MXU matmul: (Cout, 27*Cin) @ (27*Cin, P) -> (Cout, P) ------
        acc = jnp.dot(w_ref[...], patch_ref[...],
                      preferred_element_type=jnp.float32)

        # ---- InstanceNorm3d (no affine) over valid positions, then ReLU --------
        m = mask_ref[...]                                          # (1, P)
        mean = jnp.sum(acc * m, axis=1, keepdims=True) * inv_cnt   # (Cout, 1)
        centered = acc - mean                                      # reused below
        cm = centered * m
        var = jnp.sum(cm * cm, axis=1, keepdims=True) * inv_cnt
        y = jnp.maximum(centered * lax.rsqrt(var + EPS), 0.0)
        o_ref[0] = y.astype(o_ref.dtype)

    flops = 2 * N * D * H * W * K * Cout
    bytes_accessed = 4 * (N * Cin * Pext + N * Cout * P + Cout * K + P)

    # TODO(synk): for large D*H*W, tile the flat spatial axis with a second
    # 'parallel' grid dimension and a two-pass (sum / sum-of-squares) InstanceNorm
    # so the im2col scratch stays within VMEM (64 MiB on v7x).
    out_flat = pl.pallas_call(
        kernel,
        out_shape=jax.ShapeDtypeStruct((N, Cout, P), jnp.float32),
        grid_spec=pltpu.PrefetchScalarGridSpec(
            num_scalar_prefetch=0,
            grid=(N,),
            in_specs=[
                pl.BlockSpec((1, P), lambda n: (0, 0)),             # mask (resident)
                pl.BlockSpec((1, Cin, Pext), lambda n: (n, 0, 0)),  # activations
                pl.BlockSpec((Cout, K), lambda n: (0, 0)),          # weights
            ],
            out_specs=pl.BlockSpec((1, Cout, P), lambda n: (n, 0, 0)),
            scratch_shapes=[pltpu.VMEM((K, P), jnp.float32)],       # im2col patches
        ),
        compiler_params=pltpu.CompilerParams(
            dimension_semantics=("parallel",)),
        cost_estimate=pl.CostEstimate(flops=flops,
                                      transcendentals=N * Cout,
                                      bytes_accessed=bytes_accessed),
    )(mask, xf, w2)

    # Un-flatten the padded grid and drop the (discarded) border positions.
    return out_flat.reshape(N, Cout, Dp, Hp, Wp)[:, :, 1:1 + D, 1:1 + H, 1:1 + W]


def _reference(x_ncdhw, weight_oidhw, bias):
    """Pure-JAX reference replicating the PyTorch module semantics (with bias)."""
    y = lax.conv_general_dilated(
        x_ncdhw, weight_oidhw, window_strides=(1, 1, 1), padding='SAME',
        dimension_numbers=('NCDHW', 'OIDHW', 'NCDHW'))
    y = y + bias[None, :, None, None, None]
    mean = jnp.mean(y, axis=(2, 3, 4), keepdims=True)
    var = jnp.mean((y - mean) ** 2, axis=(2, 3, 4), keepdims=True)
    y = (y - mean) * lax.rsqrt(var + EPS)
    return jnp.maximum(y, 0.0)


if __name__ == "__main__":
    N, Cin, Cout = 2, 4, 8
    D = H = W = 8

    key = jax.random.PRNGKey(0)
    k_w, k_b, k_x = jax.random.split(key, 3)
    # nn.Conv3d(Cin, Cout, 3, bias=True) parameter shapes (OIDHW) + NCDHW input.
    weight = jax.random.normal(k_w, (Cout, Cin, 3, 3, 3), jnp.float32) * 0.1
    bias = jax.random.normal(k_b, (Cout,), jnp.float32) * 0.1
    x = jax.random.normal(k_x, (N, Cin, D, H, W), jnp.float32)

    fwd = jax.jit(conv_block_3d)
    out = jax.block_until_ready(fwd(x, weight, bias))

    ref = jax.block_until_ready(_reference(x, weight, bias))
    assert out.shape == (N, Cout, D, H, W)
    assert jnp.allclose(out, ref, atol=1e-4, rtol=1e-4)

    print("KERNEL_OK")
</pallas_src>

<mosaic_0001>
module attributes {stable_mosaic.version = 11 : i64} {
  func.func @kernel(%arg0: i32, %arg1: memref<1x1000xf32, #tpu.memory_space<vmem>>, %arg2: memref<1x4x1222xf32, #tpu.memory_space<vmem>>, %arg3: memref<8x108xf32, #tpu.memory_space<vmem>>, %arg4: memref<1x8x1000xf32, #tpu.memory_space<vmem>>, %arg5: memref<108x1000xf32, #tpu.memory_space<vmem>>) attributes {dimension_semantics = [#tpu.dimension_semantics<parallel>], iteration_bounds = array<i64: 2>, scalar_prefetch = 0 : i64, scratch_operands = 1 : i64, tpu.core_type = #tpu.core_type<tc>, window_params = [{pipeline_mode = #tpu.pipeline_mode<synchronous>, transform_indices = @transform_0, window_bounds = array<i64: 1, 1000>}, {transform_indices = @transform_1, window_bounds = array<i64: 1, 4, 1222>}, {pipeline_mode = #tpu.pipeline_mode<synchronous>, transform_indices = @transform_2, window_bounds = array<i64: 8, 108>}, {transform_indices = @transform_3, window_bounds = array<i64: 1, 8, 1000>}]} {
    %c0 = arith.constant 0 : index
    %c0_0 = arith.constant 0 : index
    %c0_1 = arith.constant 0 : index
    %0 = vector.load %arg2[%c0, %c0_0, %c0_1] : memref<1x4x1222xf32, #tpu.memory_space<vmem>>, vector<1x4x1000xf32>
    %1 = vector.shape_cast %0 : vector<1x4x1000xf32> to vector<4x1000xf32>
    %c0_2 = arith.constant 0 : index
    %c0_3 = arith.constant 0 : index
    %2 = vector.load %arg5[%c0_2, %c0_3] : memref<108x1000xf32, #tpu.memory_space<vmem>>, vector<4x1000xf32>
    tpu.vector_store %arg5[%c0_2, %c0_3], %1 {strides = array<i32>} : memref<108x1000xf32, #tpu.memory_space<vmem>>, vector<4x1000xf32>,
    %c0_4 = arith.constant 0 : index
    %c0_5 = arith.constant 0 : index
    %c1 = arith.constant 1 : index
    %3 = vector.load %arg2[%c0_4, %c0_5, %c1] : memref<1x4x1222xf32, #tpu.memory_space<vmem>>, vector<1x4x1000xf32>
    %4 = vector.shape_cast %3 : vector<1x4x1000xf32> to vector<4x1000xf32>
    %c4 = arith.constant 4 : index
    %c0_6 = arith.constant 0 : index
    %5 = vector.load %arg5[%c4, %c0_6] : memref<108x1000xf32, #tpu.memory_space<vmem>>, vector<4x1000xf32>
    tpu.vector_store %arg5[%c4, %c0_6], %4 {strides = array<i32>} : memref<108x1000xf32, #tpu.memory_space<vmem>>, vector<4x1000xf32>,
    %c0_7 = arith.constant 0 : index
    %c0_8 = arith.constant 0 : index
    %c2 = arith.constant 2 : index
    %6 = vector.load %arg2[%c0_7, %c0_8, %c2] : memref<1x4x1222xf32, #tpu.memory_space<vmem>>, vector<1x4x1000xf32>
    %7 = vector.shape_cast %6 : vector<1x4x1000xf32> to vector<4x1000xf32>
    %c8 = arith.constant 8 : index
    %c0_9 = arith.constant 0 : index
    %8 = vector.load %arg5[%c8, %c0_9] : memref<108x1000xf32, #tpu.memory_space<vmem>>, vector<4x1000xf32>
    tpu.vector_store %arg5[%c8, %c0_9], %7 {strides = array<i32>} : memref<108x1000xf32, #tpu.memory_space<vmem>>, vector<4x1000xf32>,
    %c0_10 = arith.constant 0 : index
    %c0_11 = arith.constant 0 : index
    %c10 = arith.constant 10 : index
    %9 = vector.load %arg2[%c0_10, %c0_11, %c10] : memref<1x4x1222xf32, #tpu.memory_space<vmem>>, vector<1x4x1000xf32>
    %10 = vector.shape_cast %9 : vector<1x4x1000xf32> to vector<4x1000xf32>
    %c12 = arith.constant 12 : index
    %c0_12 = arith.constant 0 : index
    %11 = vector.load %arg5[%c12, %c0_12] : memref<108x1000xf32, #tpu.memory_space<vmem>>, vector<4x1000xf32>
    tpu.vector_store %arg5[%c12, %c0_12], %10 {strides = array<i32>} : memref<108x1000xf32, #tpu.memory_space<vmem>>, vector<4x1000xf32>,
    %c0_13 = arith.constant 0 : index
    %c0_14 = arith.constant 0 : index
    %c11 = arith.constant 11 : index
    %12 = vector.load %arg2[%c0_13, %c0_14, %c11] : memref<1x4x1222xf32, #tpu.memory_space<vmem>>, vector<1x4x1000xf32>
    %13 = vector.shape_cast %12 : vector<1x4x1000xf32> to vector<4x1000xf32>
    %c16 = arith.constant 16 : index
    %c0_15 = arith.constant 0 : index
    %14 = vector.load %arg5[%c16, %c0_15] : memref<108x1000xf32, #tpu.memory_space<vmem>>, vector<4x1000xf32>
    tpu.vector_store %arg5[%c16, %c0_15], %13 {strides = array<i32>} : memref<108x1000xf32, #tpu.memory_space<vmem>>, vector<4x1000xf32>,
    %c0_16 = arith.constant 0 : index
    %c0_17 = arith.constant 0 : index
    %c12_18 = arith.constant 12 : index
    %15 = vector.load %arg2[%c0_16, %c0_17, %c12_18] : memref<1x4x1222xf32, #tpu.memory_space<vmem>>, vector<1x4x1000xf32>
    %16 = vector.shape_cast %15 : vector<1x4x1000xf32> to vector<4x1000xf32>
    %c20 = arith.constant 20 : index
    %c0_19 = arith.constant 0 : index
    %17 = vector.load %arg5[%c20, %c0_19] : memref<108x1000xf32, #tpu.memory_space<vmem>>, vector<4x1000xf32>
    tpu.vector_store %arg5[%c20, %c0_19], %16 {strides = array<i32>} : memref<108x1000xf32, #tpu.memory_space<vmem>>, vector<4x1000xf32>,
    %c0_20 = arith.constant 0 : index
    %c0_21 = arith.constant 0 : index
    %c20_22 = arith.constant 20 : index
    %18 = vector.load %arg2[%c0_20, %c0_21, %c20_22] : memref<1x4x1222xf32, #tpu.memory_space<vmem>>, vector<1x4x1000xf32>
    %19 = vector.shape_cast %18 : vector<1x4x1000xf32> to vector<4x1000xf32>
    %c24 = arith.constant 24 : index
    %c0_23 = arith.constant 0 : index
    %20 = vector.load %arg5[%c24, %c0_23] : memref<108x1000xf32, #tpu.memory_space<vmem>>, vector<4x1000xf32>
    tpu.vector_store %arg5[%c24, %c0_23], %19 {strides = array<i32>} : memref<108x1000xf32, #tpu.memory_space<vmem>>, vector<4x1000xf32>,
    %c0_24 = arith.constant 0 : index
    %c0_25 = arith.constant 0 : index
    %c21 = arith.constant 21 : index
    %21 = vector.load %arg2[%c0_24, %c0_25, %c21] : memref<1x4x1222xf32, #tpu.memory_space<vmem>>, vector<1x4x1000xf32>
    %22 = vector.shape_cast %21 : vector<1x4x1000xf32> to vector<4x1000xf32>
    %c28 = arith.constant 28 : index
    %c0_26 = arith.constant 0 : index
    %23 = vector.load %arg5[%c28, %c0_26] : memref<108x1000xf32, #tpu.memory_space<vmem>>, vector<4x1000xf32>
    tpu.vector_store %arg5[%c28, %c0_26], %22 {strides = array<i32>} : memref<108x1000xf32, #tpu.memory_space<vmem>>, vector<4x1000xf32>,
    %c0_27 = arith.constant 0 : index
    %c0_28 = arith.constant 0 : index
    %c22 = arith.constant 22 : index
    %24 = vector.load %arg2[%c0_27, %c0_28, %c22] : memref<1x4x1222xf32, #tpu.memory_space<vmem>>, vector<1x4x1000xf32>
    %25 = vector.shape_cast %24 : vector<1x4x1000xf32> to vector<4x1000xf32>
    %c32 = arith.constant 32 : index
    %c0_29 = arith.constant 0 : index
    %26 = vector.load %arg5[%c32, %c0_29] : memref<108x1000xf32, #tpu.memory_space<vmem>>, vector<4x1000xf32>
    tpu.vector_store %arg5[%c32, %c0_29], %25 {strides = array<i32>} : memref<108x1000xf32, #tpu.memory_space<vmem>>, vector<4x1000xf32>,
    %c0_30 = arith.constant 0 : index
    %c0_31 = arith.constant 0 : index
    %c100 = arith.constant 100 : index
    %27 = vector.load %arg2[%c0_30, %c0_31, %c100] : memref<1x4x1222xf32, #tpu.memory_space<vmem>>, vector<1x4x1000xf32>
    %28 = vector.shape_cast %27 : vector<1x4x1000xf32> to vector<4x1000xf32>
    %c36 = arith.constant 36 : index
    %c0_32 = arith.constant 0 : index
    %29 = vector.load %arg5[%c36, %c0_32] : memref<108x1000xf32, #tpu.memory_space<vmem>>, vector<4x1000xf32>
    tpu.vector_store %arg5[%c36, %c0_32], %28 {strides = array<i32>} : memref<108x1000xf32, #tpu.memory_space<vmem>>, vector<4x1000xf32>,
    %c0_33 = arith.constant 0 : index
    %c0_34 = arith.constant 0 : index
    %c101 = arith.constant 101 : index
    %30 = vector.load %arg2[%c0_33, %c0_34, %c101] : memref<1x4x1222xf32, #tpu.memory_space<vmem>>, vector<1x4x1000xf32>
    %31 = vector.shape_cast %30 : vector<1x4x1000xf32> to vector<4x1000xf32>
    %c40 = arith.constant 40 : index
    %c0_35 = arith.constant 0 : index
    %32 = vector.load %arg5[%c40, %c0_35] : memref<108x1000xf32, #tpu.memory_space<vmem>>, vector<4x1000xf32>
    tpu.vector_store %arg5[%c40, %c0_35], %31 {strides = array<i32>} : memref<108x1000xf32, #tpu.memory_space<vmem>>, vector<4x1000xf32>,
    %c0_36 = arith.constant 0 : index
    %c0_37 = arith.constant 0 : index
    %c102 = arith.constant 102 : index
    %33 = vector.load %arg2[%c0_36, %c0_37, %c102] : memref<1x4x1222xf32, #tpu.memory_space<vmem>>, vector<1x4x1000xf32>
    %34 = vector.shape_cast %33 : vector<1x4x1000xf32> to vector<4x1000xf32>
    %c44 = arith.constant 44 : index
    %c0_38 = arith.constant 0 : index
    %35 = vector.load %arg5[%c44, %c0_38] : memref<108x1000xf32, #tpu.memory_space<vmem>>, vector<4x1000xf32>
    tpu.vector_store %arg5[%c44, %c0_38], %34 {strides = array<i32>} : memref<108x1000xf32, #tpu.memory_space<vmem>>, vector<4x1000xf32>,
    %c0_39 = arith.constant 0 : index
    %c0_40 = arith.constant 0 : index
    %c110 = arith.constant 110 : index
    %36 = vector.load %arg2[%c0_39, %c0_40, %c110] : memref<1x4x1222xf32, #tpu.memory_space<vmem>>, vector<1x4x1000xf32>
    %37 = vector.shape_cast %36 : vector<1x4x1000xf32> to vector<4x1000xf32>
    %c48 = arith.constant 48 : index
    %c0_41 = arith.constant 0 : index
    %38 = vector.load %arg5[%c48, %c0_41] : memref<108x1000xf32, #tpu.memory_space<vmem>>, vector<4x1000xf32>
    tpu.vector_store %arg5[%c48, %c0_41], %37 {strides = array<i32>} : memref<108x1000xf32, #tpu.memory_space<vmem>>, vector<4x1000xf32>,
    %c0_42 = arith.constant 0 : index
    %c0_43 = arith.constant 0 : index
    %c111 = arith.constant 111 : index
    %39 = vector.load %arg2[%c0_42, %c0_43, %c111] : memref<1x4x1222xf32, #tpu.memory_space<vmem>>, vector<1x4x1000xf32>
    %40 = vector.shape_cast %39 : vector<1x4x1000xf32> to vector<4x1000xf32>
    %c52 = arith.constant 52 : index
    %c0_44 = arith.constant 0 : index
    %41 = vector.load %arg5[%c52, %c0_44] : memref<108x1000xf32, #tpu.memory_space<vmem>>, vector<4x1000xf32>
    tpu.vector_store %arg5[%c52, %c0_44], %40 {strides = array<i32>} : memref<108x1000xf32, #tpu.memory_space<vmem>>, vector<4x1000xf32>,
    %c0_45 = arith.constant 0 : index
    %c0_46 = arith.constant 0 : index
    %c112 = arith.constant 112 : index
    %42 = vector.load %arg2[%c0_45, %c0_46, %c112] : memref<1x4x1222xf32, #tpu.memory_space<vmem>>, vector<1x4x1000xf32>
    %43 = vector.shape_cast %42 : vector<1x4x1000xf32> to vector<4x1000xf32>
    %c56 = arith.constant 56 : index
    %c0_47 = arith.constant 0 : index
    %44 = vector.load %arg5[%c56, %c0_47] : memref<108x1000xf32, #tpu.memory_space<vmem>>, vector<4x1000xf32>
    tpu.vector_store %arg5[%c56, %c0_47], %43 {strides = array<i32>} : memref<108x1000xf32, #tpu.memory_space<vmem>>, vector<4x1000xf32>,
    %c0_48 = arith.constant 0 : index
    %c0_49 = arith.constant 0 : index
    %c120 = arith.constant 120 : index
    %45 = vector.load %arg2[%c0_48, %c0_49, %c120] : memref<1x4x1222xf32, #tpu.memory_space<vmem>>, vector<1x4x1000xf32>
    %46 = vector.shape_cast %45 : vector<1x4x1000xf32> to vector<4x1000xf32>
    %c60 = arith.constant 60 : index
    %c0_50 = arith.constant 0 : index
    %47 = vector.load %arg5[%c60, %c0_50] : memref<108x1000xf32, #tpu.memory_space<vmem>>, vector<4x1000xf32>
    tpu.vector_store %arg5[%c60, %c0_50], %46 {strides = array<i32>} : memref<108x1000xf32, #tpu.memory_space<vmem>>, vector<4x1000xf32>,
    %c0_51 = arith.constant 0 : index
    %c0_52 = arith.constant 0 : index
    %c121 = arith.constant 121 : index
    %48 = vector.load %arg2[%c0_51, %c0_52, %c121] : memref<1x4x1222xf32, #tpu.memory_space<vmem>>, vector<1x4x1000xf32>
    %49 = vector.shape_cast %48 : vector<1x4x1000xf32> to vector<4x1000xf32>
    %c64 = arith.constant 64 : index
    %c0_53 = arith.constant 0 : index
    %50 = vector.load %arg5[%c64, %c0_53] : memref<108x1000xf32, #tpu.memory_space<vmem>>, vector<4x1000xf32>
    tpu.vector_store %arg5[%c64, %c0_53], %49 {strides = array<i32>} : memref<108x1000xf32, #tpu.memory_space<vmem>>, vector<4x1000xf32>,
    %c0_54 = arith.constant 0 : index
    %c0_55 = arith.constant 0 : index
    %c122 = arith.constant 122 : index
    %51 = vector.load %arg2[%c0_54, %c0_55, %c122] : memref<1x4x1222xf32, #tpu.memory_space<vmem>>, vector<1x4x1000xf32>
    %52 = vector.shape_cast %51 : vector<1x4x1000xf32> to vector<4x1000xf32>
    %c68 = arith.constant 68 : index
    %c0_56 = arith.constant 0 : index
    %53 = vector.load %arg5[%c68, %c0_56] : memref<108x1000xf32, #tpu.memory_space<vmem>>, vector<4x1000xf32>
    tpu.vector_store %arg5[%c68, %c0_56], %52 {strides = array<i32>} : memref<108x1000xf32, #tpu.memory_space<vmem>>, vector<4x1000xf32>,
    %c0_57 = arith.constant 0 : index
    %c0_58 = arith.constant 0 : index
    %c200 = arith.constant 200 : index
    %54 = vector.load %arg2[%c0_57, %c0_58, %c200] : memref<1x4x1222xf32, #tpu.memory_space<vmem>>, vector<1x4x1000xf32>
    %55 = vector.shape_cast %54 : vector<1x4x1000xf32> to vector<4x1000xf32>
    %c72 = arith.constant 72 : index
    %c0_59 = arith.constant 0 : index
    %56 = vector.load %arg5[%c72, %c0_59] : memref<108x1000xf32, #tpu.memory_space<vmem>>, vector<4x1000xf32>
    tpu.vector_store %arg5[%c72, %c0_59], %55 {strides = array<i32>} : memref<108x1000xf32, #tpu.memory_space<vmem>>, vector<4x1000xf32>,
    %c0_60 = arith.constant 0 : index
    %c0_61 = arith.constant 0 : index
    %c201 = arith.constant 201 : index
    %57 = vector.load %arg2[%c0_60, %c0_61, %c201] : memref<1x4x1222xf32, #tpu.memory_space<vmem>>, vector<1x4x1000xf32>
    %58 = vector.shape_cast %57 : vector<1x4x1000xf32> to vector<4x1000xf32>
    %c76 = arith.constant 76 : index
    %c0_62 = arith.constant 0 : index
    %59 = vector.load %arg5[%c76, %c0_62] : memref<108x1000xf32, #tpu.memory_space<vmem>>, vector<4x1000xf32>
    tpu.vector_store %arg5[%c76, %c0_62], %58 {strides = array<i32>} : memref<108x1000xf32, #tpu.memory_space<vmem>>, vector<4x1000xf32>,
    %c0_63 = arith.constant 0 : index
    %c0_64 = arith.constant 0 : index
    %c202 = arith.constant 202 : index
    %60 = vector.load %arg2[%c0_63, %c0_64, %c202] : memref<1x4x1222xf32, #tpu.memory_space<vmem>>, vector<1x4x1000xf32>
    %61 = vector.shape_cast %60 : vector<1x4x1000xf32> to vector<4x1000xf32>
    %c80 = arith.constant 80 : index
    %c0_65 = arith.constant 0 : index
    %62 = vector.load %arg5[%c80, %c0_65] : memref<108x1000xf32, #tpu.memory_space<vmem>>, vector<4x1000xf32>
    tpu.vector_store %arg5[%c80, %c0_65], %61 {strides = array<i32>} : memref<108x1000xf32, #tpu.memory_space<vmem>>, vector<4x1000xf32>,
    %c0_66 = arith.constant 0 : index
    %c0_67 = arith.constant 0 : index
    %c210 = arith.constant 210 : index
    %63 = vector.load %arg2[%c0_66, %c0_67, %c210] : memref<1x4x1222xf32, #tpu.memory_space<vmem>>, vector<1x4x1000xf32>
    %64 = vector.shape_cast %63 : vector<1x4x1000xf32> to vector<4x1000xf32>
    %c84 = arith.constant 84 : index
    %c0_68 = arith.constant 0 : index
    %65 = vector.load %arg5[%c84, %c0_68] : memref<108x1000xf32, #tpu.memory_space<vmem>>, vector<4x1000xf32>
    tpu.vector_store %arg5[%c84, %c0_68], %64 {strides = array<i32>} : memref<108x1000xf32, #tpu.memory_space<vmem>>, vector<4x1000xf32>,
    %c0_69 = arith.constant 0 : index
    %c0_70 = arith.constant 0 : index
    %c211 = arith.constant 211 : index
    %66 = vector.load %arg2[%c0_69, %c0_70, %c211] : memref<1x4x1222xf32, #tpu.memory_space<vmem>>, vector<1x4x1000xf32>
    %67 = vector.shape_cast %66 : vector<1x4x1000xf32> to vector<4x1000xf32>
    %c88 = arith.constant 88 : index
    %c0_71 = arith.constant 0 : index
    %68 = vector.load %arg5[%c88, %c0_71] : memref<108x1000xf32, #tpu.memory_space<vmem>>, vector<4x1000xf32>
    tpu.vector_store %arg5[%c88, %c0_71], %67 {strides = array<i32>} : memref<108x1000xf32, #tpu.memory_space<vmem>>, vector<4x1000xf32>,
    %c0_72 = arith.constant 0 : index
    %c0_73 = arith.constant 0 : index
    %c212 = arith.constant 212 : index
    %69 = vector.load %arg2[%c0_72, %c0_73, %c212] : memref<1x4x1222xf32, #tpu.memory_space<vmem>>, vector<1x4x1000xf32>
    %70 = vector.shape_cast %69 : vector<1x4x1000xf32> to vector<4x1000xf32>
    %c92 = arith.constant 92 : index
    %c0_74 = arith.constant 0 : index
    %71 = vector.load %arg5[%c92, %c0_74] : memref<108x1000xf32, #tpu.memory_space<vmem>>, vector<4x1000xf32>
    tpu.vector_store %arg5[%c92, %c0_74], %70 {strides = array<i32>} : memref<108x1000xf32, #tpu.memory_space<vmem>>, vector<4x1000xf32>,
    %c0_75 = arith.constant 0 : index
    %c0_76 = arith.constant 0 : index
    %c220 = arith.constant 220 : index
    %72 = vector.load %arg2[%c0_75, %c0_76, %c220] : memref<1x4x1222xf32, #tpu.memory_space<vmem>>, vector<1x4x1000xf32>
    %73 = vector.shape_cast %72 : vector<1x4x1000xf32> to vector<4x1000xf32>
    %c96 = arith.constant 96 : index
    %c0_77 = arith.constant 0 : index
    %74 = vector.load %arg5[%c96, %c0_77] : memref<108x1000xf32, #tpu.memory_space<vmem>>, vector<4x1000xf32>
    tpu.vector_store %arg5[%c96, %c0_77], %73 {strides = array<i32>} : memref<108x1000xf32, #tpu.memory_space<vmem>>, vector<4x1000xf32>,
    %c0_78 = arith.constant 0 : index
    %c0_79 = arith.constant 0 : index
    %c221 = arith.constant 221 : index
    %75 = vector.load %arg2[%c0_78, %c0_79, %c221] : memref<1x4x1222xf32, #tpu.memory_space<vmem>>, vector<1x4x1000xf32>
    %76 = vector.shape_cast %75 : vector<1x4x1000xf32> to vector<4x1000xf32>
    %c100_80 = arith.constant 100 : index
    %c0_81 = arith.constant 0 : index
    %77 = vector.load %arg5[%c100_80, %c0_81] : memref<108x1000xf32, #tpu.memory_space<vmem>>, vector<4x1000xf32>
    tpu.vector_store %arg5[%c100_80, %c0_81], %76 {strides = array<i32>} : memref<108x1000xf32, #tpu.memory_space<vmem>>, vector<4x1000xf32>,
    %c0_82 = arith.constant 0 : index
    %c0_83 = arith.constant 0 : index
    %c222 = arith.constant 222 : index
    %78 = vector.load %arg2[%c0_82, %c0_83, %c222] : memref<1x4x1222xf32, #tpu.memory_space<vmem>>, vector<1x4x1000xf32>
    %79 = vector.shape_cast %78 : vector<1x4x1000xf32> to vector<4x1000xf32>
    %c104 = arith.constant 104 : index
    %c0_84 = arith.constant 0 : index
    %80 = vector.load %arg5[%c104, %c0_84] : memref<108x1000xf32, #tpu.memory_space<vmem>>, vector<4x1000xf32>
    tpu.vector_store %arg5[%c104, %c0_84], %79 {strides = array<i32>} : memref<108x1000xf32, #tpu.memory_space<vmem>>, vector<4x1000xf32>,
    %c0_85 = arith.constant 0 : index
    %c0_86 = arith.constant 0 : index
    %81 = vector.load %arg3[%c0_85, %c0_86] : memref<8x108xf32, #tpu.memory_space<vmem>>, vector<8x108xf32>
    %c0_87 = arith.constant 0 : index
    %c0_88 = arith.constant 0 : index
    %82 = vector.load %arg5[%c0_87, %c0_88] : memref<108x1000xf32, #tpu.memory_space<vmem>>, vector<108x1000xf32>
    %cst = arith.constant dense<0.000000e+00> : vector<8x1000xf32>
    %83 = tpu.matmul %81, %82, %cst {dimension_numbers = #tpu.dot_dimension_numbers<[1], [0], [0], [1], [0, 0, 1, 1], [], []>} : vector<8x108xf32>, vector<108x1000xf32>, vector<8x1000xf32> -> vector<8x1000xf32>
    %c0_89 = arith.constant 0 : index
    %c0_90 = arith.constant 0 : index
    %84 = vector.load %arg1[%c0_89, %c0_90] : memref<1x1000xf32, #tpu.memory_space<vmem>>, vector<1x1000xf32>
    %85 = vector.broadcast %84 : vector<1x1000xf32> to vector<8x1000xf32>
    %86 = arith.mulf %83, %85 : vector<8x1000xf32>
    %cst_91 = arith.constant dense<0.000000e+00> : vector<8xf32>
    %87 = vector.multi_reduction <add>, %86, %cst_91 [1] : vector<8x1000xf32> to vector<8xf32>
    %88 = vector.shape_cast %87 : vector<8xf32> to vector<8x1xf32>
    %cst_92 = arith.constant 0.001953125 : f32
    %89 = vector.broadcast %cst_92 : f32 to vector<8x1xf32>
    %90 = arith.mulf %88, %89 : vector<8x1xf32>
    %91 = vector.broadcast %90 : vector<8x1xf32> to vector<8x1000xf32>
    %92 = arith.subf %83, %91 : vector<8x1000xf32>
    %93 = vector.broadcast %84 : vector<1x1000xf32> to vector<8x1000xf32>
    %94 = arith.mulf %92, %93 : vector<8x1000xf32>
    %95 = arith.mulf %94, %94 : vector<8x1000xf32>
    %cst_93 = arith.constant dense<0.000000e+00> : vector<8xf32>
    %96 = vector.multi_reduction <add>, %95, %cst_93 [1] : vector<8x1000xf32> to vector<8xf32>
    %97 = vector.shape_cast %96 : vector<8xf32> to vector<8x1xf32>
    %cst_94 = arith.constant 0.001953125 : f32
    %98 = vector.broadcast %cst_94 : f32 to vector<8x1xf32>
    %99 = arith.mulf %97, %98 : vector<8x1xf32>
    %cst_95 = arith.constant 9.99999974E-6 : f32
    %100 = vector.broadcast %cst_95 : f32 to vector<8x1xf32>
    %101 = arith.addf %99, %100 : vector<8x1xf32>
    %102 = math.rsqrt %101 : vector<8x1xf32>
    %103 = vector.broadcast %102 : vector<8x1xf32> to vector<8x1000xf32>
    %104 = arith.mulf %92, %103 : vector<8x1000xf32>
    %cst_96 = arith.constant 0.000000e+00 : f32
    %105 = vector.broadcast %cst_96 : f32 to vector<8x1000xf32>
    %106 = arith.maximumf %104, %105 : vector<8x1000xf32>
    %c0_97 = arith.constant 0 : index
    %c0_98 = arith.constant 0 : index
    %c0_99 = arith.constant 0 : index
    %107 = vector.load %arg4[%c0_97, %c0_98, %c0_99] : memref<1x8x1000xf32, #tpu.memory_space<vmem>>, vector<1x8x1000xf32>
    %108 = vector.shape_cast %107 : vector<1x8x1000xf32> to vector<8x1000xf32>
    %109 = vector.shape_cast %106 : vector<8x1000xf32> to vector<1x8x1000xf32>
    tpu.vector_store %arg4[%c0_97, %c0_98, %c0_99], %109 {strides = array<i32>} : memref<1x8x1000xf32, #tpu.memory_space<vmem>>, vector<1x8x1000xf32>,
    return
  }
  func.func @transform_0(%arg0: i32) -> (i32, i32) {
    %c0_i32 = arith.constant 0 : i32
    %c0_i32_0 = arith.constant 0 : i32
    %c0_i32_1 = arith.constant 0 : i32
    return %c0_i32, %c0_i32_0 : i32, i32
  }
  func.func @transform_1(%arg0: i32) -> (i32, i32, i32) {
    %c0_i32 = arith.constant 0 : i32
    %c0_i32_0 = arith.constant 0 : i32
    %c0_i32_1 = arith.constant 0 : i32
    return %arg0, %c0_i32, %c0_i32_0 : i32, i32, i32
  }
  func.func @transform_2(%arg0: i32) -> (i32, i32) {
    %c0_i32 = arith.constant 0 : i32
    %c0_i32_0 = arith.constant 0 : i32
    %c0_i32_1 = arith.constant 0 : i32
    return %c0_i32, %c0_i32_0 : i32, i32
  }
  func.func @transform_3(%arg0: i32) -> (i32, i32, i32) {
    %c0_i32 = arith.constant 0 : i32
    %c0_i32_0 = arith.constant 0 : i32
    %c0_i32_1 = arith.constant 0 : i32
    return %arg0, %c0_i32, %c0_i32_0 : i32, i32, i32
  }
}

</mosaic_0001>

<bundles_post_ra>
// kernel: conv_block_3d.1
= control target key start
LH: loop header
LB: loop body
LE: loop exit
PB: predicated region body
PF: predicated region fallthrough
CT: control target
= control target key end

     0   :  { %s2571_s12 = smov 0   ;;  %s3989_s0 = inlined_call_operand.vmem [shape: f32[1,1000], index: 0, kind: input, shape index: {}]   ;;  %s3990_s1 = inlined_call_operand.vmem [shape: f32[2,4,1222], index: 1, kind: input, shape index: {}]   ;;  %s3991_s2 = inlined_call_operand.vmem [shape: f32[8,108], index: 2, kind: input, shape index: {}]   ;;  %s3992_s3 = inlined_call_operand.vmem [shape: f32[2,8,1000], index: 3, kind: output, shape index: {}]  }
   0x1 LB: > { %s2453_s13 = sadd.s32 4294967295, %s2523_s12   ;;  %p2457_p0 = scmp.ge.s32.totalorder %s2523_s12, 1  ;;  %s2523_s12 = sphi %s2571_s12, %s13_s12  }
   0x2   : > { %p137_p1 = scmp.lt.s32.totalorder %s2523_s12, 3 }
   0x4   : > { %p138_p2 = pnand %p2457_p0, %p137_p1 }
   0x6   : > { %141 = sbr.rel (%p138_p2) target bundleno = 1246 (0x4de), region = 32 }
   0xb   : > { %p161_p3 = scmp.lt.s32.totalorder %s2453_s13, 1  ;;  %s2525_s18 = smov 127   ;;  %vm251_vm0 = vcmask 1039360   ;;  %vm209_vm1 = vcmask 846848   ;;  %vm274_vm2 = vcmask 850948   ;;  %vm315_vm3 = vcmask 1031168  }
   0xc   : > { %s2526_s19 = smov 126   ;;  %s2527_s20 = smov 118   ;;  %vm379_vm4 = vcmask 965632   ;;  %vm442_vm5 = vcmask 957440   ;;  %vm506_vm6 = vcmask 949248   ;;  %vm569_vm7 = vcmask 883712  }
   0xd   : > { %s4068_s13 = smov (!%p161_p3, %s2453_s13), 1  ;;  %s2528_s21 = smov 117   ;;  %vm633_vm8 = vcmask 875520   ;;  %vm696_vm9 = vcmask 867328   ;;  %vm766_vm10 = vcmask 228352   ;;  %vm836_vm11 = vcmask 220160  }
   0xe   : > { %s2480_s14 = smul.u32 40, %s4068_s13  ;;  %s2529_s22 = smov 116   ;;  %vm907_vm12 = vcmask 211968   ;;  %vm977_vm13 = vcmask 146432   ;;  %vm1048_vm14 = vcmask 138240   ;;  %vm1118_vm15 = vcmask 130048  }
   0xf   : > { %s2530_s23 = smov 108   ;;  %s2531_s24 = smov 107  }
  0x10   : > { %s2585_s17 = scalar_lea.vmem %s3990_s1, %s2480_s14  ;;  %s2532_s25 = smov 106  }
  0x11   : > { %v2588_v0 = vld [vmem:[%s2585_s17 + $0x10] sm:$0xff]  ;;  %v2591_v1 = vld [vmem:[%s2585_s17 + $0x8] sm:$0xff]  ;;  %v2594_v2 = vld [vmem:[%s2585_s17] sm:$0xff]  ;;  %s2533_s26 = smov 28   ;;  %s2534_s27 = smov 27  }
  0x12   : > { %183 = vst [vmem:[#allocation1 + $0x20] ss:$2 sm:$0xff] %v2588_v0  ;;  %v2598_v3 = vld [vmem:[%s2585_s17 + $0x18] sm:$0xff]  ;;  %v724_v58 = vld [vmem:[%s2585_s17 + $0x20] sm:$0xf]  ;;  %s2535_s28 = smov 26  }
  0x13   : > { %181 = vst [vmem:[#allocation1 + $0x10] ss:$2 sm:$0xff] %v2591_v1  ;;  %s2536_s29 = smov 18   ;;  %s2537_s30 = smov 17  }
  0x14   : > { %179 = vst [vmem:[#allocation1] ss:$2 sm:$0xff] %v2594_v2  ;;  %s2538_s4 = smov 16   ;;  %s2539_s5 = smov 34  }
  0x15   : > { %185 = vst [vmem:[#allocation1 + $0x30] ss:$2 sm:$0xff] %v2598_v3  ;;  %s2540_s6 = smov 36   ;;  %s2541_s7 = smov 35  }
  0x16   : > { %s2542_s8 = smov 45   ;;  %s2543_s9 = smov 44  }
  0x17   : > { %s2544_s10 = smov 54   ;;  %s2545_s11 = smov 46  }
  0x18   : > { %s2546_s14 = smov 55   ;;  %s2547_s15 = smov 56  }
  0x19   : > { %v190_v4 = vld.sshfl [vmem:[#allocation1 + $0x20] sm:$0xff pattern:$0x75316420]  ;;  %v191_v5 = vld.sshfl [vmem:[#allocation1 + $0x28] sm:$0xff pattern:$0x75316420] }
  0x1a   : > { %224 = vst [vmem:[#allocation1 + $0x21] ss:$2 sm:$0xff] %v2588_v0  ;;  %v188_v6 = vld.sshfl [vmem:[#allocation1 + $0x10] sm:$0xff pattern:$0x75316420]  ;;  %s2548_s16 = smov 7  }
  0x1b   : > { %206 = vst [vmem:[#allocation2 + $0x20] sm:$0xf] %v190_v4  ;;  %v189_v7 = vld.sshfl [vmem:[#allocation1 + $0x18] sm:$0xff pattern:$0x75316420] }
  0x1c   : > { %207 = vst [vmem:[#allocation2 + $0x28] sm:$0xf] %v191_v5  ;;  %v186_v8 = vld.sshfl [vmem:[#allocation1] sm:$0xff pattern:$0x75316420] }
  0x1d   : > { %222 = vst [vmem:[#allocation1 + $0x11] ss:$2 sm:$0xff] %v2591_v1  ;;  %v187_v9 = vld.sshfl [vmem:[#allocation1 + $0x8] sm:$0xff pattern:$0x75316420] }
  0x1e   : > { %204 = vst [vmem:[#allocation2 + $0x10] sm:$0xf] %v188_v6  ;;  %v192_v10 = vld.sshfl [vmem:[#allocation1 + $0x30] sm:$0xff pattern:$0x75316420] }
  0x1f   : > { %205 = vst [vmem:[#allocation2 + $0x18] sm:$0xf] %v189_v7  ;;  %v2606_v11 = vld.sshfl [vmem:[#allocation1 + $0x38] sm:$0xff pattern:$0x75316420] }
  0x20   : > { %220 = vst [vmem:[#allocation1 + $0x1] ss:$2 sm:$0xff] %v2594_v2  ;;  %v795_v4 = vld [vmem:[%s2585_s17 + $0x20] sm:$0xf] }
  0x21   : > { %v231_v12 = vld.sshfl [vmem:[#allocation1 + $0x20] sm:$0xff pattern:$0x75316420]  ;;  %202 = vst [vmem:[#allocation2] sm:$0xf] %v186_v8 }
  0x22   : > { %243 = vrot.lane.b32.xlu2 %v231_v12, %s2525_s18  ;;  %203 = vst [vmem:[#allocation2 + $0x8] sm:$0xf] %v187_v9  ;;  %v232_v15 = vld.sshfl [vmem:[#allocation1 + $0x28] sm:$0xff pattern:$0x75316420] }
  0x23   : > { %226 = vst [vmem:[#allocation1 + $0x31] ss:$2 sm:$0xff] %v2598_v3 }
  0x24   : > { %v229_v13 = vld.sshfl [vmem:[#allocation1 + $0x10] sm:$0xff pattern:$0x75316420]  ;;  %v230_v14 = vld.sshfl [vmem:[#allocation1 + $0x18] sm:$0xff pattern:$0x75316420] }
  0x25   : > { %239 = vrot.lane.b32.xlu1 %v229_v13, %s2525_s18  ;;  %208 = vst [vmem:[#allocation2 + $0x30] sm:$0xf] %v192_v10 }
  0x26   : > { %286 = vst [vmem:[#allocation1 + $0x10] ss:$2 sm:$0xff] %v2591_v1 }
  0x27   : > { %v227_v16 = vld.sshfl [vmem:[#allocation1] sm:$0xff pattern:$0x75316420]  ;;  %v228_v17 = vld.sshfl [vmem:[#allocation1 + $0x8] sm:$0xff pattern:$0x75316420] }
  0x28   : > { %235 = vrot.lane.b32.xlu0 %v227_v16, %s2525_s18  ;;  %284 = vst [vmem:[#allocation1] ss:$2 sm:$0xff] %v2594_v2  ;;  %v865_v16 = vld [vmem:[%s2585_s17 + $0x20] sm:$0xf] }
  0x29   : > { %288 = vst [vmem:[#allocation1 + $0x20] ss:$2 sm:$0xff] %v2588_v0 }
  0x2a   : > { %245 = vrot.lane.b32.xlu2 %v232_v15, %s2525_s18  ;;  %v234_v18 = vld.sshfl [vmem:[#allocation1 + $0x38] sm:$0xff pattern:$0x75316420]  ;;  %v233_v19 = vld.sshfl [vmem:[#allocation1 + $0x30] sm:$0xff pattern:$0x75316420] }
  0x2b   : > { %290 = vst [vmem:[#allocation1 + $0x30] ss:$2 sm:$0xff] %v2598_v3 }
  0x2c   : > { %210 = vst.msk [vmem:[#allocation2 + $0x38] sm:$0xf] %vm209_vm1, %v2606_v11 }
  0x2d   : > { %241 = vrot.lane.b32.xlu1 %v230_v14, %s2525_s18  ;;  %v293_v20 = vld.sshfl [vmem:[#allocation1 + $0x10] sm:$0xff pattern:$0x75316420]  ;;  %v294_v21 = vld.sshfl [vmem:[#allocation1 + $0x18] sm:$0xff pattern:$0x75316420] }
  0x2e   : > { %350 = vst [vmem:[#allocation1 + $0x11] ss:$2 sm:$0xff] %v2591_v1 }
  0x2f   : > { %v291_v22 = vld.sshfl [vmem:[#allocation1] sm:$0xff pattern:$0x75316420]  ;;  %v292_v23 = vld.sshfl [vmem:[#allocation1 + $0x8] sm:$0xff pattern:$0x75316420] }
  0x30   : > { %237 = vrot.lane.b32.xlu0 %v228_v17, %s2525_s18  ;;  %v296_v24 = vld.sshfl [vmem:[#allocation1 + $0x28] sm:$0xff pattern:$0x75316420]  ;;  %348 = vst [vmem:[#allocation1 + $0x1] ss:$2 sm:$0xff] %v2594_v2 }
  0x31   : > { %v295_v25 = vld.sshfl [vmem:[#allocation1 + $0x20] sm:$0xff pattern:$0x75316420] }
  0x32   : > { %299 = vrot.lane.b32.xlu2 %v291_v22, %s2526_s19  ;;  %v297_v26 = vld.sshfl [vmem:[#allocation1 + $0x30] sm:$0xff pattern:$0x75316420]  ;;  %v298_v27 = vld.sshfl [vmem:[#allocation1 + $0x38] sm:$0xff pattern:$0x75316420] }
  0x33   : > { %352 = vst [vmem:[#allocation1 + $0x21] ss:$2 sm:$0xff] %v2588_v0 }
  0x34   : > { %354 = vst [vmem:[#allocation1 + $0x31] ss:$2 sm:$0xff] %v2598_v3 }
  0x35   : > { %249 = vrot.lane.b32.xlu1 %v234_v18, %s2525_s18  ;;  %v357_v28 = vld.sshfl [vmem:[#allocation1 + $0x10] sm:$0xff pattern:$0x75316420]  ;;  %v358_v29 = vld.sshfl [vmem:[#allocation1 + $0x18] sm:$0xff pattern:$0x75316420] }
  0x36   : > { %413 = vst [vmem:[#allocation1 + $0x10] ss:$2 sm:$0xff] %v2591_v1 }
  0x37   : > { %v356_v30 = vld.sshfl [vmem:[#allocation1 + $0x8] sm:$0xff pattern:$0x75316420]  ;;  %v355_v31 = vld.sshfl [vmem:[#allocation1] sm:$0xff pattern:$0x75316420] }
  0x38   : > { %247 = vrot.lane.b32.xlu0 %v233_v19, %s2525_s18  ;;  %411 = vst [vmem:[#allocation1] ss:$2 sm:$0xff] %v2594_v2  ;;  %s2550_s18 = smov 8  }
  0x3a   : > { %305 = vrot.lane.b32.xlu2 %v294_v21, %s2526_s19  ;;  %v359_v32 = vld.sshfl [vmem:[#allocation1 + $0x20] sm:$0xff pattern:$0x75316420]  ;;  %v360_v33 = vld.sshfl [vmem:[#allocation1 + $0x28] sm:$0xff pattern:$0x75316420] }
  0x3b   : > { %415 = vst [vmem:[#allocation1 + $0x20] ss:$2 sm:$0xff] %v2588_v0  ;;  %v362_v34 = vld.sshfl [vmem:[#allocation1 + $0x38] sm:$0xff pattern:$0x75316420] }
  0x3c   : > { %v361_v35 = vld.sshfl [vmem:[#allocation1 + $0x30] sm:$0xff pattern:$0x75316420] }
  0x3d   : > { %303 = vrot.lane.b32.xlu1 %v293_v20, %s2526_s19  ;;  %417 = vst [vmem:[#allocation1 + $0x30] ss:$2 sm:$0xff] %v2598_v3  ;;  %v420_v42 = vld.sshfl [vmem:[#allocation1 + $0x10] sm:$0xff pattern:$0x75316420] }
  0x3e   : > { %v421_v43 = vld.sshfl [vmem:[#allocation1 + $0x18] sm:$0xff pattern:$0x75316420] }
  0x3f   : > { %v419_v36 = vld.sshfl [vmem:[#allocation1 + $0x8] sm:$0xff pattern:$0x75316420]  ;;  %v418_v37 = vld.sshfl [vmem:[#allocation1] sm:$0xff pattern:$0x75316420] }
  0x40   : > { %301 = vrot.lane.b32.xlu0 %v292_v23, %s2526_s19  ;;  %475 = vst [vmem:[#allocation1 + $0x1] ss:$2 sm:$0xff] %v2594_v2 }
  0x41   : > { %477 = vst [vmem:[#allocation1 + $0x11] ss:$2 sm:$0xff] %v2591_v1 }
  0x42   : > { %311 = vrot.lane.b32.xlu2 %v297_v26, %s2526_s19  ;;  %v423_v38 = vld.sshfl [vmem:[#allocation1 + $0x28] sm:$0xff pattern:$0x75316420]  ;;  %v422_v39 = vld.sshfl [vmem:[#allocation1 + $0x20] sm:$0xff pattern:$0x75316420] }
  0x43   : > { %479 = vst [vmem:[#allocation1 + $0x21] ss:$2 sm:$0xff] %v2588_v0 }
  0x44   : > { %v425_v46 = vld.sshfl [vmem:[#allocation1 + $0x38] sm:$0xff pattern:$0x75316420]  ;;  %v424_v47 = vld.sshfl [vmem:[#allocation1 + $0x30] sm:$0xff pattern:$0x75316420] }
  0x45   : > { %309 = vrot.lane.b32.xlu1 %v296_v24, %s2526_s19  ;;  %481 = vst [vmem:[#allocation1 + $0x31] ss:$2 sm:$0xff] %v2598_v3 }
  0x47   : > { %v482_v40 = vld.sshfl [vmem:[#allocation1] sm:$0xff pattern:$0x75316420]  ;;  %v2637_v41 = vld.sshfl [vmem:[#allocation1 + $0x8] sm:$0xff pattern:$0x75316420] }
  0x48   : > { %307 = vrot.lane.b32.xlu0 %v295_v25, %s2526_s19  ;;  %538 = vst [vmem:[#allocation1] ss:$2 sm:$0xff] %v2594_v2  ;;  %v484_v50 = vld.sshfl [vmem:[#allocation1 + $0x10] sm:$0xff pattern:$0x75316420] }
  0x49   : > { %v485_v51 = vld.sshfl [vmem:[#allocation1 + $0x18] sm:$0xff pattern:$0x75316420] }
  0x4a   : > { %365 = vrot.lane.b32.xlu2 %v356_v30, %s2527_s20  ;;  %540 = vst [vmem:[#allocation1 + $0x10] ss:$2 sm:$0xff] %v2591_v1  ;;  %v487_v54 = vld.sshfl [vmem:[#allocation1 + $0x28] sm:$0xff pattern:$0x75316420] }
  0x4b   : > { %v486_v55 = vld.sshfl [vmem:[#allocation1 + $0x20] sm:$0xff pattern:$0x75316420] }
  0x4c   : > { %542 = vst [vmem:[#allocation1 + $0x20] ss:$2 sm:$0xff] %v2588_v0  ;;  %v488_v56 = vld.sshfl [vmem:[#allocation1 + $0x30] sm:$0xff pattern:$0x75316420] }
  0x4d   : > { %363 = vrot.lane.b32.xlu1 %v355_v31, %s2527_s20  ;;  %v489_v57 = vld.sshfl [vmem:[#allocation1 + $0x38] sm:$0xff pattern:$0x75316420]  ;;  %v936_v30 = vld [vmem:[%s2585_s17 + $0x20] sm:$0xf] }
  0x4e   : > { %544 = vst [vmem:[#allocation1 + $0x30] ss:$2 sm:$0xff] %v2598_v3 }
  0x4f   : > { %v2643_v44 = vld.sshfl [vmem:[#allocation1 + $0x8] sm:$0xff pattern:$0x75316420]  ;;  %v2645_v45 = vld.sshfl [vmem:[#allocation1] sm:$0xff pattern:$0x75316420] }
  0x50   : > { %313 = vrot.lane.b32.xlu0 %v298_v27, %s2526_s19  ;;  %602 = vst [vmem:[#allocation1 + $0x1] ss:$2 sm:$0xff] %v2594_v2 }
  0x51   : > { %v547_v62 = vld.sshfl [vmem:[#allocation1 + $0x10] sm:$0xff pattern:$0x75316420]  ;;  %v548_v63 = vld.sshfl [vmem:[#allocation1 + $0x18] sm:$0xff pattern:$0x75316420] }
  0x52   : > { %371 = vrot.lane.b32.xlu2 %v359_v32, %s2527_s20  ;;  %604 = vst [vmem:[#allocation1 + $0x11] ss:$2 sm:$0xff] %v2591_v1 }
  0x53   : > { %v549_v5 = vld.sshfl [vmem:[#allocation1 + $0x20] sm:$0xff pattern:$0x75316420]  ;;  %v550_v6 = vld.sshfl [vmem:[#allocation1 + $0x28] sm:$0xff pattern:$0x75316420] }
  0x54   : > { %606 = vst [vmem:[#allocation1 + $0x21] ss:$2 sm:$0xff] %v2588_v0 }
  0x55   : > { %369 = vrot.lane.b32.xlu1 %v358_v29, %s2527_s20  ;;  %v552_v10 = vld.sshfl [vmem:[#allocation1 + $0x38] sm:$0xff pattern:$0x75316420]  ;;  %v551_v12 = vld.sshfl [vmem:[#allocation1 + $0x30] sm:$0xff pattern:$0x75316420] }
  0x56   : > { %608 = vst [vmem:[#allocation1 + $0x31] ss:$2 sm:$0xff] %v2598_v3 }
  0x57   : > { %v2649_v48 = vld.sshfl [vmem:[#allocation1 + $0x8] sm:$0xff pattern:$0x75316420]  ;;  %v2651_v49 = vld.sshfl [vmem:[#allocation1] sm:$0xff pattern:$0x75316420] }
  0x58   : > { %367 = vrot.lane.b32.xlu0 %v357_v28, %s2527_s20  ;;  %665 = vst [vmem:[#allocation1] ss:$2 sm:$0xff] %v2594_v2 }
  0x59   : > { %v611_v18 = vld.sshfl [vmem:[#allocation1 + $0x10] sm:$0xff pattern:$0x75316420]  ;;  %v2704_v23 = vld.sshfl [vmem:[#allocation1 + $0x18] sm:$0xff pattern:$0x75316420] }
  0x5a   : > { %377 = vrot.lane.b32.xlu2 %v362_v34, %s2527_s20  ;;  %667 = vst [vmem:[#allocation1 + $0x10] ss:$2 sm:$0xff] %v2591_v1 }
  0x5b   : > { %v614_v21 = vld.sshfl [vmem:[#allocation1 + $0x28] sm:$0xff pattern:$0x75316420]  ;;  %v613_v22 = vld.sshfl [vmem:[#allocation1 + $0x20] sm:$0xff pattern:$0x75316420] }
  0x5c   : > { %669 = vst [vmem:[#allocation1 + $0x20] ss:$2 sm:$0xff] %v2588_v0 }
  0x5d   : > { %375 = vrot.lane.b32.xlu1 %v361_v35, %s2527_s20  ;;  %v2715_v25 = vld.sshfl [vmem:[#allocation1 + $0x38] sm:$0xff pattern:$0x75316420]  ;;  %v2717_v26 = vld.sshfl [vmem:[#allocation1 + $0x30] sm:$0xff pattern:$0x75316420] }
  0x5e   : > { %671 = vst [vmem:[#allocation1 + $0x30] ss:$2 sm:$0xff] %v2598_v3 }
  0x5f   : > { %v2655_v52 = vld.sshfl [vmem:[#allocation1] sm:$0xff pattern:$0x75316420]  ;;  %v2657_v53 = vld.sshfl [vmem:[#allocation1 + $0x8] sm:$0xff pattern:$0x75316420] }
  0x60   : > { %373 = vrot.lane.b32.xlu0 %v360_v33, %s2527_s20  ;;  %731 = vst [vmem:[#allocation1 + $0x1] ss:$2 sm:$0xff] %v2594_v2 }
  0x62   : > { %430 = vrot.lane.b32.xlu2 %v420_v42, %s2528_s21 }
  0x63   : > { %v2744_v42 = vld.sshfl [vmem:[#allocation1 + $0x28] sm:$0xff pattern:$0x75316420] }
  0x65   : > { %428 = vrot.lane.b32.xlu1 %v419_v36, %s2528_s21  ;;  %v2736_v36 = vld.sshfl [vmem:[#allocation1 + $0x10] sm:$0xff pattern:$0x75316420] }
  0x67   : > { %v2663_v59 = vld.sshfl [vmem:[#allocation1 + $0x8] sm:$0xff pattern:$0x75316420]  ;;  %v2665_v60 = vld.sshfl [vmem:[#allocation1] sm:$0xff pattern:$0x75316420] }
  0x68   : > { %426 = vrot.lane.b32.xlu0 %v418_v37, %s2528_s21  ;;  %746 = vst [vmem:[#allocation1 + $0x1] ss:$2 sm:$0xff] %v724_v58 }
  0x6a   : > { %436 = vrot.lane.b32.xlu2 %v423_v38, %s2528_s21  ;;  %v675_v38 = vld.sshfl [vmem:[#allocation1 + $0x18] sm:$0xff pattern:$0x75316420] }
  0x6b   : > { %733 = vst [vmem:[#allocation1 + $0x11] ss:$2 sm:$0xff] %v2591_v1 }
  0x6d   : > { %434 = vrot.lane.b32.xlu1 %v422_v39, %s2528_s21 }
  0x6f   : > { %v2668_v61 = vld.sshfl [vmem:[#allocation1] sm:$0xff pattern:$0x75316420] }
  0x70   : > { %432 = vrot.lane.b32.xlu0 %v421_v43, %s2528_s21  ;;  %801 = vst [vmem:[#allocation1] ss:$2 sm:$0xff] %v2594_v2  ;;  %v2748_v43 = vld.sshfl [vmem:[#allocation1 + $0x20] sm:$0xff pattern:$0x75316420] }
  0x71   : > { %735 = vst [vmem:[#allocation1 + $0x21] ss:$2 sm:$0xff] %v2588_v0 }
  0x72   : > { %490 = vrot.lane.b32.xlu2 %v482_v40, %s2529_s22 }
  0x75   : > { %440 = vrot.lane.b32.xlu1 %v425_v46, %s2528_s21 }
  0x77   : > { %v2675_v7 = vld.sshfl [vmem:[#allocation1 + $0x8] sm:$0xff pattern:$0x75316420]  ;;  %v2677_v9 = vld.sshfl [vmem:[#allocation1] sm:$0xff pattern:$0x75316420] }
  0x78   : > { %438 = vrot.lane.b32.xlu0 %v424_v47, %s2528_s21  ;;  %816 = vst [vmem:[#allocation1] ss:$2 sm:$0xff] %v795_v4 }
  0x7a   : > { %496 = vrot.lane.b32.xlu2 %v485_v51, %s2529_s22  ;;  %v678_v51 = vld.sshfl [vmem:[#allocation1 + $0x30] sm:$0xff pattern:$0x75316420] }
  0x7c   : > { %v244_v8 = vpop.permute.xlu2 %243 }
  0x7d   : > { %494 = vrot.lane.b32.xlu1 %v484_v50, %s2529_s22 }
  0x7f   : > { %v2686_v14 = vld.sshfl [vmem:[#allocation1] sm:$0xff pattern:$0x75316420] }
  0x80   : > { %492 = vrot.lane.b32.xlu0 %v2637_v41, %s2529_s22  ;;  %872 = vst [vmem:[#allocation1 + $0x1] ss:$2 sm:$0xff] %v2594_v2 }
  0x82   : > { %502 = vrot.lane.b32.xlu2 %v488_v56, %s2529_s22  ;;  %v2772_v56 = vld.sshfl [vmem:[#allocation1 + $0x10] sm:$0xff pattern:$0x75316420] }
  0x84   : > { %v2684_v13 = vpop.permute.xlu2 %245 }
  0x85   : > { %500 = vrot.lane.b32.xlu1 %v487_v54, %s2529_s22  ;;  %v256_v15 = vsel %vm251_vm0, %v244_v8, %v2684_v13  ;;  %v1006_v54 = vld [vmem:[%s2585_s17 + $0x20] sm:$0xf] }
  0x86   : > { %271 = vst [vmem:[#allocation2 + $0x20] sm:$0xf0] %v256_v15 }
  0x87   : > { %v2698_v19 = vld.sshfl [vmem:[#allocation1 + $0x8] sm:$0xff pattern:$0x75316420]  ;;  %v2700_v20 = vld.sshfl [vmem:[#allocation1] sm:$0xff pattern:$0x75316420] }
  0x88   : > { %498 = vrot.lane.b32.xlu0 %v486_v55, %s2529_s22  ;;  %887 = vst [vmem:[#allocation1 + $0x1] ss:$2 sm:$0xff] %v865_v16 }
  0x8a   : > { %555 = vrot.lane.b32.xlu2 %v2643_v44, %s2530_s23 }
  0x8c   : > { %v2696_v17 = vpop.permute.xlu2 %299 }
  0x8d   : > { %553 = vrot.lane.b32.xlu1 %v2645_v45, %s2530_s23 }
  0x8f   : > { %v2720_v28 = vld.sshfl [vmem:[#allocation1] sm:$0xff pattern:$0x75316420] }
  0x90   : > { %504 = vrot.lane.b32.xlu0 %v489_v57, %s2529_s22  ;;  %942 = vst [vmem:[#allocation1] ss:$2 sm:$0xff] %v2594_v2  ;;  %v2774_v57 = vld.sshfl [vmem:[#allocation1 + $0x18] sm:$0xff pattern:$0x75316420] }
  0x91   : > { %803 = vst [vmem:[#allocation1 + $0x10] ss:$2 sm:$0xff] %v2591_v1 }
  0x92   : > { %561 = vrot.lane.b32.xlu2 %v549_v5, %s2530_s23 }
  0x94   : > { %v2712_v24 = vpop.permute.xlu2 %305 }
  0x95   : > { %559 = vrot.lane.b32.xlu1 %v548_v63, %s2530_s23 }
  0x97   : > { %v240_v27 = vpop.permute.xlu1 %239  ;;  %v2729_v32 = vld.sshfl [vmem:[#allocation1 + $0x8] sm:$0xff pattern:$0x75316420]  ;;  %v2731_v33 = vld.sshfl [vmem:[#allocation1] sm:$0xff pattern:$0x75316420] }
  0x98   : > { %557 = vrot.lane.b32.xlu0 %v547_v62, %s2530_s23  ;;  %957 = vst [vmem:[#allocation1] ss:$2 sm:$0xff] %v936_v30 }
  0x9a   : > { %v236_v29 = vpop.permute.xlu0 %235  ;;  %567 = vrot.lane.b32.xlu2 %v552_v10, %s2530_s23  ;;  %v2796_v10 = vld.sshfl [vmem:[#allocation1 + $0x20] sm:$0xff pattern:$0x75316420] }
  0x9c   : > { %v2725_v11 = vpop.permute.xlu2 %311 }
  0x9d   : > { %565 = vrot.lane.b32.xlu1 %v551_v12, %s2530_s23  ;;  %v2798_v12 = vld.sshfl [vmem:[#allocation1 + $0x28] sm:$0xff pattern:$0x75316420] }
  0x9e   : > { %805 = vst [vmem:[#allocation1 + $0x20] ss:$2 sm:$0xff] %v2588_v0 }
  0x9f   : > { %v242_v31 = vpop.permute.xlu1 %241  ;;  %v2751_v45 = vld.sshfl [vmem:[#allocation1] sm:$0xff pattern:$0x75316420] }
  0xa0   : > { %563 = vrot.lane.b32.xlu0 %v550_v6, %s2530_s23  ;;  %v254_v34 = vsel %vm251_vm0, %v240_v27, %v242_v31  ;;  %v255_v35 = vsel %vm251_vm0, %v242_v31, %v244_v8  ;;  %1013 = vst [vmem:[#allocation1 + $0x1] ss:$2 sm:$0xff] %v2594_v2  ;;  %s2479_s23 = sshll.u32 %s4068_s13, 6 }
  0xa1   : > { %269 = vst [vmem:[#allocation2 + $0x10] sm:$0xf0] %v254_v34 }
  0xa2   : > { %270 = vst [vmem:[#allocation2 + $0x18] sm:$0xf0] %v255_v35  ;;  %v238_v37 = vpop.permute.xlu0 %237  ;;  %621 = vrot.lane.b32.xlu2 %v611_v18, %s2531_s24  ;;  %v2807_v18 = vld.sshfl [vmem:[#allocation1 + $0x18] sm:$0xff pattern:$0x75316420] }
  0xa3   : > { %v252_v39 = vsel %vm251_vm0, %v236_v29, %v238_v37  ;;  %v253_v40 = vsel %vm251_vm0, %v238_v37, %v240_v27  ;;  %v1077_v35 = vld [vmem:[%s2585_s17 + $0x20] sm:$0xf] }
  0xa4   : > { %267 = vst [vmem:[#allocation2] sm:$0xf0] %v252_v39  ;;  %v2742_v41 = vpop.permute.xlu2 %365 }
  0xa5   : > { %268 = vst [vmem:[#allocation2 + $0x8] sm:$0xf0] %v253_v40  ;;  %619 = vrot.lane.b32.xlu1 %v2649_v48, %s2531_s24  ;;  %v2828_v29 = vld.sshfl [vmem:[#allocation1 + $0x20] sm:$0xff pattern:$0x75316420] }
  0xa6   : > { %v2831_v31 = vld.sshfl [vmem:[#allocation1 + $0x28] sm:$0xff pattern:$0x75316420] }
  0xa7   : > { %v250_v44 = vpop.permute.xlu1 %249  ;;  %v2776_v58 = vld.sshfl [vmem:[#allocation1 + $0x8] sm:$0xff pattern:$0x75316420]  ;;  %v2781_v63 = vld.sshfl [vmem:[#allocation1] sm:$0xff pattern:$0x75316420] }
  0xa8   : > { %617 = vrot.lane.b32.xlu0 %v2651_v49, %s2531_s24  ;;  %275 = vst.msk [vmem:[#allocation2 + $0x38] sm:$0xf0] %vm274_vm2, %v250_v44  ;;  %v2764_v49 = vld.sshfl [vmem:[#allocation1 + $0x38] sm:$0xff pattern:$0x75316420] }
  0xa9   : > { %737 = vst [vmem:[#allocation1 + $0x31] ss:$2 sm:$0xff] %v2598_v3 }
  0xaa   : > { %v248_v46 = vpop.permute.xlu0 %247  ;;  %627 = vrot.lane.b32.xlu2 %v614_v21, %s2531_s24  ;;  %1028 = vst [vmem:[#allocation1 + $0x1] ss:$2 sm:$0xff] %v1006_v54 }
  0xab   : > { %v257_v47 = vsel %vm251_vm0, %v2684_v13, %v248_v46  ;;  %v258_v48 = vsel %vm251_vm0, %v248_v46, %v250_v44  ;;  %876 = vst [vmem:[#allocation1 + $0x21] ss:$2 sm:$0xff] %v2588_v0  ;;  %vm1964_vm0 = vcmask 277504  }
  0xac   : > { %272 = vst [vmem:[#allocation2 + $0x28] sm:$0xf0] %v257_v47  ;;  %v2761_v50 = vpop.permute.xlu2 %371 }
  0xad   : > { %273 = vst [vmem:[#allocation2 + $0x30] sm:$0xf0] %v258_v48  ;;  %625 = vrot.lane.b32.xlu1 %v613_v22, %s2531_s24  ;;  %v2870_v48 = vld [vmem:[%s2585_s17 + $0x8] sm:$0xff] }
  0xaf   : > { %v304_v2 = vpop.permute.xlu1 %303 }
  0xb0   : > { %623 = vrot.lane.b32.xlu0 %v2704_v23, %s2531_s24  ;;  %v318_v55 = vsel %vm315_vm3, %v304_v2, %v2712_v24  ;;  %v2814_v23 = vld [vmem:[%s2585_s17] sm:$0xff]  ;;  %v2826_v27 = vld.sshfl [vmem:[#allocation1 + $0x30] sm:$0xff pattern:$0x75316420] }
  0xb1   : > { %333 = vst [vmem:[#allocation2 + $0x50] sm:$0xf] %v318_v55  ;;  %v2811_v22 = vld.sshfl [vmem:[#allocation1] sm:$0xff pattern:$0x75316420] }
  0xb2   : > { %v302_v62 = vpop.permute.xlu0 %301  ;;  %680 = vrot.lane.b32.xlu2 %v2655_v52, %s2532_s25  ;;  %1083 = vst [vmem:[#allocation1] ss:$2 sm:$0xff] %v2814_v23  ;;  %v2863_v47 = vld.sshfl [vmem:[#allocation1 + $0x20] sm:$0xff pattern:$0x75316420] }
  0xb3   : > { %v316_v4 = vsel %vm315_vm3, %v2696_v17, %v302_v62  ;;  %v317_v5 = vsel %vm315_vm3, %v302_v62, %v304_v2  ;;  %v2805_v17 = vld.sshfl [vmem:[#allocation1 + $0x10] sm:$0xff pattern:$0x75316420] }
  0xb4   : > { %331 = vst [vmem:[#allocation2 + $0x40] sm:$0xf] %v316_v4  ;;  %v2786_v6 = vpop.permute.xlu2 %377  ;;  %v2893_v62 = vld [vmem:[%s2585_s17 + $0x10] sm:$0xff] }
  0xb5   : > { %332 = vst [vmem:[#allocation2 + $0x48] sm:$0xf] %v317_v5  ;;  %631 = vrot.lane.b32.xlu1 %v2715_v25, %s2531_s24 }
  0xb6   : > { %402 = vst.msk [vmem:[#allocation2 + $0x78] sm:$0xf0] %vm274_vm2, %v2786_v6 }
  0xb7   : > { %v310_v52 = vpop.permute.xlu1 %309  ;;  %874 = vst [vmem:[#allocation1 + $0x11] ss:$2 sm:$0xff] %v2591_v1 }
  0xb8   : > { %629 = vrot.lane.b32.xlu0 %v2717_v26, %s2531_s24  ;;  %v321_v8 = vsel %vm315_vm3, %v310_v52, %v2725_v11  ;;  %v2824_v26 = vld.sshfl [vmem:[#allocation1 + $0x38] sm:$0xff pattern:$0x75316420] }
  0xb9   : > { %336 = vst [vmem:[#allocation2 + $0x68] sm:$0xf] %v321_v8 }
  0xba   : > { %v308_v13 = vpop.permute.xlu0 %307  ;;  %686 = vrot.lane.b32.xlu2 %v675_v38, %s2532_s25  ;;  %807 = vst [vmem:[#allocation1 + $0x30] ss:$2 sm:$0xff] %v2598_v3  ;;  %v2847_v38 = vld.sshfl [vmem:[#allocation1] sm:$0xff pattern:$0x75316420] }
  0xbb   : > { %v319_v15 = vsel %vm315_vm3, %v2712_v24, %v308_v13  ;;  %v320_v16 = vsel %vm315_vm3, %v308_v13, %v310_v52 }
  0xbc   : > { %334 = vst [vmem:[#allocation2 + $0x58] sm:$0xf] %v319_v15  ;;  %v2809_v21 = vpop.permute.xlu2 %430 }
  0xbd   : > { %335 = vst [vmem:[#allocation2 + $0x60] sm:$0xf] %v320_v16  ;;  %684 = vrot.lane.b32.xlu1 %v2736_v36, %s2532_s25 }
  0xbe   : > { %v2842_v36 = vld.sshfl [vmem:[#allocation1 + $0x10] sm:$0xff pattern:$0x75316420]  ;;  %v2845_v37 = vld.sshfl [vmem:[#allocation1 + $0x18] sm:$0xff pattern:$0x75316420] }
  0xbf   : > { %v364_v24 = vpop.permute.xlu1 %363  ;;  %944 = vst [vmem:[#allocation1 + $0x10] ss:$2 sm:$0xff] %v2591_v1 }
  0xc0   : > { %682 = vrot.lane.b32.xlu0 %v2657_v53, %s2532_s25  ;;  %v380_v25 = vsel %vm379_vm4, %v364_v24, %v2742_v41 }
  0xc1   : > { %395 = vst [vmem:[#allocation2 + $0x40] sm:$0xf0] %v380_v25  ;;  %v2908_v8 = vld.sshfl [vmem:[#allocation1 + $0x38] sm:$0xff pattern:$0x75316420] }
  0xc2   : > { %v314_v30 = vpop.permute.xlu0 %313  ;;  %692 = vrot.lane.b32.xlu2 %v678_v51, %s2532_s25 }
  0xc3   : > { %v322_v53 = vsel %vm315_vm3, %v2725_v11, %v314_v30  ;;  %338 = vst.msk [vmem:[#allocation2 + $0x78] sm:$0xf] %vm209_vm1, %v314_v30  ;;  %v2850_v11 = vld.sshfl [vmem:[#allocation1 + $0x8] sm:$0xff pattern:$0x75316420]  ;;  %vm1823_vm3 = vcmask 293888  }
  0xc4   : > { %337 = vst [vmem:[#allocation2 + $0x70] sm:$0xf] %v322_v53  ;;  %v2837_v34 = vpop.permute.xlu2 %436 }
  0xc5   : > { %690 = vrot.lane.b32.xlu1 %v2744_v42, %s2532_s25  ;;  %1098 = vst [vmem:[#allocation1] ss:$2 sm:$0xff] %v1077_v35 }
  0xc6   : > { %v2872_v51 = vld.sshfl [vmem:[#allocation1 + $0x10] sm:$0xff pattern:$0x75316420] }
  0xc7   : > { %v370_v39 = vpop.permute.xlu1 %369 }
  0xc8   : > { %688 = vrot.lane.b32.xlu0 %v2748_v43, %s2532_s25  ;;  %v383_v40 = vsel %vm379_vm4, %v370_v39, %v2761_v50  ;;  %v2867_v43 = vld.sshfl [vmem:[#allocation1 + $0x28] sm:$0xff pattern:$0x75316420] }
  0xc9   : > { %398 = vst [vmem:[#allocation2 + $0x58] sm:$0xf0] %v383_v40 }
  0xca   : > { %v368_v42 = vpop.permute.xlu0 %367  ;;  %750 = vrot.lane.b32.xlu2 %v2663_v59, %s2533_s26  ;;  %946 = vst [vmem:[#allocation1 + $0x20] ss:$2 sm:$0xff] %v2588_v0 }
  0xcb   : > { %v381_v44 = vsel %vm379_vm4, %v2742_v41, %v368_v42  ;;  %v382_v1 = vsel %vm379_vm4, %v368_v42, %v370_v39  ;;  %v2875_v41 = vld.sshfl [vmem:[#allocation1 + $0x18] sm:$0xff pattern:$0x75316420] }
  0xcc   : > { %396 = vst [vmem:[#allocation2 + $0x48] sm:$0xf0] %v381_v44  ;;  %v2861_v46 = vpop.permute.xlu2 %490  ;;  %v2877_v2 = vld.sshfl [vmem:[#allocation1] sm:$0xff pattern:$0x75316420] }
  0xcd   : > { %397 = vst [vmem:[#allocation2 + $0x50] sm:$0xf0] %v382_v1  ;;  %748 = vrot.lane.b32.xlu1 %v2665_v60, %s2533_s26 }
  0xce   : > { %3993 = vst [vmem:[#allocation3_spill] sm:$0xff] %v2877_v2 }
  0xcf   : > { %v376_v59 = vpop.permute.xlu1 %375  ;;  %1015 = vst [vmem:[#allocation1 + $0x11] ss:$2 sm:$0xff] %v2870_v48 }
  0xd0   : > { %694 = vrot.lane.b32.xlu0 %v2764_v49, %s2532_s25  ;;  %v386_v60 = vsel %vm379_vm4, %v376_v59, %v2786_v6  ;;  %1154 = vst [vmem:[#allocation1 + $0x1] ss:$2 sm:$0xff] %v2814_v23 }
  0xd1   : > { %401 = vst [vmem:[#allocation2 + $0x70] sm:$0xf0] %v386_v60  ;;  %v2897_v4 = vld.sshfl [vmem:[#allocation1 + $0x20] sm:$0xff pattern:$0x75316420] }
  0xd2   : > { %v374_v54 = vpop.permute.xlu0 %373  ;;  %756 = vrot.lane.b32.xlu2 %v2796_v10, %s2533_s26  ;;  %v2899_v5 = vld.sshfl [vmem:[#allocation1 + $0x28] sm:$0xff pattern:$0x75316420]  ;;  %v2910_v10 = vld.sshfl [vmem:[#allocation1 + $0x30] sm:$0xff pattern:$0x75316420] }
  0xd3   : > { %v384_v0 = vsel %vm379_vm4, %v2761_v50, %v374_v54  ;;  %v385_v55 = vsel %vm379_vm4, %v374_v54, %v376_v59  ;;  %1017 = vst [vmem:[#allocation1 + $0x21] ss:$2 sm:$0xff] %v2893_v62  ;;  %vm2105_vm4 = vcmask 1043456  }
  0xd4   : > { %399 = vst [vmem:[#allocation2 + $0x60] sm:$0xf0] %v384_v0  ;;  %v2890_v49 = vpop.permute.xlu2 %496 }
  0xd5   : > { %400 = vst [vmem:[#allocation2 + $0x68] sm:$0xf0] %v385_v55  ;;  %754 = vrot.lane.b32.xlu1 %v2774_v57, %s2533_s26  ;;  %v1147_v57 = vld [vmem:[%s2585_s17 + $0x20] sm:$0xf] }
  0xd6   : > { %v2901_v52 = vld.sshfl [vmem:[#allocation1 + $0x10] sm:$0xff pattern:$0x75316420]  ;;  %v2913_v13 = vld.sshfl [vmem:[#allocation1 + $0x18] sm:$0xff pattern:$0x75316420] }
  0xd7   : > { %v429_v6 = vpop.permute.xlu1 %428  ;;  %878 = vst [vmem:[#allocation1 + $0x31] ss:$2 sm:$0xff] %v2598_v3  ;;  %v2918_v16 = vld.sshfl [vmem:[#allocation1] sm:$0xff pattern:$0x75316420] }
  0xd8   : > { %752 = vrot.lane.b32.xlu0 %v2772_v56, %s2533_s26  ;;  %v444_v50 = vsel %vm442_vm5, %v429_v6, %v2809_v21  ;;  %3994 = vst [vmem:[#allocation4_spill] sm:$0xff] %v2918_v16  ;;  %v2921_v24 = vld.sshfl [vmem:[#allocation1 + $0x8] sm:$0xff pattern:$0x75316420] }
  0xd9   : > { %459 = vst [vmem:[#allocation2 + $0x88] sm:$0xf] %v444_v50 }
  0xda   : > { %v427_v15 = vpop.permute.xlu0 %426  ;;  %762 = vrot.lane.b32.xlu2 %v2824_v26, %s2533_s26  ;;  %3995 = vst [vmem:[#allocation5_spill] sm:$0xff] %v2921_v24  ;;  %v2928_v30 = vld.sshfl [vmem:[#allocation1 + $0x20] sm:$0xff pattern:$0x75316420] }
  0xdb   : > { %v443_v56 = vsel %vm442_vm5, %v427_v15, %v429_v6  ;;  %1085 = vst [vmem:[#allocation1 + $0x10] ss:$2 sm:$0xff] %v2870_v48  ;;  %v2930_v26 = vld.sshfl [vmem:[#allocation1 + $0x28] sm:$0xff pattern:$0x75316420] }
  0xdc   : > { %458 = vst [vmem:[#allocation2 + $0x80] sm:$0xf] %v443_v56  ;;  %v2924_v25 = vpop.permute.xlu2 %502  ;;  %v1218_v6 = vld [vmem:[%s2585_s17 + $0x20] sm:$0xf] }
  0xdd   : > { %760 = vrot.lane.b32.xlu1 %v2826_v27, %s2533_s26  ;;  %1169 = vst [vmem:[#allocation1 + $0x1] ss:$2 sm:$0xff] %v1147_v57 }
  0xde   : > { %1087 = vst [vmem:[#allocation1 + $0x20] ss:$2 sm:$0xff] %v2893_v62  ;;  %v2985_v15 = vld.sshfl [vmem:[#allocation1 + $0x38] sm:$0xff pattern:$0x75316420] }
  0xdf   : > { %v435_v53 = vpop.permute.xlu1 %434  ;;  %v2987_v56 = vld.sshfl [vmem:[#allocation1 + $0x30] sm:$0xff pattern:$0x75316420] }
  0xe0   : > { %758 = vrot.lane.b32.xlu0 %v2798_v12, %s2533_s26  ;;  %v447_v35 = vsel %vm442_vm5, %v435_v53, %v2837_v34  ;;  %948 = vst [vmem:[#allocation1 + $0x30] ss:$2 sm:$0xff] %v2598_v3 }
  0xe1   : > { %462 = vst [vmem:[#allocation2 + $0xa0] sm:$0xf] %v447_v35 }
  0xe2   : > { %v433_v39 = vpop.permute.xlu0 %432  ;;  %820 = vrot.lane.b32.xlu2 %v2675_v7, %s2534_s27  ;;  %v2939_v27 = vld.sshfl [vmem:[#allocation1 + $0x10] sm:$0xff pattern:$0x75316420]  ;;  %v2941_v40 = vld.sshfl [vmem:[#allocation1 + $0x18] sm:$0xff pattern:$0x75316420] }
  0xe3   : > { %v445_v42 = vsel %vm442_vm5, %v2809_v21, %v433_v39  ;;  %v446_v44 = vsel %vm442_vm5, %v433_v39, %v435_v53  ;;  %1156 = vst [vmem:[#allocation1 + $0x11] ss:$2 sm:$0xff] %v2870_v48 }
  0xe4   : > { %460 = vst [vmem:[#allocation2 + $0x90] sm:$0xf] %v445_v42  ;;  %v2947_v12 = vpop.permute.xlu2 %555  ;;  %v2949_v1 = vld.sshfl [vmem:[#allocation1] sm:$0xff pattern:$0x75316420] }
  0xe5   : > { %3996 = vst [vmem:[#allocation6_spill] sm:$0xff] %v2949_v1  ;;  %818 = vrot.lane.b32.xlu1 %v2677_v9, %s2534_s27  ;;  %v2954_v7 = vld.sshfl [vmem:[#allocation1 + $0x20] sm:$0xff pattern:$0x75316420] }
  0xe6   : > { %461 = vst [vmem:[#allocation2 + $0x98] sm:$0xf] %v446_v44  ;;  %v2956_v21 = vld.sshfl [vmem:[#allocation1 + $0x28] sm:$0xff pattern:$0x75316420] }
  0xe7   : > { %1224 = vst [vmem:[#allocation1] ss:$2 sm:$0xff] %v2814_v23  ;;  %v441_v59 = vpop.permute.xlu1 %440 }
  0xe8   : > { %764 = vrot.lane.b32.xlu0 %v2668_v61, %s2533_s26  ;;  %465 = vst.msk [vmem:[#allocation2 + $0xb8] sm:$0xf] %vm209_vm1, %v441_v59  ;;  %s170_s26 = scalar_lea.vmem %s3992_s3, %s2479_s23 }
  0xe9   : > { %1158 = vst [vmem:[#allocation1 + $0x21] ss:$2 sm:$0xff] %v2893_v62 }
  0xea   : > { %v439_v60 = vpop.permute.xlu0 %438  ;;  %826 = vrot.lane.b32.xlu2 %v2828_v29, %s2534_s27  ;;  %v2964_v9 = vld.sshfl [vmem:[#allocation1 + $0x10] sm:$0xff pattern:$0x75316420]  ;;  %v2966_v54 = vld.sshfl [vmem:[#allocation1 + $0x18] sm:$0xff pattern:$0x75316420] }
  0xeb   : > { %v448_v0 = vsel %vm442_vm5, %v2837_v34, %v439_v60  ;;  %v449_v55 = vsel %vm442_vm5, %v439_v60, %v441_v59  ;;  %1226 = vst [vmem:[#allocation1 + $0x10] ss:$2 sm:$0xff] %v2870_v48  ;;  %vm1894_vm5 = vcmask 285696  }
  0xec   : > { %463 = vst [vmem:[#allocation2 + $0xa8] sm:$0xf] %v448_v0  ;;  %v2972_v61 = vpop.permute.xlu2 %561  ;;  %v3026_v0 = vld [vmem:[%s2585_s17 + $0xc] sm:$0xff] }
  0xed   : > { %464 = vst [vmem:[#allocation2 + $0xb0] sm:$0xf] %v449_v55  ;;  %824 = vrot.lane.b32.xlu1 %v2807_v18, %s2534_s27 }
  0xee   : > { %v2977_v29 = vld.sshfl [vmem:[#allocation1] sm:$0xff pattern:$0x75316420]  ;;  %v2979_v50 = vld.sshfl [vmem:[#allocation1 + $0x8] sm:$0xff pattern:$0x75316420] }
  0xef   : > { %v495_v57 = vpop.permute.xlu1 %494  ;;  %1239 = vst [vmem:[#allocation1] ss:$2 sm:$0xff] %v1218_v6 }
  0xf0   : > { %822 = vrot.lane.b32.xlu0 %v2805_v17, %s2534_s27  ;;  %v509_v34 = vsel %vm506_vm6, %v495_v57, %v2890_v49  ;;  %v2997_v39 = vld.sshfl [vmem:[#allocation1 + $0x20] sm:$0xff pattern:$0x75316420] }
  0xf1   : > { %524 = vst [vmem:[#allocation2 + $0x90] sm:$0xf0] %v509_v34  ;;  %v1288_v34 = vld [vmem:[%s2585_s17 + $0x20] sm:$0xf] }
  0xf2   : > { %v493_v53 = vpop.permute.xlu0 %492  ;;  %832 = vrot.lane.b32.xlu2 %v2908_v8, %s2534_s27  ;;  %v2995_v17 = vld.sshfl [vmem:[#allocation1 + $0x10] sm:$0xff pattern:$0x75316420]  ;;  %3997 = vst [vmem:[#allocation7_spill] sm:$0xff] %v2997_v39 }
  0xf3   : > { %v507_v18 = vsel %vm506_vm6, %v2861_v46, %v493_v53  ;;  %v508_v35 = vsel %vm506_vm6, %v493_v53, %v495_v57  ;;  %v3001_v44 = vld.sshfl [vmem:[#allocation1 + $0x18] sm:$0xff pattern:$0x75316420]  ;;  %v3005_v8 = vld.sshfl [vmem:[#allocation1 + $0x28] sm:$0xff pattern:$0x75316420] }
  0xf4   : > { %522 = vst [vmem:[#allocation2 + $0x80] sm:$0xf0] %v507_v18  ;;  %v2999_v42 = vpop.permute.xlu2 %567 }
  0xf5   : > { %523 = vst [vmem:[#allocation2 + $0x88] sm:$0xf0] %v508_v35  ;;  %830 = vrot.lane.b32.xlu1 %v2910_v10, %s2534_s27 }
  0xf6   : > { %3998 = vst [vmem:[#allocation8_spill] sm:$0xff] %v3005_v8  ;;  %v3010_v46 = vld.sshfl [vmem:[#allocation1] sm:$0xff pattern:$0x75316420] }
  0xf7   : > { %592 = vst.msk [vmem:[#allocation2 + $0xf8] sm:$0xf] %vm209_vm1, %v2999_v42  ;;  %v501_v3 = vpop.permute.xlu1 %500 }
  0xf8   : > { %1297 = vst [vmem:[#allocation1 + $0x11] ss:$2 sm:$0xff] %v2870_v48  ;;  %828 = vrot.lane.b32.xlu0 %v2831_v31, %s2534_s27  ;;  %v512_v59 = vsel %vm506_vm6, %v501_v3, %v2924_v25 }
  0xf9   : > { %3999 = vst [vmem:[#allocation9_spill] sm:$0xff] %v3010_v46 }
  0xfa   : > { %1228 = vst [vmem:[#allocation1 + $0x20] ss:$2 sm:$0xff] %v2893_v62  ;;  %v499_v10 = vpop.permute.xlu0 %498  ;;  %891 = vrot.lane.b32.xlu2 %v2698_v19, %s2535_s28 }
  0xfb   : > { %527 = vst [vmem:[#allocation2 + $0xa8] sm:$0xf0] %v512_v59  ;;  %v510_v48 = vsel %vm506_vm6, %v2890_v49, %v499_v10  ;;  %v511_v60 = vsel %vm506_vm6, %v499_v10, %v501_v3 }
  0xfc   : > { %1295 = vst [vmem:[#allocation1 + $0x1] ss:$2 sm:$0xff] %v2814_v23  ;;  %v3023_v31 = vpop.permute.xlu2 %621 }
  0xfd   : > { %525 = vst [vmem:[#allocation2 + $0x98] sm:$0xf0] %v510_v48  ;;  %889 = vrot.lane.b32.xlu1 %v2700_v20, %s2535_s28 }
  0xfe   : > { %526 = vst [vmem:[#allocation2 + $0xa0] sm:$0xf0] %v511_v60 }
  0xff   : > { %v3030_v55 = vld.sshfl [vmem:[#allocation1 + $0x10] sm:$0xff pattern:$0x75316420]  ;;  %v3032_v19 = vld.sshfl [vmem:[#allocation1 + $0x18] sm:$0xff pattern:$0x75316420]  ;;  %v554_v23 = vpop.permute.xlu1 %553 }
 0x100   : > { %1367 = vst [vmem:[#allocation1 + $0x10] ss:$2 sm:$0xff] %v3026_v0  ;;  %834 = vrot.lane.b32.xlu0 %v2686_v14, %s2534_s27  ;;  %v570_v6 = vsel %vm569_vm7, %v554_v23, %v2947_v12 }
 0x101   : > { %v3035_v49 = vld.sshfl [vmem:[#allocation1 + $0x20] sm:$0xff pattern:$0x75316420]  ;;  %v3041_v57 = vld.sshfl [vmem:[#allocation1 + $0x28] sm:$0xff pattern:$0x75316420] }
 0x102   : > { %4000 = vst [vmem:[#allocation10_spill] sm:$0xff] %v3041_v57  ;;  %v505_v53 = vpop.permute.xlu0 %504  ;;  %897 = vrot.lane.b32.xlu2 %v2863_v47, %s2535_s28 }
 0x103   : > { %585 = vst [vmem:[#allocation2 + $0xc0] sm:$0xf] %v570_v6  ;;  %v3044_v20 = vld.sshfl [vmem:[#allocation1] sm:$0xff pattern:$0x75316420]  ;;  %v513_v14 = vsel %vm506_vm6, %v2924_v25, %v505_v53  ;;  %v3068_v25 = vld [vmem:[%s2585_s17 + $0x14] sm:$0xff] }
 0x104   : > { %1299 = vst [vmem:[#allocation1 + $0x21] ss:$2 sm:$0xff] %v2893_v62  ;;  %v3049_v18 = vld.sshfl [vmem:[#allocation1 + $0x8] sm:$0xff pattern:$0x75316420]  ;;  %v3054_v35 = vpop.permute.xlu2 %627  ;;  %vm1682_vm6 = vcmask 367616  }
 0x105   : > { %529 = vst.msk [vmem:[#allocation2 + $0xb8] sm:$0xf0] %vm274_vm2, %v505_v53  ;;  %895 = vrot.lane.b32.xlu1 %v2845_v37, %s2535_s28 }
 0x106   : > { %528 = vst [vmem:[#allocation2 + $0xb0] sm:$0xf0] %v513_v14 }
 0x107   : > { %1310 = vst [vmem:[#allocation1 + $0x1] ss:$2 sm:$0xff] %v1288_v34  ;;  %v3058_v3 = vld.sshfl [vmem:[#allocation1 + $0x10] sm:$0xff pattern:$0x75316420]  ;;  %v560_v47 = vpop.permute.xlu1 %559  ;;  %v3087_v34 = vld [vmem:[%s2585_s17 + $0x4] sm:$0xff] }
 0x108   : > { %v3060_v59 = vld.sshfl [vmem:[#allocation1 + $0x18] sm:$0xff pattern:$0x75316420]  ;;  %893 = vrot.lane.b32.xlu0 %v2842_v36, %s2535_s28  ;;  %v573_v62 = vsel %vm569_vm7, %v560_v47, %v2972_v61 }
 0x109   : > { %1438 = vst [vmem:[#allocation1 + $0x11] ss:$2 sm:$0xff] %v3026_v0 }
 0x10a   : > { %588 = vst [vmem:[#allocation2 + $0xd8] sm:$0xf] %v573_v62  ;;  %v558_v37 = vpop.permute.xlu0 %557  ;;  %903 = vrot.lane.b32.xlu2 %v2985_v15, %s2535_s28 }
 0x10b   : > { %v3070_v10 = vld.sshfl [vmem:[#allocation1 + $0x20] sm:$0xff pattern:$0x75316420]  ;;  %v3074_v48 = vld.sshfl [vmem:[#allocation1 + $0x28] sm:$0xff pattern:$0x75316420]  ;;  %v571_v60 = vsel %vm569_vm7, %v2947_v12, %v558_v37  ;;  %v572_v36 = vsel %vm569_vm7, %v558_v37, %v560_v47 }
 0x10c   : > { %4001 = vst [vmem:[#allocation11_spill] sm:$0xff] %v3074_v48  ;;  %v3080_v23 = vpop.permute.xlu2 %680 }
 0x10d   : > { %1369 = vst [vmem:[#allocation1 + $0x20] ss:$2 sm:$0xff] %v3068_v25  ;;  %901 = vrot.lane.b32.xlu1 %v2987_v56, %s2535_s28 }
 0x10e   : > { %586 = vst [vmem:[#allocation2 + $0xc8] sm:$0xf] %v571_v60  ;;  %v3084_v6 = vld.sshfl [vmem:[#allocation1] sm:$0xff pattern:$0x75316420] }
 0x10f   : > { %587 = vst [vmem:[#allocation2 + $0xd0] sm:$0xf] %v572_v36  ;;  %v566_v12 = vpop.permute.xlu1 %565 }
 0x110   : > { %4002 = vst [vmem:[#allocation12_spill] sm:$0xff] %v3084_v6  ;;  %v3089_v15 = vld.sshfl [vmem:[#allocation1 + $0x10] sm:$0xff pattern:$0x75316420]  ;;  %899 = vrot.lane.b32.xlu0 %v2867_v43, %s2535_s28  ;;  %v576_v14 = vsel %vm569_vm7, %v566_v12, %v2999_v42 }
 0x111   : > { %v3091_v53 = vld.sshfl [vmem:[#allocation1 + $0x18] sm:$0xff pattern:$0x75316420]  ;;  %1365 = vst [vmem:[#allocation1] ss:$2 sm:$0xff] %v3087_v34 }
 0x112   : > { %1508 = vst [vmem:[#allocation1 + $0x10] ss:$2 sm:$0xff] %v3026_v0  ;;  %v564_v56 = vpop.permute.xlu0 %563  ;;  %961 = vrot.lane.b32.xlu2 %v2729_v32, %s2536_s29 }
 0x113   : > { %591 = vst [vmem:[#allocation2 + $0xf0] sm:$0xf] %v576_v14  ;;  %v574_v37 = vsel %vm569_vm7, %v2972_v61, %v564_v56  ;;  %v575_v43 = vsel %vm569_vm7, %v564_v56, %v566_v12  ;;  %v956_v61 = vld.sshfl [vmem:[#allocation1 + $0x38] sm:$0xff pattern:$0x75316420] }
 0x114   : > { %v3101_v47 = vld.sshfl [vmem:[#allocation1 + $0x20] sm:$0xff pattern:$0x75316420]  ;;  %v3103_v62 = vld.sshfl [vmem:[#allocation1 + $0x28] sm:$0xff pattern:$0x75316420]  ;;  %v3109_v42 = vpop.permute.xlu2 %686 }
 0x115   : > { %4003 = vst [vmem:[#allocation13_spill] sm:$0xff] %v3103_v62  ;;  %959 = vrot.lane.b32.xlu1 %v2731_v33, %s2536_s29  ;;  %v3125_v56 = vld [vmem:[%s2585_s17 + $0x18] sm:$0xff]  ;;  %v1359_v33 = vld [vmem:[%s2585_s17 + $0x24] sm:$0xf] }
 0x116   : > { %1440 = vst [vmem:[#allocation1 + $0x21] ss:$2 sm:$0xff] %v3068_v25 }
 0x117   : > { %589 = vst [vmem:[#allocation2 + $0xe0] sm:$0xf] %v574_v37  ;;  %v620_v36 = vpop.permute.xlu1 %619 }
 0x118   : > { %590 = vst [vmem:[#allocation2 + $0xe8] sm:$0xf] %v575_v43  ;;  %v3118_v12 = vld.sshfl [vmem:[#allocation1] sm:$0xff pattern:$0x75316420]  ;;  %905 = vrot.lane.b32.xlu0 %v2720_v28, %s2535_s28  ;;  %v635_v14 = vsel %vm633_vm8, %v620_v36, %v3023_v31 }
 0x119   : > { %v3113_v32 = vld.sshfl [vmem:[#allocation1 + $0x10] sm:$0xff pattern:$0x75316420]  ;;  %v3115_v60 = vld.sshfl [vmem:[#allocation1 + $0x18] sm:$0xff pattern:$0x75316420] }
 0x11a   : > { %1579 = vst [vmem:[#allocation1 + $0x11] ss:$2 sm:$0xff] %v3026_v0  ;;  %v3128_v37 = vld.sshfl [vmem:[#allocation1 + $0x8] sm:$0xff pattern:$0x75316420]  ;;  %v618_v8 = vpop.permute.xlu0 %617  ;;  %967 = vrot.lane.b32.xlu2 %v2897_v4, %s2536_s29 }
 0x11b   : > { %650 = vst [vmem:[#allocation2 + $0xc8] sm:$0xf0] %v635_v14  ;;  %v955_v43 = vld.sshfl [vmem:[#allocation1 + $0x30] sm:$0xff pattern:$0x75316420]  ;;  %v634_v28 = vsel %vm633_vm8, %v618_v8, %v620_v36 }
 0x11c   : > { %1019 = vst [vmem:[#allocation1 + $0x31] ss:$2 sm:$0xff] %v3125_v56  ;;  %v3138_v1 = vpop.permute.xlu2 %692 }
 0x11d   : > { %v3133_v48 = vld.sshfl [vmem:[#allocation1 + $0x20] sm:$0xff pattern:$0x75316420]  ;;  %v3136_v2 = vld.sshfl [vmem:[#allocation1 + $0x28] sm:$0xff pattern:$0x75316420]  ;;  %965 = vrot.lane.b32.xlu1 %v2875_v41, %s2536_s29 }
 0x11e   : > { %4004 = vst [vmem:[#allocation14_spill] sm:$0xff] %v3136_v2 }
 0x11f   : > { %1380 = vst [vmem:[#allocation1] ss:$2 sm:$0xff] %v1359_v33  ;;  %v626_v57 = vpop.permute.xlu1 %625 }
 0x120   : > { %649 = vst [vmem:[#allocation2 + $0xc0] sm:$0xf0] %v634_v28  ;;  %963 = vrot.lane.b32.xlu0 %v2872_v51, %s2536_s29  ;;  %v638_v8 = vsel %vm633_vm8, %v626_v57, %v3054_v35 }
 0x121   : > { %1510 = vst [vmem:[#allocation1 + $0x20] ss:$2 sm:$0xff] %v3068_v25  ;;  %v3143_v14 = vld.sshfl [vmem:[#allocation1 + $0x10] sm:$0xff pattern:$0x75316420] }
 0x122   : > { %v3145_v4 = vld.sshfl [vmem:[#allocation1 + $0x18] sm:$0xff pattern:$0x75316420]  ;;  %653 = vst [vmem:[#allocation2 + $0xe0] sm:$0xf0] %v638_v8  ;;  %v624_v36 = vpop.permute.xlu0 %623  ;;  %973 = vrot.lane.b32.xlu2 %v956_v61, %s2536_s29 }
 0x123   : > { %1649 = vst [vmem:[#allocation1 + $0x10] ss:$2 sm:$0xff] %v3026_v0  ;;  %v1027_v41 = vld.sshfl [vmem:[#allocation1 + $0x38] sm:$0xff pattern:$0x75316420]  ;;  %v636_v28 = vsel %vm633_vm8, %v3023_v31, %v624_v36  ;;  %v637_v46 = vsel %vm633_vm8, %v624_v36, %v626_v57 }
 0x124   : > { %v3153_v33 = vld.sshfl [vmem:[#allocation1 + $0x30] sm:$0xff pattern:$0x75316420]  ;;  %651 = vst [vmem:[#allocation2 + $0xd0] sm:$0xf0] %v636_v28  ;;  %v3159_v6 = vpop.permute.xlu2 %750 }
 0x125   : > { %1089 = vst [vmem:[#allocation1 + $0x30] ss:$2 sm:$0xff] %v3125_v56  ;;  %971 = vrot.lane.b32.xlu1 %v955_v43, %s2536_s29 }
 0x126   : > { %652 = vst [vmem:[#allocation2 + $0xd8] sm:$0xf0] %v637_v46  ;;  %v3171_v31 = vld.sshfl [vmem:[#allocation1] sm:$0xff pattern:$0x75316420] }
 0x127   : > { %v632_v2 = vpop.permute.xlu1 %631  ;;  %4006 = vst [vmem:[#allocation16_spill] sm:$0xff] %v3171_v31  ;;  %v1429_v31 = vld [vmem:[%s2585_s17 + $0x24] sm:$0xf] }
 0x128   : > { %v3161_v51 = vld.sshfl [vmem:[#allocation1 + $0x20] sm:$0xff pattern:$0x75316420]  ;;  %v3164_v8 = vld.sshfl [vmem:[#allocation1 + $0x28] sm:$0xff pattern:$0x75316420]  ;;  %969 = vrot.lane.b32.xlu0 %v2899_v5, %s2536_s29 }
 0x129   : > { %4005 = vst [vmem:[#allocation15_spill] sm:$0xff] %v3164_v8 }
 0x12a   : > { %v3166_v61 = vld.sshfl [vmem:[#allocation1 + $0x10] sm:$0xff pattern:$0x75316420]  ;;  %v3168_v62 = vld.sshfl [vmem:[#allocation1 + $0x18] sm:$0xff pattern:$0x75316420]  ;;  %v630_v46 = vpop.permute.xlu0 %629  ;;  %1032 = vrot.lane.b32.xlu2 %v2776_v58, %s2537_s30 }
 0x12b   : > { %1720 = vst [vmem:[#allocation1 + $0x11] ss:$2 sm:$0xff] %v3026_v0  ;;  %v639_v57 = vsel %vm633_vm8, %v3054_v35, %v630_v46  ;;  %v640_v43 = vsel %vm633_vm8, %v630_v46, %v632_v2  ;;  %vm1753_vm8 = vcmask 359424  }
 0x12c   : > { %656 = vst.msk [vmem:[#allocation2 + $0xf8] sm:$0xf0] %vm274_vm2, %v632_v2  ;;  %v3183_v36 = vpop.permute.xlu2 %756 }
 0x12d   : > { %1581 = vst [vmem:[#allocation1 + $0x21] ss:$2 sm:$0xff] %v3068_v25  ;;  %1030 = vrot.lane.b32.xlu1 %v2781_v63, %s2537_s30 }
 0x12e   : > { %1436 = vst [vmem:[#allocation1 + $0x1] ss:$2 sm:$0xff] %v3087_v34 }
 0x12f   : > { %654 = vst [vmem:[#allocation2 + $0xe8] sm:$0xf0] %v639_v57  ;;  %v685_v58 = vpop.permute.xlu1 %684 }
 0x130   : > { %655 = vst [vmem:[#allocation2 + $0xf0] sm:$0xf0] %v640_v43  ;;  %975 = vrot.lane.b32.xlu0 %v2751_v45, %s2536_s29  ;;  %v699_v2 = vsel %vm696_vm9, %v685_v58, %v3109_v42 }
 0x131   : > { %714 = vst [vmem:[#allocation2 + $0x110] sm:$0xf] %v699_v2 }
 0x132   : > { %v3187_v5 = vld.sshfl [vmem:[#allocation1 + $0x10] sm:$0xff pattern:$0x75316420]  ;;  %v3189_v28 = vld.sshfl [vmem:[#allocation1 + $0x18] sm:$0xff pattern:$0x75316420]  ;;  %v683_v57 = vpop.permute.xlu0 %682  ;;  %1038 = vrot.lane.b32.xlu2 %v2928_v30, %s2537_s30 }
 0x133   : > { %1790 = vst [vmem:[#allocation1 + $0x10] ss:$2 sm:$0xff] %v3026_v0  ;;  %v697_v45 = vsel %vm696_vm9, %v3080_v23, %v683_v57  ;;  %v698_v8 = vsel %vm696_vm9, %v683_v57, %v685_v58  ;;  %v3226_v58 = vld.sshfl [vmem:[#allocation1 + $0x38] sm:$0xff pattern:$0x75316420] }
 0x134   : > { %v3197_v35 = vld.sshfl [vmem:[#allocation1 + $0x20] sm:$0xff pattern:$0x75316420]  ;;  %v3199_v46 = vld.sshfl [vmem:[#allocation1 + $0x28] sm:$0xff pattern:$0x75316420]  ;;  %v3211_v16 = vpop.permute.xlu2 %762 }
 0x135   : > { %4007 = vst [vmem:[#allocation17_spill] sm:$0xff] %v3199_v46  ;;  %v3201_v63 = vld.sshfl [vmem:[#allocation1] sm:$0xff pattern:$0x75316420]  ;;  %1036 = vrot.lane.b32.xlu1 %v2913_v13, %s2537_s30 }
 0x136   : > { %1651 = vst [vmem:[#allocation1 + $0x20] ss:$2 sm:$0xff] %v3068_v25  ;;  %v3206_v43 = vld.sshfl [vmem:[#allocation1 + $0x8] sm:$0xff pattern:$0x75316420] }
 0x137   : > { %1451 = vst [vmem:[#allocation1 + $0x1] ss:$2 sm:$0xff] %v1429_v31  ;;  %v691_v46 = vpop.permute.xlu1 %690  ;;  %v3224_v31 = vld.sshfl [vmem:[#allocation1 + $0x30] sm:$0xff pattern:$0x75316420] }
 0x138   : > { %712 = vst [vmem:[#allocation2 + $0x100] sm:$0xf] %v697_v45  ;;  %1034 = vrot.lane.b32.xlu0 %v2901_v52, %s2537_s30  ;;  %v702_v23 = vsel %vm696_vm9, %v691_v46, %v3138_v1 }
 0x139   : > { %713 = vst [vmem:[#allocation2 + $0x108] sm:$0xf] %v698_v8 }
 0x13a   : > { %v3215_v2 = vld.sshfl [vmem:[#allocation1 + $0x10] sm:$0xff pattern:$0x75316420]  ;;  %v3217_v30 = vld.sshfl [vmem:[#allocation1 + $0x18] sm:$0xff pattern:$0x75316420]  ;;  %v689_v13 = vpop.permute.xlu0 %688  ;;  %1044 = vrot.lane.b32.xlu2 %v1027_v41, %s2537_s30 }
 0x13b   : > { %1861 = vst [vmem:[#allocation1 + $0x11] ss:$2 sm:$0xff] %v3026_v0  ;;  %v700_v52 = vsel %vm696_vm9, %v3109_v42, %v689_v13  ;;  %v701_v45 = vsel %vm696_vm9, %v689_v13, %v691_v46 }
 0x13c   : > { %4008 = vst [vmem:[#allocation18_spill] sm:$0xff] %v3226_v58  ;;  %v3238_v24 = vpop.permute.xlu2 %820 }
 0x13d   : > { %717 = vst [vmem:[#allocation2 + $0x128] sm:$0xf] %v702_v23  ;;  %v3228_v8 = vld.sshfl [vmem:[#allocation1 + $0x20] sm:$0xff pattern:$0x75316420]  ;;  %1042 = vrot.lane.b32.xlu1 %v3153_v33, %s2537_s30 }
 0x13e   : > { %v3231_v57 = vld.sshfl [vmem:[#allocation1 + $0x28] sm:$0xff pattern:$0x75316420]  ;;  %1160 = vst [vmem:[#allocation1 + $0x31] ss:$2 sm:$0xff] %v3125_v56 }
 0x13f   : > { %4009 = vst [vmem:[#allocation19_spill] sm:$0xff] %v3231_v57  ;;  %v3242_v41 = vld.sshfl [vmem:[#allocation1] sm:$0xff pattern:$0x75316420]  ;;  %v749_v57 = vpop.permute.xlu1 %748 }
 0x140   : > { %1722 = vst [vmem:[#allocation1 + $0x21] ss:$2 sm:$0xff] %v3068_v25  ;;  %1040 = vrot.lane.b32.xlu0 %v2930_v26, %s2537_s30  ;;  %v767_v42 = vsel %vm766_vm10, %v749_v57, %v3159_v6 }
 0x141   : > { %715 = vst [vmem:[#allocation2 + $0x118] sm:$0xf] %v700_v52 }
 0x142   : > { %716 = vst [vmem:[#allocation2 + $0x120] sm:$0xf] %v701_v45  ;;  %v3244_v23 = vld.sshfl [vmem:[#allocation1 + $0x10] sm:$0xff pattern:$0x75316420]  ;;  %v695_v46 = vpop.permute.xlu0 %694  ;;  %1102 = vrot.lane.b32.xlu2 %v2850_v11, %s2538_s4 }
 0x143   : > { %4010 = vst [vmem:[#allocation20_spill] sm:$0xff] %v3242_v41  ;;  %v3246_v58 = vld.sshfl [vmem:[#allocation1 + $0x18] sm:$0xff pattern:$0x75316420]  ;;  %v703_v26 = vsel %vm696_vm9, %v3138_v1, %v695_v46  ;;  %v1500_v45 = vld [vmem:[%s2585_s17 + $0x24] sm:$0xf] }
 0x144   : > { %1931 = vst [vmem:[#allocation1 + $0x10] ss:$2 sm:$0xff] %v3026_v0  ;;  %v3267_v52 = vpop.permute.xlu2 %826  ;;  %vm1612_vm9 = vcmask 375808  }
 0x145   : > { %1506 = vst [vmem:[#allocation1] ss:$2 sm:$0xff] %v3087_v34  ;;  %v3254_v33 = vld.sshfl [vmem:[#allocation1 + $0x30] sm:$0xff pattern:$0x75316420]  ;;  %1100 = vrot.lane.b32.xlu1 %v2847_v38, %s2538_s4 }
 0x146   : > { %783 = vst [vmem:[#allocation2 + $0x100] sm:$0xf0] %v767_v42  ;;  %v3265_v57 = vld.sshfl [vmem:[#allocation1 + $0x38] sm:$0xff pattern:$0x75316420] }
 0x147   : > { %4011 = vst [vmem:[#allocation21_spill] sm:$0xff] %v3254_v33  ;;  %v3258_v13 = vld.sshfl [vmem:[#allocation1 + $0x20] sm:$0xff pattern:$0x75316420]  ;;  %v755_v11 = vpop.permute.xlu1 %754 }
 0x148   : > { %v3260_v0 = vld.sshfl [vmem:[#allocation1 + $0x28] sm:$0xff pattern:$0x75316420]  ;;  %719 = vst.msk [vmem:[#allocation2 + $0x138] sm:$0xf] %vm209_vm1, %v695_v46  ;;  %1046 = vrot.lane.b32.xlu0 %v2811_v22, %s2537_s30  ;;  %v770_v1 = vsel %vm766_vm10, %v755_v11, %v3183_v36 }
 0x149   : > { %4012 = vst [vmem:[#allocation22_spill] sm:$0xff] %v3260_v0 }
 0x14a   : > { %4013 = vst [vmem:[#allocation23_spill] sm:$0xff] %v3265_v57  ;;  %1108 = vrot.lane.b32.xlu2 %v2954_v7, %s2538_s4 }
 0x14b   : > { %718 = vst [vmem:[#allocation2 + $0x130] sm:$0xf] %v703_v26  ;;  %v753_v26 = vpop.permute.xlu0 %752 }
 0x14c   : > { %1792 = vst [vmem:[#allocation1 + $0x20] ss:$2 sm:$0xff] %v3068_v25  ;;  %v3274_v42 = vld.sshfl [vmem:[#allocation1] sm:$0xff pattern:$0x75316420]  ;;  %v768_v38 = vsel %vm766_vm10, %v3159_v6, %v753_v26  ;;  %v769_v33 = vsel %vm766_vm10, %v753_v26, %v755_v11  ;;  %v3287_v57 = vpop.permute.xlu2 %832 }
 0x14d   : > { %1230 = vst [vmem:[#allocation1 + $0x30] ss:$2 sm:$0xff] %v3125_v56  ;;  %v3280_v46 = vld.sshfl [vmem:[#allocation1 + $0x8] sm:$0xff pattern:$0x75316420]  ;;  %1106 = vrot.lane.b32.xlu1 %v2941_v40, %s2538_s4  ;;  %v3313_v26 = vld [vmem:[%s2585_s17 + $0x1c] sm:$0xff] }
 0x14e   : > { %786 = vst [vmem:[#allocation2 + $0x118] sm:$0xf0] %v770_v1  ;;  %v1938_v6 = vld.sshfl [vmem:[#allocation1 + $0x10] sm:$0xff pattern:$0x75316420] }
 0x14f   : > { %1521 = vst [vmem:[#allocation1] ss:$2 sm:$0xff] %v1500_v45  ;;  %v761_v45 = vpop.permute.xlu1 %760 }
 0x150   : > { %784 = vst [vmem:[#allocation2 + $0x108] sm:$0xf0] %v768_v38  ;;  %1104 = vrot.lane.b32.xlu0 %v2939_v27, %s2538_s4 }
 0x151   : > { %785 = vst [vmem:[#allocation2 + $0x110] sm:$0xf0] %v769_v33  ;;  %v773_v33 = vsel %vm766_vm10, %v761_v45, %v3211_v16 }
 0x152   : > { %789 = vst [vmem:[#allocation2 + $0x130] sm:$0xf0] %v773_v33  ;;  %1950 = vrot.lane.b32.xlu2 %v1938_v6, %s2539_s5 }
 0x153   : > { %v3289_v22 = vld.sshfl [vmem:[#allocation1 + $0x20] sm:$0xff pattern:$0x75316420]  ;;  %v3293_v1 = vld.sshfl [vmem:[#allocation1 + $0x28] sm:$0xff pattern:$0x75316420]  ;;  %v759_v11 = vpop.permute.xlu0 %758 }
 0x154   : > { %v3295_v41 = vld.sshfl [vmem:[#allocation1 + $0x30] sm:$0xff pattern:$0x75316420]  ;;  %v3297_v7 = vld.sshfl [vmem:[#allocation1 + $0x38] sm:$0xff pattern:$0x75316420]  ;;  %v772_v27 = vsel %vm766_vm10, %v759_v11, %v761_v45  ;;  %v3315_v38 = vpop.permute.xlu2 %891 }
 0x155   : > { %4014 = vst [vmem:[#allocation24_spill] sm:$0xff] %v3295_v41  ;;  %1112 = vrot.lane.b32.xlu1 %v3224_v31, %s2538_s4 }
 0x156   : > { %4015 = vst [vmem:[#allocation25_spill] sm:$0xff] %v3297_v7  ;;  %v3305_v40 = vld.sshfl [vmem:[#allocation1] sm:$0xff pattern:$0x75316420] }
 0x157   : > { %1301 = vst [vmem:[#allocation1 + $0x31] ss:$2 sm:$0xff] %v3125_v56  ;;  %v771_v56 = vsel %vm766_vm10, %v3183_v36, %v759_v11  ;;  %v819_v36 = vpop.permute.xlu1 %818 }
 0x158   : > { %1863 = vst [vmem:[#allocation1 + $0x21] ss:$2 sm:$0xff] %v3068_v25  ;;  %1110 = vrot.lane.b32.xlu0 %v2956_v21, %s2538_s4  ;;  %v837_v45 = vsel %vm836_vm11, %v819_v36, %v3238_v24 }
 0x159   : > { %4016 = vst [vmem:[#allocation26_spill] sm:$0xff] %v3305_v40 }
 0x15a   : > { %1577 = vst [vmem:[#allocation1 + $0x1] ss:$2 sm:$0xff] %v3087_v34  ;;  %1809 = vrot.lane.b32.xlu2 %v3215_v2, %s2540_s6 }
 0x15b   : > { %787 = vst [vmem:[#allocation2 + $0x120] sm:$0xf0] %v771_v56  ;;  %v1570_v56 = vld [vmem:[%s2585_s17 + $0x24] sm:$0xf] }
 0x15c   : > { %788 = vst [vmem:[#allocation2 + $0x128] sm:$0xf0] %v772_v27  ;;  %v765_v27 = vpop.permute.xlu0 %764  ;;  %v3341_v36 = vpop.permute.xlu2 %897 }
 0x15d   : > { %853 = vst [vmem:[#allocation2 + $0x140] sm:$0xf] %v837_v45  ;;  %v774_v21 = vsel %vm766_vm10, %v3211_v16, %v765_v27  ;;  %v1939_v45 = vld.sshfl [vmem:[#allocation1 + $0x18] sm:$0xff pattern:$0x75316420]  ;;  %vm1541_vm10 = vcmask 441344  }
 0x15e   : > { %v3319_v33 = vld.sshfl [vmem:[#allocation1 + $0x30] sm:$0xff pattern:$0x75316420]  ;;  %v3321_v6 = vld.sshfl [vmem:[#allocation1 + $0x38] sm:$0xff pattern:$0x75316420] }
 0x15f   : > { %4017 = vst [vmem:[#allocation27_spill] sm:$0xff] %v3319_v33  ;;  %v1870_v41 = vld.sshfl [vmem:[#allocation1 + $0x20] sm:$0xff pattern:$0x75316420]  ;;  %v825_v2 = vpop.permute.xlu1 %824 }
 0x160   : > { %4018 = vst [vmem:[#allocation28_spill] sm:$0xff] %v3321_v6  ;;  %v3328_v11 = vld.sshfl [vmem:[#allocation1 + $0x28] sm:$0xff pattern:$0x75316420]  ;;  %1952 = vrot.lane.b32.xlu0 %v1939_v45, %s2539_s5 }
 0x161   : > { %1371 = vst [vmem:[#allocation1 + $0x30] ss:$2 sm:$0xff] %v3313_v26  ;;  %v3331_v31 = vld.sshfl [vmem:[#allocation1] sm:$0xff pattern:$0x75316420] }
 0x162   : > { %1933 = vst [vmem:[#allocation1 + $0x20] ss:$2 sm:$0xff] %v3068_v25  ;;  %v3336_v6 = vld.sshfl [vmem:[#allocation1 + $0x8] sm:$0xff pattern:$0x75316420]  ;;  %v840_v25 = vsel %vm836_vm11, %v825_v2, %v3267_v52  ;;  %1882 = vrot.lane.b32.xlu2 %v3246_v58, %s2541_s7 }
 0x163   : > { %1592 = vst [vmem:[#allocation1 + $0x1] ss:$2 sm:$0xff] %v1570_v56 }
 0x164   : > { %790 = vst.msk [vmem:[#allocation2 + $0x138] sm:$0xf0] %vm274_vm2, %v774_v21  ;;  %v823_v16 = vpop.permute.xlu0 %822  ;;  %v3360_v45 = vpop.permute.xlu2 %903 }
 0x165   : > { %856 = vst [vmem:[#allocation2 + $0x158] sm:$0xf] %v840_v25  ;;  %v838_v27 = vsel %vm836_vm11, %v3238_v24, %v823_v16  ;;  %v839_v21 = vsel %vm836_vm11, %v823_v16, %v825_v2  ;;  %v1641_v2 = vld [vmem:[%s2585_s17 + $0x24] sm:$0xf] }
 0x166   : > { %854 = vst [vmem:[#allocation2 + $0x148] sm:$0xf] %v838_v27 }
 0x167   : > { %855 = vst [vmem:[#allocation2 + $0x150] sm:$0xf] %v839_v21  ;;  %v831_v58 = vpop.permute.xlu1 %830 }
 0x168   : > { %v3343_v7 = vld.sshfl [vmem:[#allocation1 + $0x30] sm:$0xff pattern:$0x75316420]  ;;  %v3345_v33 = vld.sshfl [vmem:[#allocation1 + $0x38] sm:$0xff pattern:$0x75316420]  ;;  %1811 = vrot.lane.b32.xlu0 %v3217_v30, %s2540_s6  ;;  %v843_v24 = vsel %vm836_vm11, %v831_v58, %v3287_v57 }
 0x169   : > { %4019 = vst [vmem:[#allocation29_spill] sm:$0xff] %v3343_v7  ;;  %v1940_v0 = vld.sshfl [vmem:[#allocation1 + $0x20] sm:$0xff pattern:$0x75316420] }
 0x16a   : > { %4020 = vst [vmem:[#allocation30_spill] sm:$0xff] %v3345_v33  ;;  %1954 = vrot.lane.b32.xlu1 %v1940_v0, %s2539_s5  ;;  %v3354_v56 = vld.sshfl [vmem:[#allocation1] sm:$0xff pattern:$0x75316420]  ;;  %1813 = vrot.lane.b32.xlu2 %v3289_v22, %s2540_s6 }
 0x16b   : > { %1442 = vst [vmem:[#allocation1 + $0x31] ss:$2 sm:$0xff] %v3313_v26 }
 0x16c   : > { %4021 = vst [vmem:[#allocation31_spill] sm:$0xff] %v3354_v56  ;;  %v829_v16 = vpop.permute.xlu0 %828 }
 0x16d   : > { %1647 = vst [vmem:[#allocation1] ss:$2 sm:$0xff] %v3087_v34  ;;  %v842_v30 = vsel %vm836_vm11, %v829_v16, %v831_v58 }
 0x16e   : > { %859 = vst [vmem:[#allocation2 + $0x170] sm:$0xf] %v843_v24 }
 0x16f   : > { %858 = vst [vmem:[#allocation2 + $0x168] sm:$0xf] %v842_v30  ;;  %v890_v22 = vpop.permute.xlu1 %889 }
 0x170   : > { %1884 = vrot.lane.b32.xlu0 %v1870_v41, %s2541_s7 }
 0x172   : > { %v3362_v0 = vld.sshfl [vmem:[#allocation1 + $0x30] sm:$0xff pattern:$0x75316420]  ;;  %v3364_v25 = vld.sshfl [vmem:[#allocation1 + $0x38] sm:$0xff pattern:$0x75316420]  ;;  %1880 = vrot.lane.b32.xlu1 %v3244_v23, %s2541_s7  ;;  %1670 = vrot.lane.b32.xlu2 %v3168_v62, %s2542_s8 }
 0x173   : > { %4022 = vst [vmem:[#allocation32_spill] sm:$0xff] %v3362_v0  ;;  %v841_v0 = vsel %vm836_vm11, %v3267_v52, %v829_v16  ;;  %v908_v52 = vsel %vm907_vm12, %v890_v22, %v3315_v38 }
 0x174   : > { %4023 = vst [vmem:[#allocation33_spill] sm:$0xff] %v3364_v25  ;;  %v3376_v27 = vld.sshfl [vmem:[#allocation1] sm:$0xff pattern:$0x75316420]  ;;  %v3383_v25 = vpop.permute.xlu2 %961 }
 0x175   : > { %1512 = vst [vmem:[#allocation1 + $0x30] ss:$2 sm:$0xff] %v3313_v26  ;;  %v3378_v21 = vld.sshfl [vmem:[#allocation1 + $0x8] sm:$0xff pattern:$0x75316420] }
 0x176   : > { %1662 = vst [vmem:[#allocation1] ss:$2 sm:$0xff] %v1641_v2 }
 0x177   : > { %857 = vst [vmem:[#allocation2 + $0x160] sm:$0xf] %v841_v0  ;;  %v835_v0 = vpop.permute.xlu0 %834 }
 0x178   : > { %924 = vst [vmem:[#allocation2 + $0x140] sm:$0xf0] %v908_v52  ;;  %v844_v2 = vsel %vm836_vm11, %v3287_v57, %v835_v0  ;;  %1739 = vrot.lane.b32.xlu0 %v3187_v5, %s2543_s9  ;;  %v1711_v57 = vld [vmem:[%s2585_s17 + $0x24] sm:$0xf]  ;;  %vm1400_vm11 = vcmask 457728  }
 0x179   : > { %860 = vst.msk [vmem:[#allocation2 + $0x178] sm:$0xf] %vm209_vm1, %v844_v2 }
 0x17a   : > { %1668 = vrot.lane.b32.xlu1 %v3166_v61, %s2542_s8  ;;  %v896_v61 = vpop.permute.xlu1 %895 }
 0x17b   : > { %v911_v62 = vsel %vm907_vm12, %v896_v61, %v3341_v36 }
 0x17c   : > { %v3385_v23 = vld.sshfl [vmem:[#allocation1 + $0x30] sm:$0xff pattern:$0x75316420]  ;;  %v3387_v24 = vld.sshfl [vmem:[#allocation1 + $0x38] sm:$0xff pattern:$0x75316420]  ;;  %v3403_v41 = vpop.permute.xlu2 %967 }
 0x17d   : > { %4024 = vst [vmem:[#allocation34_spill] sm:$0xff] %v3385_v23  ;;  %v3397_v58 = vld.sshfl [vmem:[#allocation1] sm:$0xff pattern:$0x75316420] }
 0x17e   : > { %4025 = vst [vmem:[#allocation35_spill] sm:$0xff] %v3387_v24  ;;  %v1782_v24 = vld [vmem:[%s2585_s17 + $0x24] sm:$0xf] }
 0x17f   : > { %1583 = vst [vmem:[#allocation1 + $0x31] ss:$2 sm:$0xff] %v3313_v26  ;;  %v894_v22 = vpop.permute.xlu0 %893  ;;  %v1852_v23 = vld [vmem:[%s2585_s17 + $0x24] sm:$0xf] }
 0x180   : > { %4026 = vst [vmem:[#allocation36_spill] sm:$0xff] %v3397_v58  ;;  %v909_v2 = vsel %vm907_vm12, %v3315_v38, %v894_v22  ;;  %v910_v56 = vsel %vm907_vm12, %v894_v22, %v896_v61 }
 0x181   : > { %1718 = vst [vmem:[#allocation1 + $0x1] ss:$2 sm:$0xff] %v3087_v34 }
 0x182   : > { %927 = vst [vmem:[#allocation2 + $0x158] sm:$0xf0] %v911_v62  ;;  %1741 = vrot.lane.b32.xlu1 %v3189_v28, %s2543_s9  ;;  %v902_v28 = vpop.permute.xlu1 %901 }
 0x183   : > { %925 = vst [vmem:[#allocation2 + $0x148] sm:$0xf0] %v909_v2  ;;  %v914_v33 = vsel %vm907_vm12, %v902_v28, %v3360_v45 }
 0x184   : > { %926 = vst [vmem:[#allocation2 + $0x150] sm:$0xf0] %v910_v56  ;;  %v3424_v5 = vpop.permute.xlu2 %973 }
 0x185   : > { %930 = vst [vmem:[#allocation2 + $0x170] sm:$0xf0] %v914_v33 }
 0x186   : > { %v3405_v16 = vld.sshfl [vmem:[#allocation1 + $0x30] sm:$0xff pattern:$0x75316420]  ;;  %v3407_v30 = vld.sshfl [vmem:[#allocation1 + $0x38] sm:$0xff pattern:$0x75316420] }
 0x187   : > { %4027 = vst [vmem:[#allocation37_spill] sm:$0xff] %v3405_v16  ;;  %v900_v61 = vpop.permute.xlu0 %899 }
 0x188   : > { %4028 = vst [vmem:[#allocation38_spill] sm:$0xff] %v3407_v30  ;;  %v3417_v52 = vld.sshfl [vmem:[#allocation1] sm:$0xff pattern:$0x75316420]  ;;  %v912_v56 = vsel %vm907_vm12, %v3341_v36, %v900_v61 }
 0x189   : > { %1653 = vst [vmem:[#allocation1 + $0x30] ss:$2 sm:$0xff] %v3313_v26  ;;  %v3419_v0 = vld.sshfl [vmem:[#allocation1 + $0x8] sm:$0xff pattern:$0x75316420] }
 0x18a   : > { %1733 = vst [vmem:[#allocation1 + $0x1] ss:$2 sm:$0xff] %v1711_v57  ;;  %v913_v57 = vsel %vm907_vm12, %v900_v61, %v902_v28  ;;  %v960_v33 = vpop.permute.xlu1 %959 }
 0x18b   : > { %928 = vst [vmem:[#allocation2 + $0x160] sm:$0xf0] %v912_v56  ;;  %v978_v16 = vsel %vm977_vm13, %v960_v33, %v3383_v25 }
 0x18c   : > { %929 = vst [vmem:[#allocation2 + $0x168] sm:$0xf0] %v913_v57  ;;  %v3444_v40 = vpop.permute.xlu2 %1032 }
 0x18d   : > { %994 = vst [vmem:[#allocation2 + $0x180] sm:$0xf] %v978_v16 }
 0x18f   : > { %v906_v28 = vpop.permute.xlu0 %905 }
 0x190   : > { %v3426_v7 = vld.sshfl [vmem:[#allocation1 + $0x30] sm:$0xff pattern:$0x75316420]  ;;  %v3428_v62 = vld.sshfl [vmem:[#allocation1 + $0x38] sm:$0xff pattern:$0x75316420]  ;;  %v915_v61 = vsel %vm907_vm12, %v3360_v45, %v906_v28 }
 0x191   : > { %1724 = vst [vmem:[#allocation1 + $0x31] ss:$2 sm:$0xff] %v3313_v26  ;;  %v3433_v38 = vld.sshfl [vmem:[#allocation1] sm:$0xff pattern:$0x75316420]  ;;  %vm1471_vm12 = vcmask 449536  }
 0x192   : > { %4029 = vst [vmem:[#allocation39_spill] sm:$0xff] %v3433_v38  ;;  %v966_v33 = vpop.permute.xlu1 %965 }
 0x193   : > { %1788 = vst [vmem:[#allocation1] ss:$2 sm:$0xff] %v3087_v34  ;;  %v981_v16 = vsel %vm977_vm13, %v966_v33, %v3403_v41 }
 0x194   : > { %931 = vst.msk [vmem:[#allocation2 + $0x178] sm:$0xf0] %vm274_vm2, %v915_v61 }
 0x195   : > { %997 = vst [vmem:[#allocation2 + $0x198] sm:$0xf] %v981_v16 }
 0x198   : > { %v3439_v22 = vld.sshfl [vmem:[#allocation1 + $0x30] sm:$0xff pattern:$0x75316420]  ;;  %v3441_v2 = vld.sshfl [vmem:[#allocation1 + $0x38] sm:$0xff pattern:$0x75316420] }
 0x199   : > { %1794 = vst [vmem:[#allocation1 + $0x30] ss:$2 sm:$0xff] %v3313_v26 }
 0x19a   : > { %v1796_v36 = vld.sshfl [vmem:[#allocation1 + $0x8] sm:$0xff pattern:$0x75316420]  ;;  %v1795_v30 = vld.sshfl [vmem:[#allocation1] sm:$0xff pattern:$0x75316420]  ;;  %v972_v61 = vpop.permute.xlu1 %971 }
 0x19b   : > { %1807 = vrot.lane.b32.xlu0 %v1796_v36, %s2540_s6  ;;  %1805 = vrot.lane.b32.xlu2 %v1795_v30, %s2540_s6  ;;  %1803 = vst [vmem:[#allocation1] ss:$2 sm:$0xff] %v1782_v24  ;;  %v1039_v36 = vpop.permute.xlu2 %1038  ;;  %v964_v24 = vpop.permute.xlu0 %963  ;;  %v984_v16 = vsel %vm977_vm13, %v972_v61, %v3424_v5 }
 0x19c   : > { %v979_v45 = vsel %vm977_vm13, %v3383_v25, %v964_v24  ;;  %v980_v28 = vsel %vm977_vm13, %v964_v24, %v966_v33  ;;  %1000 = vst [vmem:[#allocation2 + $0x1b0] sm:$0xf] %v984_v16 }
 0x19d   : > { %995 = vst [vmem:[#allocation2 + $0x188] sm:$0xf] %v979_v45 }
 0x19e   : > { %996 = vst [vmem:[#allocation2 + $0x190] sm:$0xf] %v980_v28 }
 0x1a0   : > { %v3454_v56 = vld.sshfl [vmem:[#allocation1 + $0x30] sm:$0xff pattern:$0x75316420]  ;;  %v3456_v57 = vld.sshfl [vmem:[#allocation1 + $0x38] sm:$0xff pattern:$0x75316420] }
 0x1a1   : > { %1865 = vst [vmem:[#allocation1 + $0x31] ss:$2 sm:$0xff] %v3313_v26 }
 0x1a2   : > { %v3461_v30 = vld.sshfl [vmem:[#allocation1] sm:$0xff pattern:$0x75316420]  ;;  %v1031_v24 = vpop.permute.xlu1 %1030 }
 0x1a3   : > { %1859 = vst [vmem:[#allocation1 + $0x1] ss:$2 sm:$0xff] %v3087_v34  ;;  %1672 = vrot.lane.b32.xlu0 %v3228_v8, %s2542_s8  ;;  %v970_v38 = vpop.permute.xlu0 %969  ;;  %v1045_v33 = vpop.permute.xlu2 %1044  ;;  %v1049_v45 = vsel %vm1048_vm14, %v1031_v24, %v3444_v40 }
 0x1a4   : > { %v982_v8 = vsel %vm977_vm13, %v3403_v41, %v970_v38  ;;  %v983_v25 = vsel %vm977_vm13, %v970_v38, %v972_v61  ;;  %1065 = vst [vmem:[#allocation2 + $0x180] sm:$0xf0] %v1049_v45 }
 0x1a5   : > { %998 = vst [vmem:[#allocation2 + $0x1a0] sm:$0xf] %v982_v8 }
 0x1a6   : > { %999 = vst [vmem:[#allocation2 + $0x1a8] sm:$0xf] %v983_v25 }
 0x1a8   : > { %v3498_v45 = vld.sshfl [vmem:[#allocation1 + $0x30] sm:$0xff pattern:$0x75316420] }
 0x1aa   : > { %v1866_v39 = vld.sshfl [vmem:[#allocation1] sm:$0xff pattern:$0x75316420]  ;;  %v1867_v58 = vld.sshfl [vmem:[#allocation1 + $0x8] sm:$0xff pattern:$0x75316420]  ;;  %v1037_v41 = vpop.permute.xlu1 %1036 }
 0x1ab   : > { %1876 = vrot.lane.b32.xlu1 %v1866_v39, %s2541_s7  ;;  %1878 = vrot.lane.b32.xlu2 %v1867_v58, %s2541_s7  ;;  %1874 = vst [vmem:[#allocation1 + $0x1] ss:$2 sm:$0xff] %v1852_v23  ;;  %v976_v39 = vpop.permute.xlu0 %975  ;;  %v1103_v58 = vpop.permute.xlu2 %1102  ;;  %v1052_v38 = vsel %vm1048_vm14, %v1037_v41, %v1039_v36 }
 0x1ac   : > { %v985_v23 = vsel %vm977_vm13, %v3424_v5, %v976_v39  ;;  %1068 = vst [vmem:[#allocation2 + $0x198] sm:$0xf0] %v1052_v38  ;;  %v3500_v39 = vld.sshfl [vmem:[#allocation1 + $0x38] sm:$0xff pattern:$0x75316420]  ;;  %vm1259_vm13 = vcmask 56320  }
 0x1ad   : > { %1001 = vst.msk [vmem:[#allocation2 + $0x1b8] sm:$0xf] %vm209_vm1, %v985_v23 }
 0x1ae   : > { %1935 = vst [vmem:[#allocation1 + $0x30] ss:$2 sm:$0xff] %v3313_v26 }
 0x1b2   : > { %v3479_v28 = vld.sshfl [vmem:[#allocation1] sm:$0xff pattern:$0x75316420]  ;;  %v1043_v5 = vpop.permute.xlu1 %1042 }
 0x1b3   : > { %1743 = vrot.lane.b32.xlu1 %v3258_v13, %s2543_s9  ;;  %1527 = vrot.lane.b32.xlu2 %v3113_v32, %s2544_s10  ;;  %1929 = vst [vmem:[#allocation1] ss:$2 sm:$0xff] %v3087_v34  ;;  %v1035_v8 = vpop.permute.xlu0 %1034  ;;  %v1109_v13 = vpop.permute.xlu2 %1108  ;;  %v1055_v25 = vsel %vm1048_vm14, %v1043_v5, %v1045_v33 }
 0x1b4   : > { %v1050_v34 = vsel %vm1048_vm14, %v3444_v40, %v1035_v8  ;;  %v1051_v32 = vsel %vm1048_vm14, %v1035_v8, %v1037_v41  ;;  %1071 = vst [vmem:[#allocation2 + $0x1b0] sm:$0xf0] %v1055_v25 }
 0x1b5   : > { %1066 = vst [vmem:[#allocation2 + $0x188] sm:$0xf0] %v1050_v34 }
 0x1b6   : > { %1067 = vst [vmem:[#allocation2 + $0x190] sm:$0xf0] %v1051_v32 }
 0x1ba   : > { %v1937_v61 = vld.sshfl [vmem:[#allocation1 + $0x8] sm:$0xff pattern:$0x75316420]  ;;  %v1936_v16 = vld.sshfl [vmem:[#allocation1] sm:$0xff pattern:$0x75316420]  ;;  %v1101_v23 = vpop.permute.xlu1 %1100 }
 0x1bb   : > { %1948 = vrot.lane.b32.xlu1 %v1937_v61, %s2539_s5  ;;  %1946 = vrot.lane.b32.xlu0 %v1936_v16, %s2539_s5  ;;  %v1041_v24 = vpop.permute.xlu0 %1040  ;;  %v1119_v41 = vsel %vm1118_vm15, %v1101_v23, %v1103_v58  ;;  %v1923_v61 = vld [vmem:[%s2585_s17 + $0x24] sm:$0xf]  ;;  %s2549_s17 = smov 6  }
 0x1bc   : > { %1600 = vrot.lane.b32.xlu2 %v3145_v4, %s2545_s11  ;;  %v1053_v4 = vsel %vm1048_vm14, %v1039_v36, %v1041_v24  ;;  %v1054_v40 = vsel %vm1048_vm14, %v1041_v24, %v1043_v5  ;;  %1135 = vst [vmem:[#allocation2 + $0x1c0] sm:$0xf] %v1119_v41 }
 0x1bd   : > { %1069 = vst [vmem:[#allocation2 + $0x1a0] sm:$0xf0] %v1053_v4 }
 0x1be   : > { %1070 = vst [vmem:[#allocation2 + $0x1a8] sm:$0xf0] %v1054_v40 }
 0x1bf   : > { %1944 = vst [vmem:[#allocation1] ss:$2 sm:$0xff] %v1923_v61 }
 0x1c3   : > { %1598 = vrot.lane.b32.xlu1 %v3143_v14, %s2545_s11  ;;  %1529 = vrot.lane.b32.xlu0 %v3115_v60, %s2544_s10  ;;  %v3512_v14 = vpop.permute.xlu2 %1950  ;;  %v1047_v60 = vpop.permute.xlu0 %1046 }
 0x1c4   : > { %1735 = vrot.lane.b32.xlu2 %v3417_v52, %s2543_s9  ;;  %v1056_v26 = vsel %vm1048_vm14, %v1045_v33, %v1047_v60  ;;  %v1107_v52 = vpop.permute.xlu1 %1106  ;;  %vm1330_vm14 = vcmask 48128  }
 0x1c5   : > { %1072 = vst.msk [vmem:[#allocation2 + $0x1b8] sm:$0xf0] %vm274_vm2, %v1056_v26  ;;  %v1122_v36 = vsel %vm1118_vm15, %v1107_v52, %v1109_v13 }
 0x1c6   : > { %1138 = vst [vmem:[#allocation2 + $0x1d8] sm:$0xf] %v1122_v36  ;;  %v1945_v60 = vld.sshfl [vmem:[#allocation1] sm:$0xff pattern:$0x75316420] }
 0x1cb   : > { %1666 = vrot.lane.b32.xlu1 %v3378_v21, %s2542_s8  ;;  %1664 = vrot.lane.b32.xlu0 %v3376_v27, %s2542_s8  ;;  %v1105_v38 = vpop.permute.xlu0 %1104  ;;  %v3528_v27 = vpop.permute.xlu2 %1809 }
 0x1cc   : > { %1602 = vrot.lane.b32.xlu2 %v3197_v35, %s2545_s11  ;;  %v1120_v21 = vsel %vm1118_vm15, %v1103_v58, %v1105_v38  ;;  %v1121_v35 = vsel %vm1118_vm15, %v1105_v38, %v1107_v52  ;;  %v3534_v33 = vpop.permute.xlu1 %1112  ;;  %v1942_v58 = vld.sshfl [vmem:[#allocation1 + $0x30] sm:$0xff pattern:$0x75316420] }
 0x1cd   : > { %1136 = vst [vmem:[#allocation2 + $0x1c8] sm:$0xf] %v1120_v21  ;;  %v1941_v21 = vld.sshfl [vmem:[#allocation1 + $0x28] sm:$0xff pattern:$0x75316420] }
 0x1ce   : > { %1137 = vst [vmem:[#allocation2 + $0x1d0] sm:$0xf] %v1121_v35 }
 0x1d3   : > { %1531 = vrot.lane.b32.xlu1 %v3161_v51, %s2544_s10  ;;  %1737 = vrot.lane.b32.xlu0 %v3419_v0, %s2543_s9  ;;  %v1111_v16 = vpop.permute.xlu0 %1110 }
 0x1d4   : > { %1457 = vrot.lane.b32.xlu2 %v3089_v15, %s2546_s14  ;;  %v1123_v51 = vsel %vm1118_vm15, %v1109_v13, %v1111_v16  ;;  %v1124_v0 = vsel %vm1118_vm15, %v1111_v16, %v3534_v33  ;;  %v1883_v15 = vpop.permute.xlu2 %1882 }
 0x1d5   : > { %1139 = vst [vmem:[#allocation2 + $0x1e0] sm:$0xf] %v1123_v51 }
 0x1d6   : > { %1140 = vst [vmem:[#allocation2 + $0x1e8] sm:$0xf] %v1124_v0 }
 0x1db   : > { %1388 = vrot.lane.b32.xlu1 %v3060_v59, %s2547_s15  ;;  %1386 = vrot.lane.b32.xlu0 %v3058_v3, %s2547_s15  ;;  %v1953_v8 = vpop.permute.xlu0 %1952 }
 0x1dc   : > { %1525 = vrot.lane.b32.xlu2 %v3280_v46, %s2544_s10  ;;  %v1967_v3 = vsel %vm1964_vm0, %v3512_v14, %v1953_v8  ;;  %v3552_v59 = vpop.permute.xlu1 %1954  ;;  %v3556_v34 = vpop.permute.xlu2 %1813 }
 0x1dd   : > { %1983 = vst [vmem:[#allocation2 + $0x350] sm:$0xf] %v1967_v3  ;;  %v1968_v46 = vsel %vm1964_vm0, %v1953_v8, %v3552_v59 }
 0x1de   : > { %1984 = vst [vmem:[#allocation2 + $0x358] sm:$0xf] %v1968_v46 }
 0x1e3   : > { %1523 = vrot.lane.b32.xlu1 %v3274_v42, %s2544_s10  ;;  %1459 = vrot.lane.b32.xlu0 %v3091_v53, %s2546_s14  ;;  %v1812_v42 = vpop.permute.xlu0 %1811 }
 0x1e4   : > { %1958 = vrot.lane.b32.xlu2 %v1942_v58, %s2539_s5  ;;  %v1826_v53 = vsel %vm1823_vm3, %v3528_v27, %v1812_v42  ;;  %v1827_v32 = vsel %vm1823_vm3, %v1812_v42, %v3556_v34  ;;  %v2096_v13 = vld [vmem:[#allocation2 + $0x350] sm:$0xf]  ;;  %v1881_v5 = vpop.permute.xlu1 %1880  ;;  %v1671_v24 = vpop.permute.xlu2 %1670 }
 0x1e5   : > { %1842 = vst [vmem:[#allocation2 + $0x310] sm:$0xf] %v1826_v53  ;;  %2465 = vmatpush.msk.msra.mxu2 %vm2105_vm4, %v2096_v13  ;;  %v2097_v25 = vld [vmem:[#allocation2 + $0x358] sm:$0xf] }
 0x1e6   : > { %1843 = vst [vmem:[#allocation2 + $0x318] sm:$0xf] %v1827_v32  ;;  %2467 = vmatpush.msk.msra.mxu3 %vm2105_vm4, %v2097_v25 }
 0x1eb   : > { %1596 = vrot.lane.b32.xlu1 %v3336_v6, %s2545_s11  ;;  %1594 = vrot.lane.b32.xlu0 %v3331_v31, %s2545_s11  ;;  %v1897_v6 = vsel %vm1894_vm5, %v1881_v5, %v1883_v15  ;;  %v1943_v31 = vld.sshfl [vmem:[#allocation1 + $0x38] sm:$0xff pattern:$0x75316420]  ;;  %v3571_v4 = vpop.permute.xlu0 %1884 }
 0x1ec   : > { %1461 = vrot.lane.b32.xlu2 %v3133_v48, %s2546_s14  ;;  %1913 = vst [vmem:[#allocation2 + $0x310] sm:$0xf0] %v1897_v6  ;;  %v1898_v48 = vsel %vm1894_vm5, %v1883_v15, %v3571_v4  ;;  %v3580_v40 = vpop.permute.xlu1 %1668 }
 0x1ed   : > { %1914 = vst [vmem:[#allocation2 + $0x318] sm:$0xf0] %v1898_v48  ;;  %v1685_v23 = vsel %vm1682_vm6, %v3580_v40, %v1671_v24 }
 0x1ee   : > { %1701 = vst [vmem:[#allocation2 + $0x2d0] sm:$0xf] %v1685_v23 }
 0x1f3   : > { %1390 = vrot.lane.b32.xlu1 %v3101_v47, %s2547_s15  ;;  %1960 = vrot.lane.b32.xlu0 %v1943_v31, %s2539_s5  ;;  %v2088_v41 = vld [vmem:[#allocation2 + $0x310] sm:$0xff]  ;;  %v3584_v47 = vpop.permute.xlu0 %1739 }
 0x1f4   : > { %1247 = vrot.lane.b32.xlu2 %v3001_v44, %s2548_s16  ;;  %2173 = vmatpush.msra.mxu2 %v2088_v41  ;;  %v2089_v44 = vld [vmem:[#allocation2 + $0x318] sm:$0xff]  ;;  %v1742_v52 = vpop.permute.xlu1 %1741 }
 0x1f5   : > { %v1806_v26 = vpop.permute.xlu2 %1805  ;;  %2193 = vmatpush.msra.mxu3 %v2089_v44  ;;  %v1756_v36 = vsel %vm1753_vm8, %v3584_v47, %v1742_v52  ;;  %v4034_v44 = vld [vmem:[#allocation5_spill] sm:$0xff] }
 0x1f6   : > { %1772 = vst [vmem:[#allocation2 + $0x2d0] sm:$0xf0] %v1756_v36  ;;  %v4036_v36 = vld [vmem:[#allocation38_spill] sm:$0xff] }
 0x1fb   : > { %1245 = vrot.lane.b32.xlu1 %v2995_v17, %s2548_s16  ;;  %1962 = vrot.lane.b32.xlu0 %v1945_v60, %s2539_s5 }
 0x1fc   : > { %1382 = vrot.lane.b32.xlu2 %v3118_v12, %s2547_s15 }
 0x1fd   : > { %v2080_v38 = vld [vmem:[#allocation2 + $0x2d0] sm:$0xff] }
 0x1fe   : > { %2174 = vmatpush.msra.mxu2 %v2080_v38 }
 0x203   : > { %1318 = vrot.lane.b32.xlu1 %v3032_v19, %s2549_s17  ;;  %1316 = vrot.lane.b32.xlu0 %v3030_v55, %s2549_s17 }
 0x204   : > { %1455 = vrot.lane.b32.xlu2 %v3206_v43, %s2546_s14 }
 0x205   : > { %v1879_v17 = vpop.permute.xlu2 %1878 }
 0x206   : > { %v1896_v12 = vsel %vm1894_vm5, %v1879_v17, %v1881_v5 }
 0x207   : > { %1912 = vst [vmem:[#allocation2 + $0x308] sm:$0xf0] %v1896_v12 }
 0x20b   : > { %1453 = vrot.lane.b32.xlu1 %v3201_v63, %s2546_s14  ;;  %1384 = vrot.lane.b32.xlu0 %v3128_v37, %s2547_s15 }
 0x20c   : > { %1888 = vrot.lane.b32.xlu2 %v3498_v45, %s2541_s7 }
 0x20d   : > { %v1528_v19 = vpop.permute.xlu2 %1527  ;;  %v1808_v55 = vpop.permute.xlu0 %1807 }
 0x20e   : > { %v1824_v61 = vsel %vm1823_vm3, %v1806_v26, %v1808_v55  ;;  %v1825_v43 = vsel %vm1823_vm3, %v1808_v55, %v3528_v27 }
 0x20f   : > { %1840 = vst [vmem:[#allocation2 + $0x300] sm:$0xf] %v1824_v61 }
 0x210   : > { %1841 = vst [vmem:[#allocation2 + $0x308] sm:$0xf] %v1825_v43  ;;  %v4037_v43 = vld [vmem:[#allocation37_spill] sm:$0xff] }
 0x213   : > { %1819 = vrot.lane.b32.xlu1 %v3456_v57, %s2540_s6  ;;  %1817 = vrot.lane.b32.xlu0 %v3454_v56, %s2540_s6 }
 0x214   : > { %1249 = vrot.lane.b32.xlu2 %v3035_v49, %s2548_s16 }
 0x215   : > { %v3615_v37 = vpop.permute.xlu0 %1672 }
 0x216   : > { %v1601_v63 = vpop.permute.xlu2 %1600  ;;  %v1686_v45 = vsel %vm1682_vm6, %v1671_v24, %v3615_v37  ;;  %v4033_v24 = vld [vmem:[#allocation34_spill] sm:$0xff] }
 0x217   : > { %1702 = vst [vmem:[#allocation2 + $0x2d8] sm:$0xf] %v1686_v45  ;;  %v4039_v45 = vld [vmem:[#allocation26_spill] sm:$0xff] }
 0x21b   : > { %1956 = vrot.lane.b32.xlu1 %v1941_v21, %s2539_s5  ;;  %1890 = vrot.lane.b32.xlu0 %v3500_v39, %s2541_s7 }
 0x21c   : > { %1892 = vrot.lane.b32.xlu2 %v3479_v28, %s2541_s7 }
 0x21d   : > { %v1877_v56 = vpop.permute.xlu1 %1876 }
 0x21e   : > { %v1895_v57 = vsel %vm1894_vm5, %v1877_v56, %v1879_v17  ;;  %v3625_v49 = vpop.permute.xlu2 %1735 }
 0x21f   : > { %1911 = vst [vmem:[#allocation2 + $0x300] sm:$0xf0] %v1895_v57 }
 0x223   : > { %1821 = vrot.lane.b32.xlu1 %v3461_v30, %s2540_s6  ;;  %1320 = vrot.lane.b32.xlu0 %v3070_v10, %s2549_s17 }
 0x224   : > { %1241 = vrot.lane.b32.xlu2 %v2977_v29, %s2548_s16 }
 0x225   : > { %v3633_v27 = vpop.permute.xlu1 %1743 }
 0x226   : > { %v1757_v28 = vsel %vm1753_vm8, %v1742_v52, %v3633_v27  ;;  %v3637_v39 = vpop.permute.xlu2 %1602  ;;  %v4035_v52 = vld [vmem:[#allocation4_spill] sm:$0xff] }
 0x227   : > { %1773 = vst [vmem:[#allocation2 + $0x2d8] sm:$0xf0] %v1757_v28  ;;  %v1616_v35 = vsel %vm1612_vm9, %v1601_v63, %v3637_v39 }
 0x228   : > { %1632 = vst [vmem:[#allocation2 + $0x298] sm:$0xf0] %v1616_v35 }
 0x22b   : > { %1177 = vrot.lane.b32.xlu1 %v2966_v54, %s2550_s18  ;;  %1175 = vrot.lane.b32.xlu0 %v2964_v9, %s2550_s18 }
 0x22c   : > { %1314 = vrot.lane.b32.xlu2 %v3049_v18, %s2549_s17 }
 0x22d   : > { %v1949_v29 = vpop.permute.xlu1 %1948  ;;  %v1947_v10 = vpop.permute.xlu0 %1946 }
 0x22e   : > { %v1966_v30 = vsel %vm1964_vm0, %v1949_v29, %v3512_v14  ;;  %v1965_v16 = vsel %vm1964_vm0, %v1947_v10, %v1949_v29  ;;  %v2081_v51 = vld [vmem:[#allocation2 + $0x2d8] sm:$0xff]  ;;  %v3650_v0 = vpop.permute.xlu2 %1457 }
 0x22f   : > { %1982 = vst [vmem:[#allocation2 + $0x348] sm:$0xf] %v1966_v30  ;;  %2194 = vmatpush.msra.mxu3 %v2081_v51  ;;  %v4040_v10 = vld [vmem:[#allocation22_spill] sm:$0xff]  ;;  %v4041_v30 = vld [vmem:[#allocation19_spill] sm:$0xff] }
 0x230   : > { %1981 = vst [vmem:[#allocation2 + $0x340] sm:$0xf] %v1965_v16  ;;  %v4042_v16 = vld [vmem:[#allocation30_spill] sm:$0xff] }
 0x233   : > { %1312 = vrot.lane.b32.xlu1 %v3044_v20, %s2549_s17  ;;  %1243 = vrot.lane.b32.xlu0 %v2979_v50, %s2548_s16  ;;  %v2087_v20 = vld [vmem:[#allocation2 + $0x308] sm:$0xff] }
 0x234   : > { %1747 = vrot.lane.b32.xlu2 %v3439_v22, %s2543_s9  ;;  %v2086_v22 = vld [vmem:[#allocation2 + $0x300] sm:$0xff] }
 0x235   : > { %v3658_v9 = vpop.permute.xlu1 %1598  ;;  %v1530_v54 = vpop.permute.xlu0 %1529 }
 0x236   : > { %v1615_v18 = vsel %vm1612_vm9, %v3658_v9, %v1601_v63  ;;  %v1544_v14 = vsel %vm1541_vm10, %v1528_v19, %v1530_v54  ;;  %v2095_v15 = vld [vmem:[#allocation2 + $0x348] sm:$0xf]  ;;  %v1526_v58 = vpop.permute.xlu2 %1525  ;;  %v4038_v63 = vld [vmem:[#allocation35_spill] sm:$0xff] }
 0x237   : > { %1631 = vst [vmem:[#allocation2 + $0x290] sm:$0xf0] %v1615_v18  ;;  %v2094_v8 = vld [vmem:[#allocation2 + $0x340] sm:$0xf]  ;;  %2463 = vmatpush.msk.msra.mxu1 %vm2105_vm4, %v2095_v15  ;;  %v1543_v50 = vsel %vm1541_vm10, %v1526_v58, %v1528_v19 }
 0x238   : > { %1560 = vst [vmem:[#allocation2 + $0x290] sm:$0xf] %v1544_v14  ;;  %2461 = vmatpush.msk.msra.mxu0 %vm2105_vm4, %v2094_v8  ;;  %v4044_v8 = vld [vmem:[#allocation31_spill] sm:$0xff] }
 0x239   : > { %2153 = vmatpush.msra.mxu1 %v2087_v20  ;;  %1559 = vst [vmem:[#allocation2 + $0x288] sm:$0xf] %v1543_v50  ;;  %v4045_v50 = vld [vmem:[#allocation15_spill] sm:$0xff] }
 0x23a   : > { %2133 = vmatpush.msra.mxu0 %v2086_v22 }
 0x23b   : > { %1678 = vrot.lane.b32.xlu1 %v3428_v62, %s2542_s8  ;;  %1676 = vrot.lane.b32.xlu0 %v3426_v7, %s2542_s8  ;;  %v4030_v7 = vld [vmem:[#allocation39_spill] sm:$0xff] }
 0x23c   : > { %1886 = vrot.lane.b32.xlu2 %v3328_v11, %s2541_s7 }
 0x23d   : > { %v1667_v3 = vpop.permute.xlu1 %1666  ;;  %v1665_v46 = vpop.permute.xlu0 %1664 }
 0x23e   : > { %v1684_v42 = vsel %vm1682_vm6, %v1667_v3, %v3580_v40  ;;  %v1683_v53 = vsel %vm1682_vm6, %v1665_v46, %v1667_v3  ;;  %v3675_v32 = vpop.permute.xlu2 %1958 }
 0x23f   : > { %1700 = vst [vmem:[#allocation2 + $0x2c8] sm:$0xf] %v1684_v42  ;;  %v2072_v13 = vld [vmem:[#allocation2 + $0x290] sm:$0xff] }
 0x240   : > { %1699 = vst [vmem:[#allocation2 + $0x2c0] sm:$0xf] %v1683_v53  ;;  %2175 = vmatpush.msra.mxu2 %v2072_v13 }
 0x243   : > { %1815 = vrot.lane.b32.xlu1 %v3293_v1, %s2540_s6  ;;  %1749 = vrot.lane.b32.xlu0 %v3441_v2, %s2543_s9  ;;  %v4031_v1 = vld [vmem:[#allocation36_spill] sm:$0xff]  ;;  %v4032_v2 = vld [vmem:[#allocation7_spill] sm:$0xff] }
 0x244   : > { %1751 = vrot.lane.b32.xlu2 %v4030_v7, %s2543_s9  ;;  %v4046_v7 = vld [vmem:[#allocation33_spill] sm:$0xff] }
 0x245   : > { %v3683_v11 = vpop.permute.xlu1 %1531  ;;  %v1738_v62 = vpop.permute.xlu0 %1737 }
 0x246   : > { %v1545_v5 = vsel %vm1541_vm10, %v1530_v54, %v3683_v11  ;;  %v1754_v6 = vsel %vm1753_vm8, %v3625_v49, %v1738_v62  ;;  %v1755_v25 = vsel %vm1753_vm8, %v1738_v62, %v3584_v47  ;;  %v3691_v31 = vpop.permute.xlu2 %1461  ;;  %v4047_v62 = vld [vmem:[#allocation32_spill] sm:$0xff] }
 0x247   : > { %1561 = vst [vmem:[#allocation2 + $0x298] sm:$0xf] %v1545_v5  ;;  %v4048_v5 = vld [vmem:[#allocation20_spill] sm:$0xff] }
 0x248   : > { %1770 = vst [vmem:[#allocation2 + $0x2c0] sm:$0xf0] %v1754_v6 }
 0x249   : > { %1771 = vst [vmem:[#allocation2 + $0x2c8] sm:$0xf0] %v1755_v25 }
 0x24b   : > { %1680 = vrot.lane.b32.xlu1 %v4031_v1, %s2542_s8  ;;  %1179 = vrot.lane.b32.xlu0 %v4032_v2, %s2550_s18 }
 0x24c   : > { %1535 = vrot.lane.b32.xlu2 %v4033_v24, %s2544_s10  ;;  %v4049_v24 = vld [vmem:[#allocation16_spill] sm:$0xff] }
 0x24d   : > { %v1389_v48 = vpop.permute.xlu1 %1388  ;;  %v3699_v40 = vpop.permute.xlu0 %1386 }
 0x24e   : > { %v1403_v23 = vsel %vm1400_vm11, %v3699_v40, %v1389_v48  ;;  %v2073_v41 = vld [vmem:[#allocation2 + $0x298] sm:$0xff]  ;;  %v1248_v60 = vpop.permute.xlu2 %1247 }
 0x24f   : > { %1419 = vst [vmem:[#allocation2 + $0x250] sm:$0xf] %v1403_v23  ;;  %v2078_v47 = vld [vmem:[#allocation2 + $0x2c0] sm:$0xff]  ;;  %2195 = vmatpush.msra.mxu3 %v2073_v41 }
 0x250   : > { %2134 = vmatpush.msra.mxu0 %v2078_v47  ;;  %v2079_v26 = vld [vmem:[#allocation2 + $0x2c8] sm:$0xff]  ;;  %v4051_v23 = vld [vmem:[#allocation27_spill] sm:$0xff] }
 0x251   : > { %2154 = vmatpush.msra.mxu1 %v2079_v26 }
 0x253   : > { %1173 = vrot.lane.b32.xlu1 %v4034_v44, %s2550_s18  ;;  %1171 = vrot.lane.b32.xlu0 %v4035_v52, %s2550_s18 }
 0x254   : > { %1608 = vrot.lane.b32.xlu2 %v4036_v36, %s2545_s11 }
 0x255   : > { %v1524_v17 = vpop.permute.xlu1 %1523  ;;  %v1460_v38 = vpop.permute.xlu0 %1459 }
 0x256   : > { %v1542_v12 = vsel %vm1541_vm10, %v1524_v17, %v1526_v58  ;;  %v1474_v19 = vsel %vm1471_vm12, %v3650_v0, %v1460_v38  ;;  %v1475_v55 = vsel %vm1471_vm12, %v1460_v38, %v3691_v31  ;;  %v3714_v61 = vpop.permute.xlu2 %1382  ;;  %v4043_v58 = vld [vmem:[#allocation29_spill] sm:$0xff]  ;;  %v4053_v38 = vld [vmem:[#allocation24_spill] sm:$0xff] }
 0x257   : > { %1558 = vst [vmem:[#allocation2 + $0x280] sm:$0xf] %v1542_v12  ;;  %v4052_v17 = vld [vmem:[#allocation25_spill] sm:$0xff]  ;;  %v4054_v12 = vld [vmem:[#allocation14_spill] sm:$0xff] }
 0x258   : > { %1490 = vst [vmem:[#allocation2 + $0x250] sm:$0xf0] %v1474_v19 }
 0x259   : > { %1491 = vst [vmem:[#allocation2 + $0x258] sm:$0xf0] %v1475_v55 }
 0x25b   : > { %1606 = vrot.lane.b32.xlu1 %v4037_v43, %s2545_s11  ;;  %1537 = vrot.lane.b32.xlu0 %v4038_v63, %s2544_s10 }
 0x25c   : > { %1539 = vrot.lane.b32.xlu2 %v4039_v45, %s2544_s10 }
 0x25d   : > { %v1597_v21 = vpop.permute.xlu1 %1596  ;;  %v1595_v56 = vpop.permute.xlu0 %1594 }
 0x25e   : > { %v1614_v57 = vsel %vm1612_vm9, %v1597_v21, %v3658_v9  ;;  %v1613_v49 = vsel %vm1612_vm9, %v1595_v56, %v1597_v21  ;;  %v1456_v28 = vpop.permute.xlu2 %1455  ;;  %v4055_v21 = vld [vmem:[#allocation13_spill] sm:$0xff]  ;;  %v4056_v56 = vld [vmem:[#allocation28_spill] sm:$0xff] }
 0x25f   : > { %1630 = vst [vmem:[#allocation2 + $0x288] sm:$0xf0] %v1614_v57  ;;  %v2064_v35 = vld [vmem:[#allocation2 + $0x250] sm:$0xff]  ;;  %v1473_v29 = vsel %vm1471_vm12, %v1456_v28, %v3650_v0  ;;  %v4057_v57 = vld [vmem:[#allocation18_spill] sm:$0xff] }
 0x260   : > { %1629 = vst [vmem:[#allocation2 + $0x280] sm:$0xf0] %v1613_v49  ;;  %2176 = vmatpush.msra.mxu2 %v2064_v35 }
 0x261   : > { %1489 = vst [vmem:[#allocation2 + $0x248] sm:$0xf0] %v1473_v29 }
 0x263   : > { %1745 = vrot.lane.b32.xlu1 %v4040_v10, %s2543_s9  ;;  %1674 = vrot.lane.b32.xlu0 %v4041_v30, %s2542_s8 }
 0x264   : > { %1396 = vrot.lane.b32.xlu2 %v4042_v16, %s2547_s15 }
 0x265   : > { %v3733_v51 = vpop.permute.xlu1 %1390  ;;  %v1961_v9 = vpop.permute.xlu0 %1960 }
 0x266   : > { %v1404_v54 = vsel %vm1400_vm11, %v1389_v48, %v3733_v51  ;;  %v1971_v0 = vsel %vm1964_vm0, %v3675_v32, %v1961_v9  ;;  %v2071_v18 = vld [vmem:[#allocation2 + $0x288] sm:$0xff]  ;;  %v3739_v14 = vpop.permute.xlu2 %1888  ;;  %v4050_v48 = vld [vmem:[#allocation17_spill] sm:$0xff] }
 0x267   : > { %1420 = vst [vmem:[#allocation2 + $0x258] sm:$0xf] %v1404_v54  ;;  %v2070_v15 = vld [vmem:[#allocation2 + $0x280] sm:$0xff]  ;;  %2155 = vmatpush.msra.mxu1 %v2071_v18 }
 0x268   : > { %1987 = vst [vmem:[#allocation2 + $0x370] sm:$0xf] %v1971_v0  ;;  %2135 = vmatpush.msra.mxu0 %v2070_v15 }
 0x26b   : > { %1394 = vrot.lane.b32.xlu1 %v4043_v58, %s2547_s15  ;;  %1610 = vrot.lane.b32.xlu0 %v4044_v8, %s2545_s11 }
 0x26c   : > { %1533 = vrot.lane.b32.xlu2 %v4045_v50, %s2544_s10 }
 0x26d   : > { %v3747_v20 = vpop.permute.xlu1 %1245  ;;  %v1963_v22 = vpop.permute.xlu0 %1962 }
 0x26e   : > { %v1262_v3 = vsel %vm1259_vm13, %v3747_v20, %v1248_v60  ;;  %v1972_v46 = vsel %vm1964_vm0, %v1961_v9, %v1963_v22  ;;  %v2065_v42 = vld [vmem:[#allocation2 + $0x258] sm:$0xff]  ;;  %v3752_v53 = vpop.permute.xlu2 %1249  ;;  %v4058_v9 = vld [vmem:[#allocation12_spill] sm:$0xff]  ;;  %v4061_v22 = vld [vmem:[#allocation23_spill] sm:$0xff] }
 0x26f   : > { %1278 = vst [vmem:[#allocation2 + $0x210] sm:$0xf] %v1262_v3  ;;  %2196 = vmatpush.msra.mxu3 %v2065_v42  ;;  %v1263_v13 = vsel %vm1259_vm13, %v1248_v60, %v3752_v53  ;;  %v4062_v3 = vld [vmem:[#allocation21_spill] sm:$0xff] }
 0x270   : > { %1988 = vst.msk [vmem:[#allocation2 + $0x378] sm:$0xf] %vm209_vm1, %v1972_v46  ;;  %v4063_v46 = vld [vmem:[#allocation6_spill] sm:$0xff] }
 0x271   : > { %1279 = vst [vmem:[#allocation2 + $0x218] sm:$0xf] %v1263_v13 }
 0x273   : > { %1467 = vrot.lane.b32.xlu1 %v4046_v7, %s2546_s14  ;;  %1465 = vrot.lane.b32.xlu0 %v4047_v62, %s2546_s14  ;;  %v4064_v62 = vld [vmem:[#allocation3_spill] sm:$0xff] }
 0x274   : > { %1469 = vrot.lane.b32.xlu2 %v4048_v5, %s2546_s14  ;;  %v4065_v5 = vld [vmem:[#allocation11_spill] sm:$0xff] }
 0x275   : > { %v1319_v6 = vpop.permute.xlu1 %1318  ;;  %v1317_v25 = vpop.permute.xlu0 %1316 }
 0x276   : > { %v1333_v1 = vsel %vm1330_vm14, %v1317_v25, %v1319_v6  ;;  %v1893_v2 = vpop.permute.xlu2 %1892 }
 0x277   : > { %1349 = vst [vmem:[#allocation2 + $0x210] sm:$0xf0] %v1333_v1 }
 0x27b   : > { %1398 = vrot.lane.b32.xlu1 %v4049_v24, %s2547_s15  ;;  %1604 = vrot.lane.b32.xlu0 %v4050_v48, %s2545_s11 }
 0x27c   : > { %1324 = vrot.lane.b32.xlu2 %v4051_v23, %s2549_s17 }
 0x27d   : > { %v1454_v41 = vpop.permute.xlu1 %1453  ;;  %v1385_v60 = vpop.permute.xlu0 %1384 }
 0x27e   : > { %v1472_v47 = vsel %vm1471_vm12, %v1454_v41, %v1456_v28  ;;  %v1401_v26 = vsel %vm1400_vm11, %v3714_v61, %v1385_v60  ;;  %v1402_v44 = vsel %vm1400_vm11, %v1385_v60, %v3699_v40  ;;  %v2056_v52 = vld [vmem:[#allocation2 + $0x210] sm:$0xff]  ;;  %v3775_v36 = vpop.permute.xlu2 %1241 }
 0x27f   : > { %1488 = vst [vmem:[#allocation2 + $0x240] sm:$0xf0] %v1472_v47  ;;  %2177 = vmatpush.msra.mxu2 %v2056_v52  ;;  %v2040_v41 = vld [vmem:[#allocation2 + $0x190] sm:$0xff]  ;;  %v4066_v47 = vld [vmem:[#allocation8_spill] sm:$0xff] }
 0x280   : > { %1417 = vst [vmem:[#allocation2 + $0x240] sm:$0xf] %v1401_v26  ;;  %v2032_v60 = vld [vmem:[#allocation2 + $0x150] sm:$0xff] }
 0x281   : > { %1418 = vst [vmem:[#allocation2 + $0x248] sm:$0xf] %v1402_v44  ;;  %v2024_v26 = vld [vmem:[#allocation2 + $0x110] sm:$0xff] }
 0x283   : > { %1255 = vrot.lane.b32.xlu1 %v4052_v17, %s2548_s16  ;;  %1253 = vrot.lane.b32.xlu0 %v4053_v38, %s2548_s16 }
 0x284   : > { %1463 = vrot.lane.b32.xlu2 %v4054_v12, %s2546_s14 }
 0x285   : > { %v1820_v19 = vpop.permute.xlu1 %1819  ;;  %v3783_v55 = vpop.permute.xlu0 %1817 }
 0x286   : > { %v1830_v40 = vsel %vm1823_vm3, %v3783_v55, %v1820_v19  ;;  %v1315_v61 = vpop.permute.xlu2 %1314 }
 0x287   : > { %1846 = vst [vmem:[#allocation2 + $0x330] sm:$0xf] %v1830_v40  ;;  %v2062_v43 = vld [vmem:[#allocation2 + $0x240] sm:$0xff]  ;;  %v1332_v63 = vsel %vm1330_vm14, %v1315_v61, %v1317_v25  ;;  %v2000_v40 = vld [vmem:[#allocation2 + $0x50] sm:$0xff] }
 0x288   : > { %2136 = vmatpush.msra.mxu0 %v2062_v43  ;;  %v2063_v45 = vld [vmem:[#allocation2 + $0x248] sm:$0xff]  ;;  %1348 = vst [vmem:[#allocation2 + $0x208] sm:$0xf0] %v1332_v63 }
 0x289   : > { %2156 = vmatpush.msra.mxu1 %v2063_v45  ;;  %v2100_v45 = vld [vmem:[#allocation2 + $0x370] sm:$0xf] }
 0x28b   : > { %1392 = vrot.lane.b32.xlu1 %v4055_v21, %s2547_s15  ;;  %1326 = vrot.lane.b32.xlu0 %v4056_v56, %s2549_s17 }
 0x28c   : > { %1114 = vrot.lane.b32.xlu2 %v4057_v57, %s2538_s4 }
 0x28d   : > { %v1957_v49 = vpop.permute.xlu1 %1956  ;;  %v1891_v28 = vpop.permute.xlu0 %1890 }
 0x28e   : > { %v1969_v35 = vsel %vm1964_vm0, %v3552_v59, %v1957_v49  ;;  %v1970_v29 = vsel %vm1964_vm0, %v1957_v49, %v3675_v32  ;;  %v1901_v10 = vsel %vm1894_vm5, %v3739_v14, %v1891_v28  ;;  %v3800_v30 = vpop.permute.xlu2 %1747  ;;  %v1902_v16 = vsel %vm1894_vm5, %v1891_v28, %v1893_v2  ;;  %v4059_v59 = vld [vmem:[#allocation9_spill] sm:$0xff]  ;;  %v4060_v32 = vld [vmem:[#allocation10_spill] sm:$0xff] }
 0x28f   : > { %1985 = vst [vmem:[#allocation2 + $0x360] sm:$0xf] %v1969_v35  ;;  %vm1189_vm0 = vcmask 64512  }
 0x290   : > { %1986 = vst [vmem:[#allocation2 + $0x368] sm:$0xf] %v1970_v29 }
 0x291   : > { %1917 = vst [vmem:[#allocation2 + $0x330] sm:$0xf0] %v1901_v10 }
 0x292   : > { %1918 = vst.msk [vmem:[#allocation2 + $0x338] sm:$0xf0] %vm274_vm2, %v1902_v16 }
 0x293   : > { %1328 = vrot.lane.b32.xlu1 %v4058_v9, %s2549_s17  ;;  %1257 = vrot.lane.b32.xlu0 %v4059_v59, %s2548_s16 }
 0x294   : > { %1251 = vrot.lane.b32.xlu2 %v4060_v32, %s2548_s16 }
 0x295   : > { %v1822_v54 = vpop.permute.xlu1 %1821  ;;  %v3810_v0 = vpop.permute.xlu0 %1320 }
 0x296   : > { %v1831_v18 = vsel %vm1823_vm3, %v1820_v19, %v1822_v54  ;;  %v1334_v15 = vsel %vm1330_vm14, %v1319_v6, %v3810_v0  ;;  %v1887_v58 = vpop.permute.xlu2 %1886  ;;  %v2008_v19 = vld [vmem:[#allocation2 + $0x90] sm:$0xff] }
 0x297   : > { %1847 = vst.msk [vmem:[#allocation2 + $0x338] sm:$0xf] %vm209_vm1, %v1831_v18  ;;  %v1899_v8 = vsel %vm1894_vm5, %v3571_v4, %v1887_v58  ;;  %v1900_v50 = vsel %vm1894_vm5, %v1887_v58, %v3739_v14 }
 0x298   : > { %1350 = vst [vmem:[#allocation2 + $0x218] sm:$0xf0] %v1334_v15  ;;  %v2092_v35 = vld [vmem:[#allocation2 + $0x330] sm:$0xff] }
 0x299   : > { %1915 = vst [vmem:[#allocation2 + $0x320] sm:$0xf0] %v1899_v8 }
 0x29a   : > { %1916 = vst [vmem:[#allocation2 + $0x328] sm:$0xf0] %v1900_v50 }
 0x29b   : > { %1185 = vrot.lane.b32.xlu1 %v4061_v22, %s2550_s18  ;;  %1183 = vrot.lane.b32.xlu0 %v4062_v3, %s2550_s18  ;;  %v2041_v22 = vld [vmem:[#allocation2 + $0x198] sm:$0xff] }
 0x29c   : > { %1187 = vrot.lane.b32.xlu2 %v4063_v46, %s2550_s18  ;;  %v2033_v3 = vld [vmem:[#allocation2 + $0x158] sm:$0xff] }
 0x29d   : > { %v3826_v42 = vpop.permute.xlu1 %1177  ;;  %v3828_v13 = vpop.permute.xlu0 %1175 }
 0x29e   : > { %v1192_v4 = vsel %vm1189_vm0, %v3828_v13, %v3826_v42  ;;  %v1752_v14 = vpop.permute.xlu2 %1751 }
 0x29f   : > { %1208 = vst [vmem:[#allocation2 + $0x1d0] sm:$0xf0] %v1192_v4  ;;  %v2057_v7 = vld [vmem:[#allocation2 + $0x218] sm:$0xff] }
 0x2a0   : > { %2197 = vmatpush.msra.mxu3 %v2057_v7 }
 0x2a3   : > { %1116 = vrot.lane.b32.xlu1 %v4064_v62, %s2538_s4  ;;  %1322 = vrot.lane.b32.xlu0 %v4065_v5, %s2549_s17 }
 0x2a5   : > { %v1313_v6 = vpop.permute.xlu1 %1312  ;;  %v1244_v25 = vpop.permute.xlu0 %1243 }
 0x2a6   : > { %v1331_v1 = vsel %vm1330_vm14, %v1313_v6, %v1315_v61  ;;  %v1260_v2 = vsel %vm1259_vm13, %v3775_v36, %v1244_v25  ;;  %v1261_v24 = vsel %vm1259_vm13, %v1244_v25, %v3747_v20  ;;  %v2048_v48 = vld [vmem:[#allocation2 + $0x1d0] sm:$0xff]  ;;  %v3842_v23 = vpop.permute.xlu2 %1535  ;;  %v2017_v6 = vld [vmem:[#allocation2 + $0xd8] sm:$0xff]  ;;  %v2039_v25 = vld [vmem:[#allocation2 + $0x188] sm:$0xff] }
 0x2a7   : > { %1347 = vst [vmem:[#allocation2 + $0x200] sm:$0xf0] %v1331_v1  ;;  %2178 = vmatpush.msra.mxu2 %v2048_v48  ;;  %v2016_v36 = vld [vmem:[#allocation2 + $0xd0] sm:$0xff]  ;;  %v2038_v1 = vld [vmem:[#allocation2 + $0x180] sm:$0xff] }
 0x2a8   : > { %1276 = vst [vmem:[#allocation2 + $0x200] sm:$0xf] %v1260_v2  ;;  %v1992_v61 = vld [vmem:[#allocation2 + $0x10] sm:$0xff]  ;;  %v2009_v2 = vld [vmem:[#allocation2 + $0x98] sm:$0xff]  ;;  %v2030_v48 = vld [vmem:[#allocation2 + $0x140] sm:$0xff] }
 0x2a9   : > { %1277 = vst [vmem:[#allocation2 + $0x208] sm:$0xf] %v1261_v24  ;;  %2179 = vmatpush.msra.mxu2 %v2040_v41  ;;  %v2031_v24 = vld [vmem:[#allocation2 + $0x148] sm:$0xff] }
 0x2aa   : > { %v2023_v41 = vld [vmem:[#allocation2 + $0x108] sm:$0xff] }
 0x2ab   : > { %1181 = vrot.lane.b32.xlu0 %v4066_v47, %s2550_s18  ;;  %2180 = vmatpush.msra.mxu2 %v2032_v60  ;;  %v2022_v47 = vld [vmem:[#allocation2 + $0x100] sm:$0xff] }
 0x2ad   : > { %v1679_v44 = vpop.permute.xlu1 %1678  ;;  %2181 = vmatpush.msra.mxu2 %v2024_v26  ;;  %v3846_v52 = vpop.permute.xlu0 %1676  ;;  %v1993_v26 = vld [vmem:[#allocation2 + $0x18] sm:$0xff] }
 0x2ae   : > { %v1689_v20 = vsel %vm1682_vm6, %v3846_v52, %v1679_v44  ;;  %v3850_v17 = vpop.permute.xlu2 %1608 }
 0x2af   : > { %1705 = vst [vmem:[#allocation2 + $0x2f0] sm:$0xf] %v1689_v20  ;;  %v2054_v38 = vld [vmem:[#allocation2 + $0x200] sm:$0xff]  ;;  %2182 = vmatpush.msra.mxu2 %v2016_v36 }
 0x2b0   : > { %2137 = vmatpush.msra.mxu0 %v2054_v38  ;;  %v2055_v12 = vld [vmem:[#allocation2 + $0x208] sm:$0xff] }
 0x2b1   : > { %2157 = vmatpush.msra.mxu1 %v2055_v12  ;;  %2183 = vmatpush.msra.mxu2 %v2008_v19  ;;  %v2101_v12 = vld [vmem:[#allocation2 + $0x378] sm:$0xf]  ;;  %v2015_v19 = vld [vmem:[#allocation2 + $0xc8] sm:$0xff] }
 0x2b3   : > { %2184 = vmatpush.msra.mxu2 %v2000_v40 }
 0x2b5   : > { %v1816_v43 = vpop.permute.xlu1 %1815  ;;  %2185 = vmatpush.msra.mxu2 %v1992_v61  ;;  %v1750_v63 = vpop.permute.xlu0 %1749 }
 0x2b6   : > { %v1828_v21 = vsel %vm1823_vm3, %v3556_v34, %v1816_v43  ;;  %v1829_v56 = vsel %vm1823_vm3, %v1816_v43, %v3783_v55  ;;  %v1760_v57 = vsel %vm1753_vm8, %v3800_v30, %v1750_v63  ;;  %v1540_v49 = vpop.permute.xlu2 %1539  ;;  %v1761_v28 = vsel %vm1753_vm8, %v1750_v63, %v1752_v14  ;;  %v2014_v43 = vld [vmem:[#allocation2 + $0xc0] sm:$0xff]  ;;  %v2007_v63 = vld [vmem:[#allocation2 + $0x88] sm:$0xff] }
 0x2b7   : > { %2473 = vmatpush.msk.msrb.mxu2 %vm2105_vm4, %v2100_v45  ;;  %1844 = vst [vmem:[#allocation2 + $0x320] sm:$0xf] %v1828_v21  ;;  %v1999_v21 = vld [vmem:[#allocation2 + $0x48] sm:$0xff] }
 0x2b8   : > { %1845 = vst [vmem:[#allocation2 + $0x328] sm:$0xf] %v1829_v56  ;;  %v1991_v56 = vld [vmem:[#allocation2 + $0x8] sm:$0xff] }
 0x2b9   : > { %2253 = vmatpush.msrb.mxu2 %v2092_v35  ;;  %1776 = vst [vmem:[#allocation2 + $0x2f0] sm:$0xf0] %v1760_v57  ;;  %v2099_v35 = vld [vmem:[#allocation2 + $0x368] sm:$0xf] }
 0x2ba   : > { %1777 = vst.msk [vmem:[#allocation2 + $0x2f8] sm:$0xf0] %vm274_vm2, %v1761_v28  ;;  %v1990_v28 = vld [vmem:[#allocation2] sm:$0xff] }
 0x2bd   : > { %v1681_v29 = vpop.permute.xlu1 %1680  ;;  %v3861_v34 = vpop.permute.xlu0 %1179 }
 0x2be   : > { %v1690_v55 = vsel %vm1682_vm6, %v1679_v44, %v1681_v29  ;;  %v1193_v10 = vsel %vm1189_vm0, %v3826_v42, %v3861_v34  ;;  %v3867_v16 = vpop.permute.xlu2 %1396  ;;  %v2025_v42 = vld [vmem:[#allocation2 + $0x118] sm:$0xff] }
 0x2bf   : > { %1706 = vst.msk [vmem:[#allocation2 + $0x2f8] sm:$0xf] %vm209_vm1, %v1690_v55 }
 0x2c0   : > { %1209 = vst [vmem:[#allocation2 + $0x1d8] sm:$0xf0] %v1193_v10  ;;  %v2084_v9 = vld [vmem:[#allocation2 + $0x2f0] sm:$0xff]  ;;  %v2098_v10 = vld [vmem:[#allocation2 + $0x360] sm:$0xf] }
 0x2c1   : > { %2254 = vmatpush.msrb.mxu2 %v2084_v9 }
 0x2c5   : > { %v1174_v59 = vpop.permute.xlu1 %1173  ;;  %v1172_v32 = vpop.permute.xlu0 %1171 }
 0x2c6   : > { %v1191_v54 = vsel %vm1189_vm0, %v1174_v59, %v3828_v13  ;;  %v1190_v18 = vsel %vm1189_vm0, %v1172_v32, %v1174_v59  ;;  %v1534_v15 = vpop.permute.xlu2 %1533  ;;  %v2085_v45 = vld [vmem:[#allocation2 + $0x2f8] sm:$0xff]  ;;  %v2091_v59 = vld [vmem:[#allocation2 + $0x328] sm:$0xff] }
 0x2c7   : > { %1207 = vst [vmem:[#allocation2 + $0x1c8] sm:$0xf0] %v1191_v54  ;;  %v2049_v58 = vld [vmem:[#allocation2 + $0x1d8] sm:$0xff]  ;;  %v1546_v8 = vsel %vm1541_vm10, %v3683_v11, %v1534_v15  ;;  %v1547_v50 = vsel %vm1541_vm10, %v1534_v15, %v3842_v23  ;;  %v2090_v54 = vld [vmem:[#allocation2 + $0x320] sm:$0xff] }
 0x2c8   : > { %1206 = vst [vmem:[#allocation2 + $0x1c0] sm:$0xf0] %v1190_v18  ;;  %2198 = vmatpush.msra.mxu3 %v2049_v58 }
 0x2c9   : > { %1562 = vst [vmem:[#allocation2 + $0x2a0] sm:$0xf] %v1546_v8 }
 0x2ca   : > { %2199 = vmatpush.msra.mxu3 %v2041_v22  ;;  %1563 = vst [vmem:[#allocation2 + $0x2a8] sm:$0xf] %v1547_v50 }
 0x2cc   : > { %2200 = vmatpush.msra.mxu3 %v2033_v3 }
 0x2cd   : > { %v3877_v46 = vpop.permute.xlu1 %1606  ;;  %v1538_v13 = vpop.permute.xlu0 %1537 }
 0x2ce   : > { %v1619_v4 = vsel %vm1612_vm9, %v3877_v46, %v3850_v17  ;;  %2201 = vmatpush.msra.mxu3 %v2025_v42  ;;  %v1548_v11 = vsel %vm1541_vm10, %v3842_v23, %v1538_v13  ;;  %v1549_v14 = vsel %vm1541_vm10, %v1538_v13, %v1540_v49  ;;  %v2047_v7 = vld [vmem:[#allocation2 + $0x1c8] sm:$0xff]  ;;  %v3885_v62 = vpop.permute.xlu2 %1469  ;;  %v2001_v23 = vld [vmem:[#allocation2 + $0x58] sm:$0xff] }
 0x2cf   : > { %1635 = vst [vmem:[#allocation2 + $0x2b0] sm:$0xf0] %v1619_v4  ;;  %v2046_v5 = vld [vmem:[#allocation2 + $0x1c0] sm:$0xff]  ;;  %2158 = vmatpush.msra.mxu1 %v2047_v7 }
 0x2d0   : > { %1564 = vst [vmem:[#allocation2 + $0x2b0] sm:$0xf] %v1548_v11  ;;  %2138 = vmatpush.msra.mxu0 %v2046_v5  ;;  %2202 = vmatpush.msra.mxu3 %v2017_v6 }
 0x2d1   : > { %1565 = vst.msk [vmem:[#allocation2 + $0x2b8] sm:$0xf] %vm209_vm1, %v1549_v14  ;;  %2159 = vmatpush.msra.mxu1 %v2039_v25 }
 0x2d2   : > { %2139 = vmatpush.msra.mxu0 %v2038_v1  ;;  %2203 = vmatpush.msra.mxu3 %v2009_v2 }
 0x2d3   : > { %2160 = vmatpush.msra.mxu1 %v2031_v24 }
 0x2d4   : > { %2140 = vmatpush.msra.mxu0 %v2030_v48  ;;  %2204 = vmatpush.msra.mxu3 %v2001_v23 }
 0x2d5   : > { %v1746_v60 = vpop.permute.xlu1 %1745  ;;  %2161 = vmatpush.msra.mxu1 %v2023_v41  ;;  %v1675_v44 = vpop.permute.xlu0 %1674 }
 0x2d6   : > { %v1758_v20 = vsel %vm1753_vm8, %v3633_v27, %v1746_v60  ;;  %v1759_v36 = vsel %vm1753_vm8, %v1746_v60, %v3800_v30  ;;  %2141 = vmatpush.msra.mxu0 %v2022_v47  ;;  %2205 = vmatpush.msra.mxu3 %v1993_v26  ;;  %v1687_v38 = vsel %vm1682_vm6, %v3615_v37, %v1675_v44  ;;  %v3894_v40 = vpop.permute.xlu2 %1324  ;;  %v2093_v30 = vld [vmem:[#allocation2 + $0x338] sm:$0xff]  ;;  %v2006_v37 = vld [vmem:[#allocation2 + $0x80] sm:$0xff] }
 0x2d7   : > { %1774 = vst [vmem:[#allocation2 + $0x2e0] sm:$0xf0] %v1758_v20  ;;  %v1688_v61 = vsel %vm1682_vm6, %v1675_v44, %v3846_v52  ;;  %2162 = vmatpush.msra.mxu1 %v2015_v19  ;;  %v2076_v27 = vld [vmem:[#allocation2 + $0x2b0] sm:$0xff]  ;;  %v1998_v52 = vld [vmem:[#allocation2 + $0x40] sm:$0xff] }
 0x2d8   : > { %2475 = vmatpush.msk.msrb.mxu3 %vm2105_vm4, %v2101_v12  ;;  %1775 = vst [vmem:[#allocation2 + $0x2e8] sm:$0xf0] %v1759_v36  ;;  %2142 = vmatpush.msra.mxu0 %v2014_v43 }
 0x2d9   : > { %2255 = vmatpush.msrb.mxu2 %v2076_v27  ;;  %1703 = vst [vmem:[#allocation2 + $0x2e0] sm:$0xf] %v1687_v38  ;;  %2163 = vmatpush.msra.mxu1 %v2007_v63  ;;  %v3945_v38 = vld [vmem:[%s3991_s2] sm:$0xff] }
 0x2da   : > { %2273 = vmatpush.msrb.mxu3 %v2093_v30  ;;  %1704 = vst [vmem:[#allocation2 + $0x2e8] sm:$0xf] %v1688_v61  ;;  %2143 = vmatpush.msra.mxu0 %v2006_v37 }
 0x2db   : > { %2164 = vmatpush.msra.mxu1 %v1999_v21  ;;  %2466 = vmatmul.msk.f32.vlgmr.msra.gmra.mxu2 %vm569_vm7, %v3945_v38 }
 0x2dc   : > { %2274 = vmatpush.msrb.mxu3 %v2085_v45  ;;  %2144 = vmatpush.msra.mxu0 %v1998_v52 }
 0x2dd   : > { %v3899_v57 = vpop.permute.xlu1 %1394  ;;  %2165 = vmatpush.msra.mxu1 %v1991_v56  ;;  %v1611_v49 = vpop.permute.xlu0 %1610  ;;  %2468 = vmatmul.msk.f32.vlgmr.msra.gmra.mxu3 %vm569_vm7, %v3945_v38 }
 0x2de   : > { %v1407_v29 = vsel %vm1400_vm11, %v3899_v57, %v3867_v16  ;;  %v1620_v55 = vsel %vm1612_vm9, %v3850_v17, %v1611_v49  ;;  %2145 = vmatpush.msra.mxu0 %v1990_v28  ;;  %v1464_v9 = vpop.permute.xlu2 %1463  ;;  %2464 = vmatmul.msk.f32.vlgmr.msra.gmra.mxu1 %vm569_vm7, %v3945_v38  ;;  %v2036_v49 = vld [vmem:[#allocation2 + $0x170] sm:$0xff] }
 0x2df   : > { %2471 = vmatpush.msk.msrb.mxu1 %vm2105_vm4, %v2099_v35  ;;  %1423 = vst [vmem:[#allocation2 + $0x270] sm:$0xf] %v1407_v29  ;;  %v1476_v32 = vsel %vm1471_vm12, %v3691_v31, %v1464_v9  ;;  %2462 = vmatmul.msk.f32.vlgmr.msra.gmra.mxu0 %vm569_vm7, %v3945_v38  ;;  %v2028_v28 = vld [vmem:[#allocation2 + $0x130] sm:$0xff] }
 0x2e0   : > { %2469 = vmatpush.msk.msrb.mxu0 %vm2105_vm4, %v2098_v10  ;;  %1636 = vst.msk [vmem:[#allocation2 + $0x2b8] sm:$0xf0] %vm274_vm2, %v1620_v55  ;;  %v2082_v17 = vld [vmem:[#allocation2 + $0x2e0] sm:$0xff]  ;;  %v2020_v55 = vld [vmem:[#allocation2 + $0xf0] sm:$0xff] }
 0x2e1   : > { %2233 = vmatpush.msrb.mxu1 %v2091_v59  ;;  %v2083_v18 = vld [vmem:[#allocation2 + $0x2e8] sm:$0xff]  ;;  %1492 = vst [vmem:[#allocation2 + $0x260] sm:$0xf0] %v1476_v32  ;;  %v2012_v59 = vld [vmem:[#allocation2 + $0xb0] sm:$0xff]  ;;  %v2045_v32 = vld [vmem:[#allocation2 + $0x1b8] sm:$0xff] }
 0x2e2   : > { %2213 = vmatpush.msrb.mxu0 %v2090_v54  ;;  %v2004_v54 = vld [vmem:[#allocation2 + $0x70] sm:$0xff] }
 0x2e3   : > { %2234 = vmatpush.msrb.mxu1 %v2083_v18  ;;  %v2037_v18 = vld [vmem:[#allocation2 + $0x178] sm:$0xff] }
 0x2e4   : > { %2214 = vmatpush.msrb.mxu0 %v2082_v17  ;;  %v2029_v17 = vld [vmem:[#allocation2 + $0x138] sm:$0xff] }
 0x2e5   : > { %v1468_v15 = vpop.permute.xlu1 %1467  ;;  %v1466_v58 = vpop.permute.xlu0 %1465 }
 0x2e6   : > { %v1479_v8 = vsel %vm1471_vm12, %v1468_v15, %v3885_v62  ;;  %v1477_v50 = vsel %vm1471_vm12, %v1464_v9, %v1466_v58  ;;  %v1478_v22 = vsel %vm1471_vm12, %v1466_v58, %v1468_v15  ;;  %v3915_v31 = vpop.permute.xlu2 %1114 }
 0x2e7   : > { %1495 = vst.msk [vmem:[#allocation2 + $0x278] sm:$0xf0] %vm274_vm2, %v1479_v8  ;;  %v2077_v3 = vld [vmem:[#allocation2 + $0x2b8] sm:$0xff]  ;;  %v1125_v42 = vsel %vm1118_vm15, %v3534_v33, %v3915_v31 }
 0x2e8   : > { %1493 = vst [vmem:[#allocation2 + $0x268] sm:$0xf0] %v1477_v50  ;;  %2275 = vmatpush.msrb.mxu3 %v2077_v3  ;;  %v2021_v8 = vld [vmem:[#allocation2 + $0xf8] sm:$0xff]  ;;  %v2042_v50 = vld [vmem:[#allocation2 + $0x1a0] sm:$0xff] }
 0x2e9   : > { %1494 = vst [vmem:[#allocation2 + $0x270] sm:$0xf0] %v1478_v22  ;;  %v2043_v22 = vld [vmem:[#allocation2 + $0x1a8] sm:$0xff]  ;;  %v2034_v3 = vld [vmem:[#allocation2 + $0x160] sm:$0xff] }
 0x2ea   : > { %1141 = vst [vmem:[#allocation2 + $0x1f0] sm:$0xf] %v1125_v42  ;;  %v2035_v42 = vld [vmem:[#allocation2 + $0x168] sm:$0xff] }
 0x2ed   : > { %v1399_v13 = vpop.permute.xlu1 %1398  ;;  %v1605_v4 = vpop.permute.xlu0 %1604 }
 0x2ee   : > { %v1408_v11 = vsel %vm1400_vm11, %v3867_v16, %v1399_v13  ;;  %v1617_v14 = vsel %vm1612_vm9, %v3637_v39, %v1605_v4  ;;  %v1618_v7 = vsel %vm1612_vm9, %v1605_v4, %v3877_v46  ;;  %v1252_v62 = vpop.permute.xlu2 %1251  ;;  %v2005_v13 = vld [vmem:[#allocation2 + $0x78] sm:$0xff]  ;;  %v2026_v4 = vld [vmem:[#allocation2 + $0x120] sm:$0xff] }
 0x2ef   : > { %1424 = vst.msk [vmem:[#allocation2 + $0x278] sm:$0xf] %vm209_vm1, %v1408_v11  ;;  %v1264_v33 = vsel %vm1259_vm13, %v3752_v53, %v1252_v62  ;;  %v2027_v11 = vld [vmem:[#allocation2 + $0x128] sm:$0xff] }
 0x2f0   : > { %1633 = vst [vmem:[#allocation2 + $0x2a0] sm:$0xf0] %v1617_v14  ;;  %v2068_v5 = vld [vmem:[#allocation2 + $0x270] sm:$0xff]  ;;  %v1997_v14 = vld [vmem:[#allocation2 + $0x38] sm:$0xff] }
 0x2f1   : > { %1634 = vst [vmem:[#allocation2 + $0x2a8] sm:$0xf0] %v1618_v7  ;;  %2256 = vmatpush.msrb.mxu2 %v2068_v5  ;;  %v2018_v7 = vld [vmem:[#allocation2 + $0xe0] sm:$0xff]  ;;  %v2011_v5 = vld [vmem:[#allocation2 + $0xa8] sm:$0xff] }
 0x2f2   : > { %1280 = vst [vmem:[#allocation2 + $0x220] sm:$0xf] %v1264_v33  ;;  %v2010_v33 = vld [vmem:[#allocation2 + $0xa0] sm:$0xff] }
 0x2f5   : > { %v1256_v6 = vpop.permute.xlu1 %1255  ;;  %v1254_v25 = vpop.permute.xlu0 %1253 }
 0x2f6   : > { %v1265_v16 = vsel %vm1259_vm13, %v1252_v62, %v1254_v25  ;;  %v1266_v39 = vsel %vm1259_vm13, %v1254_v25, %v1256_v6  ;;  %v2069_v1 = vld [vmem:[#allocation2 + $0x278] sm:$0xff]  ;;  %v1188_v12 = vpop.permute.xlu2 %1187  ;;  %v2019_v62 = vld [vmem:[#allocation2 + $0xe8] sm:$0xff] }
 0x2f7   : > { %1281 = vst [vmem:[#allocation2 + $0x228] sm:$0xf] %v1265_v16  ;;  %v2074_v46 = vld [vmem:[#allocation2 + $0x2a0] sm:$0xff]  ;;  %2276 = vmatpush.msrb.mxu3 %v2069_v1  ;;  %v2003_v25 = vld [vmem:[#allocation2 + $0x68] sm:$0xff]  ;;  %v2290_v1 = vld [vmem:[%s3989_s0] sm:$0xff] }
 0x2f8   : > { %1282 = vst [vmem:[#allocation2 + $0x230] sm:$0xf] %v1266_v39  ;;  %2215 = vmatpush.msrb.mxu0 %v2074_v46  ;;  %v2075_v2 = vld [vmem:[#allocation2 + $0x2a8] sm:$0xff]  ;;  %v1994_v16 = vld [vmem:[#allocation2 + $0x20] sm:$0xff]  ;;  %v2292_v46 = vperm.slane %v2290_v1, 0 }
 0x2f9   : > { %2235 = vmatpush.msrb.mxu1 %v2075_v2  ;;  %v1995_v39 = vld [vmem:[#allocation2 + $0x28] sm:$0xff]  ;;  %v2293_v2 = vperm.slane %v2290_v1, 1 }
 0x2fd   : > { %v1393_v53 = vpop.permute.xlu1 %1392  ;;  %v1327_v24 = vpop.permute.xlu0 %1326 }
 0x2fe   : > { %v1405_v48 = vsel %vm1400_vm11, %v3733_v51, %v1393_v53  ;;  %v1406_v23 = vsel %vm1400_vm11, %v1393_v53, %v3899_v57  ;;  %v1337_v41 = vsel %vm1330_vm14, %v3894_v40, %v1327_v24  ;;  %v2044_v57 = vld [vmem:[#allocation2 + $0x1b0] sm:$0xff] }
 0x2ff   : > { %1421 = vst [vmem:[#allocation2 + $0x260] sm:$0xf] %v1405_v48 }
 0x300   : > { %1422 = vst [vmem:[#allocation2 + $0x268] sm:$0xf] %v1406_v23 }
 0x301   : > { %1353 = vst [vmem:[#allocation2 + $0x230] sm:$0xf0] %v1337_v41  ;;  %v2294_v41 = vperm.slane %v2290_v1, 2 }
 0x305   : > { %v1329_v60 = vpop.permute.xlu1 %1328  ;;  %v1258_v47 = vpop.permute.xlu0 %1257 }
 0x306   : > { %v1338_v26 = vsel %vm1330_vm14, %v1327_v24, %v1329_v60  ;;  %v1267_v44 = vsel %vm1259_vm13, %v1256_v6, %v1258_v47  ;;  %v2066_v20 = vld [vmem:[#allocation2 + $0x260] sm:$0xff] }
 0x307   : > { %1354 = vst.msk [vmem:[#allocation2 + $0x238] sm:$0xf0] %vm274_vm2, %v1338_v26  ;;  %2216 = vmatpush.msrb.mxu0 %v2066_v20  ;;  %v2067_v51 = vld [vmem:[#allocation2 + $0x268] sm:$0xff]  ;;  %v2002_v6 = vld [vmem:[#allocation2 + $0x60] sm:$0xff]  ;;  %v2295_v20 = vperm.slane %v2290_v1, 3 }
 0x308   : > { %1283 = vst.msk [vmem:[#allocation2 + $0x238] sm:$0xf] %vm209_vm1, %v1267_v44  ;;  %2236 = vmatpush.msrb.mxu1 %v2067_v51  ;;  %v2060_v36 = vld [vmem:[#allocation2 + $0x230] sm:$0xff] }
 0x309   : > { %2257 = vmatpush.msrb.mxu2 %v2060_v36 }
 0x30d   : > { %v1186_v19 = vpop.permute.xlu1 %1185  ;;  %v1184_v61 = vpop.permute.xlu0 %1183 }
 0x30e   : > { %v1196_v43 = vsel %vm1189_vm0, %v1184_v61, %v1186_v19  ;;  %v1197_v27 = vsel %vm1189_vm0, %v1186_v19, %v1188_v12  ;;  %v2296_v12 = vperm.slane %v2290_v1, 4  ;;  %v2299_v19 = vperm.slane %v2290_v1, 7 }
 0x30f   : > { %1212 = vst [vmem:[#allocation2 + $0x1f0] sm:$0xf0] %v1196_v43  ;;  %v2061_v30 = vld [vmem:[#allocation2 + $0x238] sm:$0xff] }
 0x310   : > { %2277 = vmatpush.msrb.mxu3 %v2061_v30  ;;  %1213 = vst.msk [vmem:[#allocation2 + $0x1f8] sm:$0xf0] %vm274_vm2, %v1197_v27 }
 0x315   : > { %v1117_v63 = vpop.permute.xlu1 %1116  ;;  %v1323_v37 = vpop.permute.xlu0 %1322 }
 0x316   : > { %v1126_v45 = vsel %vm1118_vm15, %v3915_v31, %v1117_v63  ;;  %v1335_v21 = vsel %vm1330_vm14, %v3810_v0, %v1323_v37  ;;  %v1336_v52 = vsel %vm1330_vm14, %v1323_v37, %v3894_v40  ;;  %v2052_v56 = vld [vmem:[#allocation2 + $0x1f0] sm:$0xff]  ;;  %v2013_v31 = vld [vmem:[#allocation2 + $0xb8] sm:$0xff] }
 0x317   : > { %1142 = vst.msk [vmem:[#allocation2 + $0x1f8] sm:$0xf] %vm209_vm1, %v1126_v45  ;;  %2258 = vmatpush.msrb.mxu2 %v2052_v56  ;;  %vm2322_vm1 = vcmask 850944  }
 0x318   : > { %1351 = vst [vmem:[#allocation2 + $0x220] sm:$0xf0] %v1335_v21 }
 0x319   : > { %1352 = vst [vmem:[#allocation2 + $0x228] sm:$0xf0] %v1336_v52  ;;  %2259 = vmatpush.msrb.mxu2 %v2044_v57 }
 0x31b   : > { %2260 = vmatpush.msrb.mxu2 %v2036_v49 }
 0x31d   : > { %2261 = vmatpush.msrb.mxu2 %v2028_v28  ;;  %v1182_v35 = vpop.permute.xlu0 %1181 }
 0x31e   : > { %v1194_v29 = vsel %vm1189_vm0, %v3861_v34, %v1182_v35  ;;  %v1195_v0 = vsel %vm1189_vm0, %v1182_v35, %v1184_v61  ;;  %v2053_v40 = vld [vmem:[#allocation2 + $0x1f8] sm:$0xff]  ;;  %v1996_v34 = vld [vmem:[#allocation2 + $0x30] sm:$0xff]  ;;  %v2298_v61 = vperm.slane %v2290_v1, 6 }
 0x31f   : > { %1210 = vst [vmem:[#allocation2 + $0x1e0] sm:$0xf0] %v1194_v29  ;;  %v2058_v10 = vld [vmem:[#allocation2 + $0x220] sm:$0xff]  ;;  %2262 = vmatpush.msrb.mxu2 %v2020_v55  ;;  %2278 = vmatpush.msrb.mxu3 %v2053_v40 }
 0x320   : > { %1211 = vst [vmem:[#allocation2 + $0x1e8] sm:$0xf0] %v1195_v0  ;;  %2217 = vmatpush.msrb.mxu0 %v2058_v10  ;;  %v2059_v9 = vld [vmem:[#allocation2 + $0x228] sm:$0xff] }
 0x321   : > { %2237 = vmatpush.msrb.mxu1 %v2059_v9  ;;  %2263 = vmatpush.msrb.mxu2 %v2012_v59 }
 0x322   : > { %2279 = vmatpush.msrb.mxu3 %v2045_v32 }
 0x323   : > { %2264 = vmatpush.msrb.mxu2 %v2004_v54 }
 0x324   : > { %2280 = vmatpush.msrb.mxu3 %v2037_v18 }
 0x325   : > { %2265 = vmatpush.msrb.mxu2 %v1996_v34 }
 0x326   : > { %2281 = vmatpush.msrb.mxu3 %v2029_v17  ;;  %v2050_v15 = vld [vmem:[#allocation2 + $0x1e0] sm:$0xff]  ;;  %2474 = vmatmul.msk.f32.vlgmr.msrb.gmra.mxu2 %vm569_vm7, %v3945_v38 }
 0x327   : > { %2218 = vmatpush.msrb.mxu0 %v2050_v15  ;;  %v2051_v58 = vld [vmem:[#allocation2 + $0x1e8] sm:$0xff] }
 0x328   : > { %2238 = vmatpush.msrb.mxu1 %v2051_v58  ;;  %2282 = vmatpush.msrb.mxu3 %v2021_v8 }
 0x329   : > { %2219 = vmatpush.msrb.mxu0 %v2042_v50 }
 0x32a   : > { %2239 = vmatpush.msrb.mxu1 %v2043_v22  ;;  %2283 = vmatpush.msrb.mxu3 %v2013_v31 }
 0x32b   : > { %2220 = vmatpush.msrb.mxu0 %v2034_v3 }
 0x32c   : > { %2240 = vmatpush.msrb.mxu1 %v2035_v42  ;;  %2284 = vmatpush.msrb.mxu3 %v2005_v13 }
 0x32d   : > { %2221 = vmatpush.msrb.mxu0 %v2026_v4 }
 0x32e   : > { %2241 = vmatpush.msrb.mxu1 %v2027_v11  ;;  %2285 = vmatpush.msrb.mxu3 %v1997_v14 }
 0x32f   : > { %2222 = vmatpush.msrb.mxu0 %v2018_v7  ;;  %2476 = vmatmul.msk.f32.vlgmr.msrb.gmra.mxu3 %vm569_vm7, %v3945_v38 }
 0x330   : > { %2242 = vmatpush.msrb.mxu1 %v2019_v62 }
 0x331   : > { %2223 = vmatpush.msrb.mxu0 %v2010_v33 }
 0x332   : > { %2243 = vmatpush.msrb.mxu1 %v2011_v5 }
 0x333   : > { %2224 = vmatpush.msrb.mxu0 %v2002_v6 }
 0x334   : > { %2244 = vmatpush.msrb.mxu1 %v2003_v25 }
 0x335   : > { %2225 = vmatpush.msrb.mxu0 %v1994_v16 }
 0x336   : > { %2245 = vmatpush.msrb.mxu1 %v1995_v39  ;;  %2470 = vmatmul.msk.f32.vlgmr.msrb.gmra.mxu0 %vm569_vm7, %v3945_v38 }
 0x337   : > { %2472 = vmatmul.msk.f32.vlgmr.msrb.gmra.mxu1 %vm569_vm7, %v3945_v38  ;;  %v2297_v38 = vperm.slane %v2290_v1, 5 }
 0x35b   : > { %v2167_v24 = vpop.f32.mrf.mxu1 }
 0x35c   : > { %v2147_v53 = vpop.f32.mrf.mxu0  ;;  %v2309_v23 = vmul.f32 %v2293_v2, %v2167_v24 }
 0x35d   : > { %v2308_v48 = vmul.f32 %v2292_v46, %v2147_v53 }
 0x35e   : > { %v2187_v47 = vpop.f32.mrf.mxu2 }
 0x35f   : > { %v2316_v26 = vadd.f32 %v2309_v23, %v2308_v48  ;;  %v2310_v44 = vmul.f32 %v2294_v41, %v2187_v47 }
 0x360   : > { %v2207_v60 = vpop.f32.mrf.mxu3 }
 0x361   : > { %v2317_v51 = vadd.f32 %v2316_v26, %v2310_v44  ;;  %v2311_v36 = vmul.f32 %v2295_v20, %v2207_v60 }
 0x363   : > { %v2318_v63 = vadd.f32 %v2317_v51, %v2311_v36 }
 0x3a9   : > { %v2267_v30 = vpop.f32.mrf.mxu2 }
 0x3aa   : > { %v2314_v57 = vmul.f32 %v2298_v61, %v2267_v30 }
 0x3b2   : > { %v2287_v43 = vpop.f32.mrf.mxu3 }
 0x3b3   : > { %v2227_v27 = vpop.f32.mrf.mxu0  ;;  %v2315_v52 = vmul.f32 %v2299_v19, %v2287_v43 }
 0x3b4   : > { %v2312_v37 = vmul.f32 %v2296_v12, %v2227_v27  ;;  %v2247_v45 = vpop.f32.mrf.mxu1 }
 0x3b5   : > { %v2313_v21 = vmul.f32 %v2297_v38, %v2247_v45  ;;  %v2323_v28 = vsel %vm2322_vm1, %v2315_v52, 0.0 }
 0x3b6   : > { %v2319_v56 = vadd.f32 %v2318_v63, %v2312_v37 }
 0x3b8   : > { %v2320_v49 = vadd.f32 %v2319_v56, %v2313_v21 }
 0x3ba   : > { %v2321_v35 = vadd.f32 %v2320_v49, %v2314_v57 }
 0x3bc   : > { %v2324_v29 = vadd.f32 %v2323_v28, %v2321_v35 }
 0x3be   : > { %2325 = vadd.xlane.f32.xlu1 %v2324_v29 }
 0x431   : > { %v2326_v0 = vpop.xlane.xlu1 %2325 }
 0x432   : > { %v2327_v55 = vmul.f32 0.001953125, %v2326_v0 }
 0x434   : > { %v2328_v40 = vsub.f32 %v2147_v53, %v2327_v55  ;;  %v2329_v10 = vsub.f32 %v2167_v24, %v2327_v55  ;;  %v2330_v9 = vsub.f32 %v2187_v47, %v2327_v55  ;;  %v2331_v59 = vsub.f32 %v2207_v60, %v2327_v55 }
 0x435   : > { %v2332_v32 = vsub.f32 %v2227_v27, %v2327_v55  ;;  %v2333_v17 = vsub.f32 %v2247_v45, %v2327_v55  ;;  %v2335_v50 = vsub.f32 %v2287_v43, %v2327_v55  ;;  %v2334_v22 = vsub.f32 %v2267_v30, %v2327_v55 }
 0x436   : > { %v2336_v54 = vmul.f32 %v2328_v40, %v2292_v46  ;;  %v2337_v18 = vmul.f32 %v2329_v10, %v2293_v2  ;;  %v2338_v34 = vmul.f32 %v2330_v9, %v2294_v41  ;;  %v2339_v15 = vmul.f32 %v2331_v59, %v2295_v20 }
 0x437   : > { %v2340_v31 = vmul.f32 %v2332_v32, %v2296_v12  ;;  %v2341_v13 = vmul.f32 %v2333_v17, %v2297_v38  ;;  %v2343_v14 = vmul.f32 %v2335_v50, %v2299_v19  ;;  %v2342_v7 = vmul.f32 %v2334_v22, %v2298_v61 }
 0x438   : > { %v2344_v58 = vmul.f32 %v2336_v54, %v2336_v54  ;;  %v2345_v8 = vmul.f32 %v2337_v18, %v2337_v18  ;;  %v2346_v3 = vmul.f32 %v2338_v34, %v2338_v34  ;;  %v2347_v4 = vmul.f32 %v2339_v15, %v2339_v15 }
 0x439   : > { %v2348_v62 = vmul.f32 %v2340_v31, %v2340_v31  ;;  %v2349_v5 = vmul.f32 %v2341_v13, %v2341_v13  ;;  %v2351_v25 = vmul.f32 %v2343_v14, %v2343_v14  ;;  %v2350_v16 = vmul.f32 %v2342_v7, %v2342_v7 }
 0x43a   : > { %v2352_v42 = vadd.f32 %v2345_v8, %v2344_v58 }
 0x43b   : > { %v2358_v46 = vsel %vm2322_vm1, %v2351_v25, 0.0 }
 0x43c   : > { %v2353_v11 = vadd.f32 %v2352_v42, %v2346_v3 }
 0x43e   : > { %v2354_v33 = vadd.f32 %v2353_v11, %v2347_v4 }
 0x440   : > { %v2355_v6 = vadd.f32 %v2354_v33, %v2348_v62 }
 0x442   : > { %v2356_v39 = vadd.f32 %v2355_v6, %v2349_v5 }
 0x444   : > { %v2357_v1 = vadd.f32 %v2356_v39, %v2350_v16 }
 0x446   : > { %v2359_v2 = vadd.f32 %v2358_v46, %v2357_v1 }
 0x448   : > { %2360 = vadd.xlane.f32.xlu2 %v2359_v2 }
 0x4bb   : > { %v2361_v53 = vpop.xlane.xlu2 %2360 }
 0x4bc   : > { %v2362_v24 = vmul.f32 0.001953125, %v2361_v53 }
 0x4be   : > { %v2363_v48 = vadd.f32 1e-05, %v2362_v24 }
 0x4c0   : > { %2515 = vrsqrt.f32 %v2363_v48  ;;  %vm2370_vm7 = vweird.f32 %v2363_v48 }
 0x4c6   : > { %v2516_v23 = vpop.eup %2515 }
 0x4c7   : > { %v2365_v41 = vmul.f32 %v2516_v23, %v2363_v48  ;;  %vm2371_vm2 = vweird.f32 %v2516_v23 }
 0x4c8   : > { %vm2372_vm15 = vmor %vm2370_vm7, %vm2371_vm2 }
 0x4c9   : > { %v2366_v60 = vmul.f32 %v2516_v23, %v2365_v41 }
 0x4cb   : > { %v2367_v47 = vmul.f32 0.5, %v2366_v60 }
 0x4cd   : > { %v2368_v26 = vsub.f32 1.5, %v2367_v47 }
 0x4cf   : > { %v2369_v44 = vmul.f32 %v2516_v23, %v2368_v26 }
 0x4d1   : > { %v2373_v20 = vsel %vm2372_vm15, %v2516_v23, %v2369_v44 }
 0x4d2   : > { %v2374_v51 = vmul.f32 %v2373_v20, %v2328_v40  ;;  %v2375_v36 = vmul.f32 %v2373_v20, %v2329_v10  ;;  %v2376_v12 = vmul.f32 %v2373_v20, %v2330_v9  ;;  %v2377_v38 = vmul.f32 %v2373_v20, %v2331_v59 }
 0x4d3   : > { %v2378_v19 = vmul.f32 %v2373_v20, %v2332_v32  ;;  %v2379_v61 = vmul.f32 %v2373_v20, %v2333_v17  ;;  %v2380_v43 = vmul.f32 %v2373_v20, %v2334_v22  ;;  %v2381_v37 = vmul.f32 %v2373_v20, %v2335_v50 }
 0x4d4   : > { %v2382_v27 = vmax.f32 %v2374_v51, 0.0  ;;  %v2383_v30 = vmax.f32 %v2375_v36, 0.0  ;;  %v2384_v63 = vmax.f32 %v2376_v12, 0.0  ;;  %v2385_v45 = vmax.f32 %v2377_v38, 0.0 }
 0x4d5   : > { %v2386_v21 = vmax.f32 %v2378_v19, 0.0  ;;  %v2387_v52 = vmax.f32 %v2379_v61, 0.0  ;;  %v2388_v56 = vmax.f32 %v2380_v43, 0.0  ;;  %v2389_v57 = vmax.f32 %v2381_v37, 0.0 }
 0x4d6   : > { %2390 = vst [vmem:[%s170_s26] sm:$0xff] %v2382_v27 }
 0x4d7   : > { %2391 = vst [vmem:[%s170_s26 + $0x8] sm:$0xff] %v2383_v30 }
 0x4d8   : > { %2392 = vst [vmem:[%s170_s26 + $0x10] sm:$0xff] %v2384_v63 }
 0x4d9   : > { %2393 = vst [vmem:[%s170_s26 + $0x18] sm:$0xff] %v2385_v45 }
 0x4da   : > { %2394 = vst [vmem:[%s170_s26 + $0x20] sm:$0xff] %v2386_v21 }
 0x4db   : > { %2395 = vst [vmem:[%s170_s26 + $0x28] sm:$0xff] %v2387_v52 }
 0x4dc   : > { %2396 = vst [vmem:[%s170_s26 + $0x30] sm:$0xff] %v2388_v56 }
 0x4dd   : > { %2397 = vst.msk [vmem:[%s170_s26 + $0x38] sm:$0xff] %vm2322_vm1, %v2389_v57 }
 0x4de PF: > { %s13_s12 = sadd.s32 1, %s2523_s12  }
 0x4df   : > { %p10_p4 = scmp.ge.s32.totalorder %s13_s12, 4  }
 0x4e1   :  { %12 = sbr.rel (!%p10_p4) target bundleno = 1 (0x1), region = 156 }

</bundles_post_ra>
